<compile_context>
chip_gen: v7x
topology: tpu7x:2x2x1
jax: 0.10.0
libtpu: 0.0.40
codegen_flags: <defaults>
</compile_context>

<pallas_src>
import math

import jax
import jax.numpy as jnp
from jax.experimental import pallas as pl
from jax.experimental.pallas import tpu as pltpu

# ---- model dims (small, deterministic) ----
B = 2          # batch
S_DEC = 8      # decoder sequence length
S_ENC = 8      # encoder sequence length
D_MODEL = 32
D_FF = 64
N_HEADS = 4
D_K = 8
D_V = 8
EPS = 1e-5     # nn.LayerNorm default

_HDK = N_HEADS * D_K   # 32
_HDV = N_HEADS * D_V   # 32

# ---- packed weight slab (D_MODEL, 320): lane offsets, zero padding waste ----
_OFF_QKV1 = 0                      # fused self-attn QKV (32, 96)
_OFF_Q2 = _OFF_QKV1 + 3 * _HDK     # cross-attn Q        (32, 32)  -> 96
_OFF_KV2 = _OFF_Q2 + _HDK          # fused cross KV      (32, 64)  -> 128 (aligned)
_OFF_O1 = _OFF_KV2 + 2 * _HDK      # self-attn out proj  (32, 32)  -> 192
_OFF_O2 = _OFF_O1 + D_MODEL        # cross-attn out proj (32, 32)  -> 224
_OFF_FF1 = _OFF_O2 + D_MODEL       # FFN layer-1         (32, 64)  -> 256 (aligned)
_W_SLAB_COLS = _OFF_FF1 + D_FF     # 320

# ---- fused lane-dense output layout: (bb, S_DEC, 128) ----
_PACK_OUT = 0                       # decoder output, lanes [0, 32)
_PACK_A1 = D_MODEL                  # self-attn map,  lanes [32, 64)
_PACK_A2 = _PACK_A1 + N_HEADS * S_DEC   # cross-attn map, lanes [64, 96)
_PACK_END = _PACK_A2 + N_HEADS * S_ENC  # 96
_PACK_W = 128                       # pad lanes [96, 128) with zeros


def _make_kernel(bb):
    """Build the kernel for a batch block of size `bb`."""
    inv_sqrt_dk = 1.0 / math.sqrt(D_K)
    c_gelu = math.sqrt(2.0 / math.pi)

    def layer_norm(y, g, b):
        mu = jnp.mean(y, axis=-1, keepdims=True)
        var = jnp.mean(jnp.square(y - mu), axis=-1, keepdims=True)
        return (y - mu) * jax.lax.rsqrt(var + EPS) * g + b

    def mha(q3, k3, v3, mask):
        # q3: (bb, sq, H*Dk); k3/v3: (bb, sk, H*Dk / H*Dv); mask: (bb, sq, sk) f32
        sq, sk = q3.shape[1], k3.shape[1]
        scores = []
        for h in range(N_HEADS):
            qh = q3[:, :, h * D_K:(h + 1) * D_K]
            kh = k3[:, :, h * D_K:(h + 1) * D_K]
            scores.append(jnp.einsum('bqd,bkd->bqk', qh, kh,
                                     preferred_element_type=jnp.float32))
        # all-head score tensor, head-major along lanes: (bb, sq, H*sk)
        s = jnp.concatenate(scores, axis=-1) * inv_sqrt_dk
        s4 = s.reshape(bb, sq, N_HEADS, sk)
        s4 = jnp.where(mask[:, :, None, :] != 0.0, jnp.float32(-1e9), s4)
        # ONE batched masked softmax for all heads; exact normalization so the
        # returned attention maps sum to 1 (approx reciprocal was too coarse).
        m = jnp.max(s4, axis=-1, keepdims=True)
        e = jnp.exp(s4 - m)
        a4 = e / jnp.sum(e, axis=-1, keepdims=True)
        a = a4.reshape(bb, sq, N_HEADS * sk)      # flat, ready for packed store
        ctxs = []
        for h in range(N_HEADS):
            ah = a[:, :, h * sk:(h + 1) * sk]
            vh = v3[:, :, h * D_V:(h + 1) * D_V]
            ctxs.append(jnp.einsum('bqk,bkd->bqd', ah, vh,
                                   preferred_element_type=jnp.float32))
        ctx = jnp.concatenate(ctxs, axis=-1).reshape(bb * sq, _HDV)
        return ctx, a

    def kernel(xd_ref, xe_ref, msk_ref, w_ref, w2_ref, vec_ref, out_ref):
        # ---- packed parameters (loaded once; all slices static) ----
        w_qkv1 = w_ref[:, _OFF_QKV1:_OFF_QKV1 + 3 * _HDK]
        w_q2 = w_ref[:, _OFF_Q2:_OFF_Q2 + _HDK]
        w_kv2 = w_ref[:, _OFF_KV2:_OFF_KV2 + 2 * _HDK]
        w_o1 = w_ref[:, _OFF_O1:_OFF_O1 + D_MODEL]
        w_o2 = w_ref[:, _OFF_O2:_OFF_O2 + D_MODEL]
        w_ff1 = w_ref[:, _OFF_FF1:_OFF_FF1 + D_FF]
        w_ff2 = w2_ref[...]

        b_qkv1 = vec_ref[0:1, 0:3 * _HDK]
        b_q2 = vec_ref[1:2, 0:_HDK]
        b_kv2 = vec_ref[2:3, 0:2 * _HDK]
        b_o1 = vec_ref[3:4, 0:D_MODEL]
        b_o2 = vec_ref[4:5, 0:D_MODEL]
        b_ff1 = vec_ref[5:6, 0:D_FF]
        b_ff2 = vec_ref[6:7, 0:D_MODEL]
        g1, be1 = vec_ref[7:8, 0:D_MODEL], vec_ref[8:9, 0:D_MODEL]
        g2, be2 = vec_ref[9:10, 0:D_MODEL], vec_ref[10:11, 0:D_MODEL]
        g3, be3 = vec_ref[11:12, 0:D_MODEL], vec_ref[12:13, 0:D_MODEL]

        mask_d = msk_ref[:, :, 0:S_DEC]                # (bb, S_DEC, S_DEC)
        mask_e = msk_ref[:, :, S_DEC:S_DEC + S_ENC]    # (bb, S_DEC, S_ENC)
        xd = xd_ref[...].reshape(bb * S_DEC, D_MODEL)
        xe = xe_ref[...].reshape(bb * S_ENC, D_MODEL)

        # ---- masked self-attention (fused QKV projection) ----
        qkv = jnp.dot(xd, w_qkv1, preferred_element_type=jnp.float32) + b_qkv1
        qkv3 = qkv.reshape(bb, S_DEC, 3 * _HDK)
        ctx1, attn1 = mha(qkv3[:, :, 0:_HDK],
                          qkv3[:, :, _HDK:2 * _HDK],
                          qkv3[:, :, 2 * _HDK:3 * _HDK], mask_d)
        att_out1 = jnp.dot(ctx1, w_o1, preferred_element_type=jnp.float32) + b_o1
        # (dropout1: identity in eval mode)
        out1 = layer_norm(att_out1 + xd, g1, be1)

        # ---- encoder/decoder cross-attention (fused KV projection) ----
        q2 = jnp.dot(out1, w_q2, preferred_element_type=jnp.float32) + b_q2
        kv2 = jnp.dot(xe, w_kv2, preferred_element_type=jnp.float32) + b_kv2
        kv23 = kv2.reshape(bb, S_ENC, 2 * _HDK)
        ctx2, attn2 = mha(q2.reshape(bb, S_DEC, _HDK),
                          kv23[:, :, 0:_HDK],
                          kv23[:, :, _HDK:2 * _HDK], mask_e)
        att_out2 = jnp.dot(ctx2, w_o2, preferred_element_type=jnp.float32) + b_o2
        # (dropout2: identity in eval mode)
        out2 = layer_norm(att_out2 + out1, g2, be2)

        # ---- feed-forward with tanh-GELU ("GaussianRectifier") ----
        h1 = jnp.dot(out2, w_ff1, preferred_element_type=jnp.float32) + b_ff1
        gel = 0.5 * h1 * (1.0 + jnp.tanh(c_gelu * (h1 + 0.044715 * h1 * h1 * h1)))
        ff = jnp.dot(gel, w_ff2, preferred_element_type=jnp.float32) + b_ff2
        # NOTE: the reference module adds the *pre-norm2* cross-attention
        # output here (out_ff + out_dec_enc), not out2 -- preserved exactly.
        out3 = layer_norm(ff + att_out2, g3, be3)

        # ---- ONE lane-dense 128-wide packed store ----
        pad = jnp.zeros((bb, S_DEC, _PACK_W - _PACK_END), jnp.float32)
        out_ref[...] = jnp.concatenate(
            [out3.reshape(bb, S_DEC, D_MODEL), attn1, attn2, pad], axis=-1)

    return kernel


# ---------- parameter packing ----------
def pack_params(p):
    (wq1, bq1, wk1, bk1, wv1, bv1, wo1, bo1,
     wq2, bq2, wk2, bk2, wv2, bv2, wo2, bo2,
     w1, b1, w2, b2, g1, be1, g2, be2, g3, be3) = p

    # (32, 320) weight slab, zero lane waste
    w_slab = jnp.concatenate(
        [jnp.concatenate([wq1, wk1, wv1], axis=1),   # [  0,  96)
         wq2,                                        # [ 96, 128)
         jnp.concatenate([wk2, wv2], axis=1),        # [128, 192)
         wo1,                                        # [192, 224)
         wo2,                                        # [224, 256)
         w1],                                        # [256, 320)
        axis=1)

    vec = jnp.zeros((16, 128), jnp.float32)
    rows = [jnp.concatenate([bq1, bk1, bv1]), bq2, jnp.concatenate([bk2, bv2]),
            bo1, bo2, b1, b2, g1, be1, g2, be2, g3, be3]
    for i, r in enumerate(rows):
        vec = vec.at[i, 0:r.shape[0]].set(r)

    return w_slab, w2, vec


def decoder_layer_pallas(x_dec, in_mask_dec, x_enc, out_mask_enc, params,
                         batch_block=None):
    """x_dec: (B, S_DEC, D) f32; in_mask_dec: (B, S_DEC, S_DEC) int/f32;
    x_enc: (B, S_ENC, D) f32; out_mask_enc: (B, S_DEC, S_ENC) int/f32.
    Returns (out_dec, attn_dec, attn_dec_enc)."""
    b = x_dec.shape[0]
    # one grid step over the whole batch by default (overhead-bound regime);
    # pass batch_block=1 to shard the batch across TensorCores for large B.
    bb = b if batch_block is None else batch_block
    if b % bb != 0:
        bb = b

    w_slab, w_ff2, vec_slab = pack_params(params)
    mask_slab = jnp.concatenate(
        [in_mask_dec.astype(jnp.float32), out_mask_enc.astype(jnp.float32)],
        axis=-1)                                   # (B, S_DEC, S_DEC + S_ENC)

    kernel = _make_kernel(bb)
    grid = (b // bb,)

    in_specs = [
        pl.BlockSpec((bb, S_DEC, D_MODEL), lambda i: (i, 0, 0)),         # x_dec
        pl.BlockSpec((bb, S_ENC, D_MODEL), lambda i: (i, 0, 0)),         # x_enc
        pl.BlockSpec((bb, S_DEC, S_DEC + S_ENC), lambda i: (i, 0, 0)),   # masks
        pl.BlockSpec((D_MODEL, _W_SLAB_COLS), lambda i: (0, 0)),         # weights
        pl.BlockSpec((D_FF, D_MODEL), lambda i: (0, 0)),                 # FFN W2
        pl.BlockSpec((16, 128), lambda i: (0, 0)),                       # bias/LN
    ]
    out_specs = pl.BlockSpec((bb, S_DEC, _PACK_W), lambda i: (i, 0, 0))
    out_shape = jax.ShapeDtypeStruct((b, S_DEC, _PACK_W), jnp.float32)

    packed = pl.pallas_call(
        kernel,
        out_shape=out_shape,
        grid_spec=pltpu.PrefetchScalarGridSpec(
            num_scalar_prefetch=0,
            grid=grid,
            in_specs=in_specs,
            out_specs=out_specs,
        ),
        compiler_params=pltpu.CompilerParams(
            dimension_semantics=("parallel",)),
    )(x_dec, x_enc, mask_slab, w_slab, w_ff2, vec_slab)

    # cheap XLA unpacking of the lane-dense slab
    out = packed[:, :, _PACK_OUT:_PACK_OUT + D_MODEL]
    attn1 = packed[:, :, _PACK_A1:_PACK_A1 + N_HEADS * S_DEC]
    attn1 = jnp.transpose(attn1.reshape(b, S_DEC, N_HEADS, S_DEC), (0, 2, 1, 3))
    attn2 = packed[:, :, _PACK_A2:_PACK_A2 + N_HEADS * S_ENC]
    attn2 = jnp.transpose(attn2.reshape(b, S_DEC, N_HEADS, S_ENC), (0, 2, 1, 3))
    return out, attn1, attn2


# ---------- pure-JAX reference (for correctness check) ----------
def _layer_norm_ref(y, g, b):
    mu = jnp.mean(y, axis=-1, keepdims=True)
    var = jnp.mean((y - mu) ** 2, axis=-1, keepdims=True)
    return (y - mu) / jnp.sqrt(var + EPS) * g + b


def _multihead_ref(q_in, kv_in, mask, wq, bq, wk, bk, wv, bv, wo, bo):
    bsz, sq, _ = q_in.shape
    sk = kv_in.shape[1]
    q = (q_in @ wq + bq).reshape(bsz, sq, N_HEADS, D_K).transpose(0, 2, 1, 3)
    k = (kv_in @ wk + bk).reshape(bsz, sk, N_HEADS, D_K).transpose(0, 2, 1, 3)
    v = (kv_in @ wv + bv).reshape(bsz, sk, N_HEADS, D_V).transpose(0, 2, 1, 3)
    scores = jnp.einsum('bhqd,bhkd->bhqk', q, k) / math.sqrt(D_K)
    scores = jnp.where(mask[:, None, :, :] != 0, -1e9, scores)
    attn = jax.nn.softmax(scores, axis=-1)
    ctx = jnp.einsum('bhqk,bhkd->bhqd', attn, v)
    ctx = ctx.transpose(0, 2, 1, 3).reshape(bsz, sq, _HDV)
    return ctx @ wo + bo, attn


def decoder_layer_ref(x_dec, in_mask_dec, x_enc, out_mask_enc, p):
    (wq1, bq1, wk1, bk1, wv1, bv1, wo1, bo1,
     wq2, bq2, wk2, bk2, wv2, bv2, wo2, bo2,
     w1, b1, w2, b2, g1, be1, g2, be2, g3, be3) = p
    att1, attn_dec = _multihead_ref(x_dec, x_dec, in_mask_dec,
                                    wq1, bq1, wk1, bk1, wv1, bv1, wo1, bo1)
    out1 = _layer_norm_ref(att1 + x_dec, g1, be1)
    att2, attn_de = _multihead_ref(out1, x_enc, out_mask_enc,
                                   wq2, bq2, wk2, bk2, wv2, bv2, wo2, bo2)
    out2 = _layer_norm_ref(att2 + out1, g2, be2)
    h1 = out2 @ w1 + b1
    c = math.sqrt(2.0 / math.pi)
    gel = 0.5 * h1 * (1.0 + jnp.tanh(c * (h1 + 0.044715 * h1 ** 3)))
    ff = gel @ w2 + b2
    out3 = _layer_norm_ref(ff + att2, g3, be3)   # residual uses pre-norm2 att2
    return out3, attn_dec, attn_de


def init_params(key):
    ks = jax.random.split(key, 26)
    sc = 0.05

    def w(k, shape):
        return sc * jax.random.normal(k, shape, jnp.float32)

    def bvec(k, n):
        return 0.02 * jax.random.normal(k, (n,), jnp.float32)

    wq1 = w(ks[0], (D_MODEL, _HDK)); bq1 = bvec(ks[1], _HDK)
    wk1 = w(ks[2], (D_MODEL, _HDK)); bk1 = bvec(ks[3], _HDK)
    wv1 = w(ks[4], (D_MODEL, _HDV)); bv1 = bvec(ks[5], _HDV)
    wo1 = w(ks[6], (_HDV, D_MODEL)); bo1 = bvec(ks[7], D_MODEL)
    wq2 = w(ks[8], (D_MODEL, _HDK)); bq2 = bvec(ks[9], _HDK)
    wk2 = w(ks[10], (D_MODEL, _HDK)); bk2 = bvec(ks[11], _HDK)
    wv2 = w(ks[12], (D_MODEL, _HDV)); bv2 = bvec(ks[13], _HDV)
    wo2 = w(ks[14], (_HDV, D_MODEL)); bo2 = bvec(ks[15], D_MODEL)
    w1 = w(ks[16], (D_MODEL, D_FF)); b1 = bvec(ks[17], D_FF)
    w2 = w(ks[18], (D_FF, D_MODEL)); b2 = bvec(ks[19], D_MODEL)
    g1 = 1.0 + bvec(ks[20], D_MODEL); be1 = bvec(ks[21], D_MODEL)
    g2 = 1.0 + bvec(ks[22], D_MODEL); be2 = bvec(ks[23], D_MODEL)
    g3 = 1.0 + bvec(ks[24], D_MODEL); be3 = bvec(ks[25], D_MODEL)
    return (wq1, bq1, wk1, bk1, wv1, bv1, wo1, bo1,
            wq2, bq2, wk2, bk2, wv2, bv2, wo2, bo2,
            w1, b1, w2, b2, g1, be1, g2, be2, g3, be3)


if __name__ == "__main__":
    key = jax.random.PRNGKey(0)
    kxd, kxe, kp = jax.random.split(key, 3)
    x_dec = jax.random.normal(kxd, (B, S_DEC, D_MODEL), jnp.float32)
    x_enc = jax.random.normal(kxe, (B, S_ENC, D_MODEL), jnp.float32)

    # decoder self-attention: causal mask (nonzero == masked)
    causal = jnp.triu(jnp.ones((S_DEC, S_DEC), jnp.int32), k=1)
    in_mask_dec = jnp.broadcast_to(causal[None], (B, S_DEC, S_DEC))

    # encoder-decoder attention: padding mask over encoder positions
    valid_len = jnp.array([5, 7], dtype=jnp.int32)
    col = jnp.arange(S_ENC)[None, None, :]
    out_mask_enc = jnp.broadcast_to(
        (col >= valid_len[:, None, None]).astype(jnp.int32), (B, S_DEC, S_ENC))

    params = init_params(kp)

    out, attn_dec, attn_de = decoder_layer_pallas(
        x_dec, in_mask_dec, x_enc, out_mask_enc, params)
    out = jax.block_until_ready(out)
    attn_dec = jax.block_until_ready(attn_dec)
    attn_de = jax.block_until_ready(attn_de)

    # Full-precision f32 reference: the in-kernel MXU matmuls are (near-)full
    # f32, while XLA's default f32 matmul precision on TPU is lower, so force
    # "highest" for the reference only (never inside the Mosaic kernel).
    with jax.default_matmul_precision("highest"):
        out_r, attn_dec_r, attn_de_r = decoder_layer_ref(
            x_dec, in_mask_dec, x_enc, out_mask_enc, params)

    # tolerance covers residual MXU-pass precision differences between the
    # Pallas matmuls and the XLA reference path
    assert jnp.allclose(out, out_r, atol=1e-2, rtol=1e-2), "decoder output mismatch"
    assert jnp.allclose(attn_dec, attn_dec_r, atol=1e-2, rtol=1e-2), "self-attn mismatch"
    assert jnp.allclose(attn_de, attn_de_r, atol=1e-2, rtol=1e-2), "cross-attn mismatch"

    print("KERNEL_OK")
</pallas_src>

<mosaic_0001>
module attributes {stable_mosaic.version = 11 : i64} {
  func.func @kernel(%arg0: i32, %arg1: memref<2x8x32xf32, #tpu.memory_space<vmem>>, %arg2: memref<2x8x32xf32, #tpu.memory_space<vmem>>, %arg3: memref<2x8x16xf32, #tpu.memory_space<vmem>>, %arg4: memref<32x320xf32, #tpu.memory_space<vmem>>, %arg5: memref<64x32xf32, #tpu.memory_space<vmem>>, %arg6: memref<16x128xf32, #tpu.memory_space<vmem>>, %arg7: memref<2x8x128xf32, #tpu.memory_space<vmem>>) attributes {dimension_semantics = [#tpu.dimension_semantics<parallel>], iteration_bounds = array<i64: 1>, scalar_prefetch = 0 : i64, scratch_operands = 0 : i64, tpu.core_type = #tpu.core_type<tc>, window_params = [{transform_indices = @transform_0, window_bounds = array<i64: 2, 8, 32>}, {transform_indices = @transform_1, window_bounds = array<i64: 2, 8, 32>}, {transform_indices = @transform_2, window_bounds = array<i64: 2, 8, 16>}, {pipeline_mode = #tpu.pipeline_mode<synchronous>, transform_indices = @transform_3, window_bounds = array<i64: 32, 320>}, {pipeline_mode = #tpu.pipeline_mode<synchronous>, transform_indices = @transform_4, window_bounds = array<i64: 64, 32>}, {pipeline_mode = #tpu.pipeline_mode<synchronous>, transform_indices = @transform_5, window_bounds = array<i64: 16, 128>}, {transform_indices = @transform_6, window_bounds = array<i64: 2, 8, 128>}]} {
    %c0 = arith.constant 0 : index
    %c0_0 = arith.constant 0 : index
    %0 = vector.load %arg4[%c0, %c0_0] : memref<32x320xf32, #tpu.memory_space<vmem>>, vector<32x96xf32>
    %c0_1 = arith.constant 0 : index
    %c96 = arith.constant 96 : index
    %1 = vector.load %arg4[%c0_1, %c96] : memref<32x320xf32, #tpu.memory_space<vmem>>, vector<32x32xf32>
    %c0_2 = arith.constant 0 : index
    %c128 = arith.constant 128 : index
    %2 = vector.load %arg4[%c0_2, %c128] : memref<32x320xf32, #tpu.memory_space<vmem>>, vector<32x64xf32>
    %c0_3 = arith.constant 0 : index
    %c192 = arith.constant 192 : index
    %3 = vector.load %arg4[%c0_3, %c192] : memref<32x320xf32, #tpu.memory_space<vmem>>, vector<32x32xf32>
    %c0_4 = arith.constant 0 : index
    %c224 = arith.constant 224 : index
    %4 = vector.load %arg4[%c0_4, %c224] : memref<32x320xf32, #tpu.memory_space<vmem>>, vector<32x32xf32>
    %c0_5 = arith.constant 0 : index
    %c256 = arith.constant 256 : index
    %5 = vector.load %arg4[%c0_5, %c256] : memref<32x320xf32, #tpu.memory_space<vmem>>, vector<32x64xf32>
    %c0_6 = arith.constant 0 : index
    %c0_7 = arith.constant 0 : index
    %6 = vector.load %arg5[%c0_6, %c0_7] : memref<64x32xf32, #tpu.memory_space<vmem>>, vector<64x32xf32>
    %c0_8 = arith.constant 0 : index
    %c0_9 = arith.constant 0 : index
    %7 = vector.load %arg6[%c0_8, %c0_9] : memref<16x128xf32, #tpu.memory_space<vmem>>, vector<1x96xf32>
    %c1 = arith.constant 1 : index
    %c0_10 = arith.constant 0 : index
    %8 = vector.load %arg6[%c1, %c0_10] : memref<16x128xf32, #tpu.memory_space<vmem>>, vector<1x32xf32>
    %c2 = arith.constant 2 : index
    %c0_11 = arith.constant 0 : index
    %9 = vector.load %arg6[%c2, %c0_11] : memref<16x128xf32, #tpu.memory_space<vmem>>, vector<1x64xf32>
    %c3 = arith.constant 3 : index
    %c0_12 = arith.constant 0 : index
    %10 = vector.load %arg6[%c3, %c0_12] : memref<16x128xf32, #tpu.memory_space<vmem>>, vector<1x32xf32>
    %c4 = arith.constant 4 : index
    %c0_13 = arith.constant 0 : index
    %11 = vector.load %arg6[%c4, %c0_13] : memref<16x128xf32, #tpu.memory_space<vmem>>, vector<1x32xf32>
    %c5 = arith.constant 5 : index
    %c0_14 = arith.constant 0 : index
    %12 = vector.load %arg6[%c5, %c0_14] : memref<16x128xf32, #tpu.memory_space<vmem>>, vector<1x64xf32>
    %c6 = arith.constant 6 : index
    %c0_15 = arith.constant 0 : index
    %13 = vector.load %arg6[%c6, %c0_15] : memref<16x128xf32, #tpu.memory_space<vmem>>, vector<1x32xf32>
    %c7 = arith.constant 7 : index
    %c0_16 = arith.constant 0 : index
    %14 = vector.load %arg6[%c7, %c0_16] : memref<16x128xf32, #tpu.memory_space<vmem>>, vector<1x32xf32>
    %c8 = arith.constant 8 : index
    %c0_17 = arith.constant 0 : index
    %15 = vector.load %arg6[%c8, %c0_17] : memref<16x128xf32, #tpu.memory_space<vmem>>, vector<1x32xf32>
    %c9 = arith.constant 9 : index
    %c0_18 = arith.constant 0 : index
    %16 = vector.load %arg6[%c9, %c0_18] : memref<16x128xf32, #tpu.memory_space<vmem>>, vector<1x32xf32>
    %c10 = arith.constant 10 : index
    %c0_19 = arith.constant 0 : index
    %17 = vector.load %arg6[%c10, %c0_19] : memref<16x128xf32, #tpu.memory_space<vmem>>, vector<1x32xf32>
    %c11 = arith.constant 11 : index
    %c0_20 = arith.constant 0 : index
    %18 = vector.load %arg6[%c11, %c0_20] : memref<16x128xf32, #tpu.memory_space<vmem>>, vector<1x32xf32>
    %c12 = arith.constant 12 : index
    %c0_21 = arith.constant 0 : index
    %19 = vector.load %arg6[%c12, %c0_21] : memref<16x128xf32, #tpu.memory_space<vmem>>, vector<1x32xf32>
    %c0_22 = arith.constant 0 : index
    %c0_23 = arith.constant 0 : index
    %c0_24 = arith.constant 0 : index
    %20 = vector.load %arg3[%c0_22, %c0_23, %c0_24] : memref<2x8x16xf32, #tpu.memory_space<vmem>>, vector<2x8x8xf32>
    %c0_25 = arith.constant 0 : index
    %c0_26 = arith.constant 0 : index
    %c8_27 = arith.constant 8 : index
    %21 = vector.load %arg3[%c0_25, %c0_26, %c8_27] : memref<2x8x16xf32, #tpu.memory_space<vmem>>, vector<2x8x8xf32>
    %c0_28 = arith.constant 0 : index
    %c0_29 = arith.constant 0 : index
    %c0_30 = arith.constant 0 : index
    %22 = vector.load %arg1[%c0_28, %c0_29, %c0_30] : memref<2x8x32xf32, #tpu.memory_space<vmem>>, vector<2x8x32xf32>
    %23 = vector.shape_cast %22 : vector<2x8x32xf32> to vector<16x32xf32>
    %c0_31 = arith.constant 0 : index
    %c0_32 = arith.constant 0 : index
    %c0_33 = arith.constant 0 : index
    %24 = vector.load %arg2[%c0_31, %c0_32, %c0_33] : memref<2x8x32xf32, #tpu.memory_space<vmem>>, vector<2x8x32xf32>
    %25 = vector.shape_cast %24 : vector<2x8x32xf32> to vector<16x32xf32>
    %cst = arith.constant dense<0.000000e+00> : vector<16x96xf32>
    %26 = tpu.matmul %23, %0, %cst {dimension_numbers = #tpu.dot_dimension_numbers<[1], [0], [0], [1], [0, 0, 1, 1], [], []>} : vector<16x32xf32>, vector<32x96xf32>, vector<16x96xf32> -> vector<16x96xf32>
    %27 = vector.broadcast %7 : vector<1x96xf32> to vector<16x96xf32>
    %28 = arith.addf %26, %27 : vector<16x96xf32>
    %29 = vector.shape_cast %28 : vector<16x96xf32> to vector<2x8x96xf32>
    %30 = vector.extract_strided_slice %29 {offsets = [0, 0, 0], sizes = [2, 8, 32], strides = [1, 1, 1]} : vector<2x8x96xf32> to vector<2x8x32xf32>
    %31 = vector.extract_strided_slice %29 {offsets = [0, 0, 32], sizes = [2, 8, 32], strides = [1, 1, 1]} : vector<2x8x96xf32> to vector<2x8x32xf32>
    %32 = vector.extract_strided_slice %29 {offsets = [0, 0, 64], sizes = [2, 8, 32], strides = [1, 1, 1]} : vector<2x8x96xf32> to vector<2x8x32xf32>
    %33 = vector.extract_strided_slice %30 {offsets = [0, 0, 0], sizes = [2, 8, 8], strides = [1, 1, 1]} : vector<2x8x32xf32> to vector<2x8x8xf32>
    %34 = vector.extract_strided_slice %31 {offsets = [0, 0, 0], sizes = [2, 8, 8], strides = [1, 1, 1]} : vector<2x8x32xf32> to vector<2x8x8xf32>
    "tpu.trace_start"() <{level = 10 : i32, message = "bqd,bkd->bqk"}> : () -> ()
    %cst_34 = arith.constant dense<0.000000e+00> : vector<2x8x8xf32>
    %35 = tpu.matmul %33, %34, %cst_34 {dimension_numbers = #tpu.dot_dimension_numbers<[2], [2], [1], [1], [0, 0, 0, 1, 1, 1], [0], [0]>} : vector<2x8x8xf32>, vector<2x8x8xf32>, vector<2x8x8xf32> -> vector<2x8x8xf32>
    "tpu.trace_stop"() : () -> ()
    %36 = vector.extract_strided_slice %30 {offsets = [0, 0, 8], sizes = [2, 8, 8], strides = [1, 1, 1]} : vector<2x8x32xf32> to vector<2x8x8xf32>
    %37 = vector.extract_strided_slice %31 {offsets = [0, 0, 8], sizes = [2, 8, 8], strides = [1, 1, 1]} : vector<2x8x32xf32> to vector<2x8x8xf32>
    "tpu.trace_start"() <{level = 10 : i32, message = "bqd,bkd->bqk"}> : () -> ()
    %cst_35 = arith.constant dense<0.000000e+00> : vector<2x8x8xf32>
    %38 = tpu.matmul %36, %37, %cst_35 {dimension_numbers = #tpu.dot_dimension_numbers<[2], [2], [1], [1], [0, 0, 0, 1, 1, 1], [0], [0]>} : vector<2x8x8xf32>, vector<2x8x8xf32>, vector<2x8x8xf32> -> vector<2x8x8xf32>
    "tpu.trace_stop"() : () -> ()
    %39 = vector.extract_strided_slice %30 {offsets = [0, 0, 16], sizes = [2, 8, 8], strides = [1, 1, 1]} : vector<2x8x32xf32> to vector<2x8x8xf32>
    %40 = vector.extract_strided_slice %31 {offsets = [0, 0, 16], sizes = [2, 8, 8], strides = [1, 1, 1]} : vector<2x8x32xf32> to vector<2x8x8xf32>
    "tpu.trace_start"() <{level = 10 : i32, message = "bqd,bkd->bqk"}> : () -> ()
    %cst_36 = arith.constant dense<0.000000e+00> : vector<2x8x8xf32>
    %41 = tpu.matmul %39, %40, %cst_36 {dimension_numbers = #tpu.dot_dimension_numbers<[2], [2], [1], [1], [0, 0, 0, 1, 1, 1], [0], [0]>} : vector<2x8x8xf32>, vector<2x8x8xf32>, vector<2x8x8xf32> -> vector<2x8x8xf32>
    "tpu.trace_stop"() : () -> ()
    %42 = vector.extract_strided_slice %30 {offsets = [0, 0, 24], sizes = [2, 8, 8], strides = [1, 1, 1]} : vector<2x8x32xf32> to vector<2x8x8xf32>
    %43 = vector.extract_strided_slice %31 {offsets = [0, 0, 24], sizes = [2, 8, 8], strides = [1, 1, 1]} : vector<2x8x32xf32> to vector<2x8x8xf32>
    "tpu.trace_start"() <{level = 10 : i32, message = "bqd,bkd->bqk"}> : () -> ()
    %cst_37 = arith.constant dense<0.000000e+00> : vector<2x8x8xf32>
    %44 = tpu.matmul %42, %43, %cst_37 {dimension_numbers = #tpu.dot_dimension_numbers<[2], [2], [1], [1], [0, 0, 0, 1, 1, 1], [0], [0]>} : vector<2x8x8xf32>, vector<2x8x8xf32>, vector<2x8x8xf32> -> vector<2x8x8xf32>
    "tpu.trace_stop"() : () -> ()
    %45 = tpu.concatenate %35, %38, %41, %44 in 2 : vector<2x8x8xf32>, vector<2x8x8xf32>, vector<2x8x8xf32>, vector<2x8x8xf32> -> vector<2x8x32xf32>
    %cst_38 = arith.constant 0.353553385 : f32
    %46 = vector.broadcast %cst_38 : f32 to vector<2x8x32xf32>
    %47 = arith.mulf %45, %46 : vector<2x8x32xf32>
    %48 = vector.shape_cast %47 : vector<2x8x32xf32> to vector<2x8x4x8xf32>
    %49 = vector.shape_cast %20 : vector<2x8x8xf32> to vector<2x8x1x8xf32>
    %cst_39 = arith.constant 0.000000e+00 : f32
    %50 = vector.broadcast %cst_39 : f32 to vector<2x8x1x8xf32>
    %51 = arith.cmpf one, %49, %50 : vector<2x8x1x8xf32>
    %cst_40 = arith.constant -1.000000e+09 : f32
    %52 = vector.shape_cast %51 : vector<2x8x1x8xi1> to vector<2x8x1x8xi1>
    %53 = vector.broadcast %52 : vector<2x8x1x8xi1> to vector<2x8x4x8xi1>
    %54 = vector.broadcast %cst_40 : f32 to vector<2x8x4x8xf32>
    %55 = arith.select %53, %54, %48 : vector<2x8x4x8xi1>, vector<2x8x4x8xf32>
    %cst_41 = arith.constant dense<0xFF800000> : vector<2x8x4xf32>
    %56 = vector.multi_reduction <maximumf>, %55, %cst_41 [3] : vector<2x8x4x8xf32> to vector<2x8x4xf32>
    %57 = vector.shape_cast %56 : vector<2x8x4xf32> to vector<2x8x4x1xf32>
    %58 = vector.broadcast %57 : vector<2x8x4x1xf32> to vector<2x8x4x8xf32>
    %59 = arith.subf %55, %58 : vector<2x8x4x8xf32>
    %60 = math.exp %59 : vector<2x8x4x8xf32>
    %cst_42 = arith.constant dense<0.000000e+00> : vector<2x8x4xf32>
    %61 = vector.multi_reduction <add>, %60, %cst_42 [3] : vector<2x8x4x8xf32> to vector<2x8x4xf32>
    %62 = vector.shape_cast %61 : vector<2x8x4xf32> to vector<2x8x4x1xf32>
    %63 = vector.broadcast %62 : vector<2x8x4x1xf32> to vector<2x8x4x8xf32>
    %64 = arith.divf %60, %63 : vector<2x8x4x8xf32>
    %65 = vector.shape_cast %64 : vector<2x8x4x8xf32> to vector<2x8x32xf32>
    %66 = vector.extract_strided_slice %65 {offsets = [0, 0, 0], sizes = [2, 8, 8], strides = [1, 1, 1]} : vector<2x8x32xf32> to vector<2x8x8xf32>
    %67 = vector.extract_strided_slice %32 {offsets = [0, 0, 0], sizes = [2, 8, 8], strides = [1, 1, 1]} : vector<2x8x32xf32> to vector<2x8x8xf32>
    "tpu.trace_start"() <{level = 10 : i32, message = "bqk,bkd->bqd"}> : () -> ()
    %cst_43 = arith.constant dense<0.000000e+00> : vector<2x8x8xf32>
    %68 = tpu.matmul %66, %67, %cst_43 {dimension_numbers = #tpu.dot_dimension_numbers<[2], [1], [1], [2], [0, 0, 0, 1, 1, 2], [0], [0]>} : vector<2x8x8xf32>, vector<2x8x8xf32>, vector<2x8x8xf32> -> vector<2x8x8xf32>
    "tpu.trace_stop"() : () -> ()
    %69 = vector.extract_strided_slice %65 {offsets = [0, 0, 8], sizes = [2, 8, 8], strides = [1, 1, 1]} : vector<2x8x32xf32> to vector<2x8x8xf32>
    %70 = vector.extract_strided_slice %32 {offsets = [0, 0, 8], sizes = [2, 8, 8], strides = [1, 1, 1]} : vector<2x8x32xf32> to vector<2x8x8xf32>
    "tpu.trace_start"() <{level = 10 : i32, message = "bqk,bkd->bqd"}> : () -> ()
    %cst_44 = arith.constant dense<0.000000e+00> : vector<2x8x8xf32>
    %71 = tpu.matmul %69, %70, %cst_44 {dimension_numbers = #tpu.dot_dimension_numbers<[2], [1], [1], [2], [0, 0, 0, 1, 1, 2], [0], [0]>} : vector<2x8x8xf32>, vector<2x8x8xf32>, vector<2x8x8xf32> -> vector<2x8x8xf32>
    "tpu.trace_stop"() : () -> ()
    %72 = vector.extract_strided_slice %65 {offsets = [0, 0, 16], sizes = [2, 8, 8], strides = [1, 1, 1]} : vector<2x8x32xf32> to vector<2x8x8xf32>
    %73 = vector.extract_strided_slice %32 {offsets = [0, 0, 16], sizes = [2, 8, 8], strides = [1, 1, 1]} : vector<2x8x32xf32> to vector<2x8x8xf32>
    "tpu.trace_start"() <{level = 10 : i32, message = "bqk,bkd->bqd"}> : () -> ()
    %cst_45 = arith.constant dense<0.000000e+00> : vector<2x8x8xf32>
    %74 = tpu.matmul %72, %73, %cst_45 {dimension_numbers = #tpu.dot_dimension_numbers<[2], [1], [1], [2], [0, 0, 0, 1, 1, 2], [0], [0]>} : vector<2x8x8xf32>, vector<2x8x8xf32>, vector<2x8x8xf32> -> vector<2x8x8xf32>
    "tpu.trace_stop"() : () -> ()
    %75 = vector.extract_strided_slice %65 {offsets = [0, 0, 24], sizes = [2, 8, 8], strides = [1, 1, 1]} : vector<2x8x32xf32> to vector<2x8x8xf32>
    %76 = vector.extract_strided_slice %32 {offsets = [0, 0, 24], sizes = [2, 8, 8], strides = [1, 1, 1]} : vector<2x8x32xf32> to vector<2x8x8xf32>
    "tpu.trace_start"() <{level = 10 : i32, message = "bqk,bkd->bqd"}> : () -> ()
    %cst_46 = arith.constant dense<0.000000e+00> : vector<2x8x8xf32>
    %77 = tpu.matmul %75, %76, %cst_46 {dimension_numbers = #tpu.dot_dimension_numbers<[2], [1], [1], [2], [0, 0, 0, 1, 1, 2], [0], [0]>} : vector<2x8x8xf32>, vector<2x8x8xf32>, vector<2x8x8xf32> -> vector<2x8x8xf32>
    "tpu.trace_stop"() : () -> ()
    %78 = tpu.concatenate %68, %71, %74, %77 in 2 : vector<2x8x8xf32>, vector<2x8x8xf32>, vector<2x8x8xf32>, vector<2x8x8xf32> -> vector<2x8x32xf32>
    %79 = vector.shape_cast %78 : vector<2x8x32xf32> to vector<16x32xf32>
    %cst_47 = arith.constant dense<0.000000e+00> : vector<16x32xf32>
    %80 = tpu.matmul %79, %3, %cst_47 {dimension_numbers = #tpu.dot_dimension_numbers<[1], [0], [0], [1], [0, 0, 1, 1], [], []>} : vector<16x32xf32>, vector<32x32xf32>, vector<16x32xf32> -> vector<16x32xf32>
    %81 = vector.broadcast %10 : vector<1x32xf32> to vector<16x32xf32>
    %82 = arith.addf %80, %81 : vector<16x32xf32>
    %83 = arith.addf %82, %23 : vector<16x32xf32>
    %cst_48 = arith.constant dense<0.000000e+00> : vector<16xf32>
    %84 = vector.multi_reduction <add>, %83, %cst_48 [1] : vector<16x32xf32> to vector<16xf32>
    %85 = vector.shape_cast %84 : vector<16xf32> to vector<16x1xf32>
    %cst_49 = arith.constant 3.200000e+01 : f32
    %86 = vector.broadcast %cst_49 : f32 to vector<16x1xf32>
    %87 = arith.divf %85, %86 : vector<16x1xf32>
    %88 = vector.broadcast %87 : vector<16x1xf32> to vector<16x32xf32>
    %89 = arith.subf %83, %88 : vector<16x32xf32>
    %90 = arith.mulf %89, %89 : vector<16x32xf32>
    %cst_50 = arith.constant dense<0.000000e+00> : vector<16xf32>
    %91 = vector.multi_reduction <add>, %90, %cst_50 [1] : vector<16x32xf32> to vector<16xf32>
    %92 = vector.shape_cast %91 : vector<16xf32> to vector<16x1xf32>
    %cst_51 = arith.constant 3.200000e+01 : f32
    %93 = vector.broadcast %cst_51 : f32 to vector<16x1xf32>
    %94 = arith.divf %92, %93 : vector<16x1xf32>
    %95 = vector.broadcast %87 : vector<16x1xf32> to vector<16x32xf32>
    %96 = arith.subf %83, %95 : vector<16x32xf32>
    %cst_52 = arith.constant 9.99999974E-6 : f32
    %97 = vector.broadcast %cst_52 : f32 to vector<16x1xf32>
    %98 = arith.addf %94, %97 : vector<16x1xf32>
    %99 = math.rsqrt %98 : vector<16x1xf32>
    %100 = vector.broadcast %99 : vector<16x1xf32> to vector<16x32xf32>
    %101 = arith.mulf %96, %100 : vector<16x32xf32>
    %102 = vector.broadcast %14 : vector<1x32xf32> to vector<16x32xf32>
    %103 = arith.mulf %101, %102 : vector<16x32xf32>
    %104 = vector.broadcast %15 : vector<1x32xf32> to vector<16x32xf32>
    %105 = arith.addf %103, %104 : vector<16x32xf32>
    %cst_53 = arith.constant dense<0.000000e+00> : vector<16x32xf32>
    %106 = tpu.matmul %105, %1, %cst_53 {dimension_numbers = #tpu.dot_dimension_numbers<[1], [0], [0], [1], [0, 0, 1, 1], [], []>} : vector<16x32xf32>, vector<32x32xf32>, vector<16x32xf32> -> vector<16x32xf32>
    %107 = vector.broadcast %8 : vector<1x32xf32> to vector<16x32xf32>
    %108 = arith.addf %106, %107 : vector<16x32xf32>
    %cst_54 = arith.constant dense<0.000000e+00> : vector<16x64xf32>
    %109 = tpu.matmul %25, %2, %cst_54 {dimension_numbers = #tpu.dot_dimension_numbers<[1], [0], [0], [1], [0, 0, 1, 1], [], []>} : vector<16x32xf32>, vector<32x64xf32>, vector<16x64xf32> -> vector<16x64xf32>
    %110 = vector.broadcast %9 : vector<1x64xf32> to vector<16x64xf32>
    %111 = arith.addf %109, %110 : vector<16x64xf32>
    %112 = vector.shape_cast %111 : vector<16x64xf32> to vector<2x8x64xf32>
    %113 = vector.shape_cast %108 : vector<16x32xf32> to vector<2x8x32xf32>
    %114 = vector.extract_strided_slice %112 {offsets = [0, 0, 0], sizes = [2, 8, 32], strides = [1, 1, 1]} : vector<2x8x64xf32> to vector<2x8x32xf32>
    %115 = vector.extract_strided_slice %112 {offsets = [0, 0, 32], sizes = [2, 8, 32], strides = [1, 1, 1]} : vector<2x8x64xf32> to vector<2x8x32xf32>
    %116 = vector.extract_strided_slice %113 {offsets = [0, 0, 0], sizes = [2, 8, 8], strides = [1, 1, 1]} : vector<2x8x32xf32> to vector<2x8x8xf32>
    %117 = vector.extract_strided_slice %114 {offsets = [0, 0, 0], sizes = [2, 8, 8], strides = [1, 1, 1]} : vector<2x8x32xf32> to vector<2x8x8xf32>
    "tpu.trace_start"() <{level = 10 : i32, message = "bqd,bkd->bqk"}> : () -> ()
    %cst_55 = arith.constant dense<0.000000e+00> : vector<2x8x8xf32>
    %118 = tpu.matmul %116, %117, %cst_55 {dimension_numbers = #tpu.dot_dimension_numbers<[2], [2], [1], [1], [0, 0, 0, 1, 1, 1], [0], [0]>} : vector<2x8x8xf32>, vector<2x8x8xf32>, vector<2x8x8xf32> -> vector<2x8x8xf32>
    "tpu.trace_stop"() : () -> ()
    %119 = vector.extract_strided_slice %113 {offsets = [0, 0, 8], sizes = [2, 8, 8], strides = [1, 1, 1]} : vector<2x8x32xf32> to vector<2x8x8xf32>
    %120 = vector.extract_strided_slice %114 {offsets = [0, 0, 8], sizes = [2, 8, 8], strides = [1, 1, 1]} : vector<2x8x32xf32> to vector<2x8x8xf32>
    "tpu.trace_start"() <{level = 10 : i32, message = "bqd,bkd->bqk"}> : () -> ()
    %cst_56 = arith.constant dense<0.000000e+00> : vector<2x8x8xf32>
    %121 = tpu.matmul %119, %120, %cst_56 {dimension_numbers = #tpu.dot_dimension_numbers<[2], [2], [1], [1], [0, 0, 0, 1, 1, 1], [0], [0]>} : vector<2x8x8xf32>, vector<2x8x8xf32>, vector<2x8x8xf32> -> vector<2x8x8xf32>
    "tpu.trace_stop"() : () -> ()
    %122 = vector.extract_strided_slice %113 {offsets = [0, 0, 16], sizes = [2, 8, 8], strides = [1, 1, 1]} : vector<2x8x32xf32> to vector<2x8x8xf32>
    %123 = vector.extract_strided_slice %114 {offsets = [0, 0, 16], sizes = [2, 8, 8], strides = [1, 1, 1]} : vector<2x8x32xf32> to vector<2x8x8xf32>
    "tpu.trace_start"() <{level = 10 : i32, message = "bqd,bkd->bqk"}> : () -> ()
    %cst_57 = arith.constant dense<0.000000e+00> : vector<2x8x8xf32>
    %124 = tpu.matmul %122, %123, %cst_57 {dimension_numbers = #tpu.dot_dimension_numbers<[2], [2], [1], [1], [0, 0, 0, 1, 1, 1], [0], [0]>} : vector<2x8x8xf32>, vector<2x8x8xf32>, vector<2x8x8xf32> -> vector<2x8x8xf32>
    "tpu.trace_stop"() : () -> ()
    %125 = vector.extract_strided_slice %113 {offsets = [0, 0, 24], sizes = [2, 8, 8], strides = [1, 1, 1]} : vector<2x8x32xf32> to vector<2x8x8xf32>
    %126 = vector.extract_strided_slice %114 {offsets = [0, 0, 24], sizes = [2, 8, 8], strides = [1, 1, 1]} : vector<2x8x32xf32> to vector<2x8x8xf32>
    "tpu.trace_start"() <{level = 10 : i32, message = "bqd,bkd->bqk"}> : () -> ()
    %cst_58 = arith.constant dense<0.000000e+00> : vector<2x8x8xf32>
    %127 = tpu.matmul %125, %126, %cst_58 {dimension_numbers = #tpu.dot_dimension_numbers<[2], [2], [1], [1], [0, 0, 0, 1, 1, 1], [0], [0]>} : vector<2x8x8xf32>, vector<2x8x8xf32>, vector<2x8x8xf32> -> vector<2x8x8xf32>
    "tpu.trace_stop"() : () -> ()
    %128 = tpu.concatenate %118, %121, %124, %127 in 2 : vector<2x8x8xf32>, vector<2x8x8xf32>, vector<2x8x8xf32>, vector<2x8x8xf32> -> vector<2x8x32xf32>
    %cst_59 = arith.constant 0.353553385 : f32
    %129 = vector.broadcast %cst_59 : f32 to vector<2x8x32xf32>
    %130 = arith.mulf %128, %129 : vector<2x8x32xf32>
    %131 = vector.shape_cast %130 : vector<2x8x32xf32> to vector<2x8x4x8xf32>
    %132 = vector.shape_cast %21 : vector<2x8x8xf32> to vector<2x8x1x8xf32>
    %cst_60 = arith.constant 0.000000e+00 : f32
    %133 = vector.broadcast %cst_60 : f32 to vector<2x8x1x8xf32>
    %134 = arith.cmpf one, %132, %133 : vector<2x8x1x8xf32>
    %cst_61 = arith.constant -1.000000e+09 : f32
    %135 = vector.shape_cast %134 : vector<2x8x1x8xi1> to vector<2x8x1x8xi1>
    %136 = vector.broadcast %135 : vector<2x8x1x8xi1> to vector<2x8x4x8xi1>
    %137 = vector.broadcast %cst_61 : f32 to vector<2x8x4x8xf32>
    %138 = arith.select %136, %137, %131 : vector<2x8x4x8xi1>, vector<2x8x4x8xf32>
    %cst_62 = arith.constant dense<0xFF800000> : vector<2x8x4xf32>
    %139 = vector.multi_reduction <maximumf>, %138, %cst_62 [3] : vector<2x8x4x8xf32> to vector<2x8x4xf32>
    %140 = vector.shape_cast %139 : vector<2x8x4xf32> to vector<2x8x4x1xf32>
    %141 = vector.broadcast %140 : vector<2x8x4x1xf32> to vector<2x8x4x8xf32>
    %142 = arith.subf %138, %141 : vector<2x8x4x8xf32>
    %143 = math.exp %142 : vector<2x8x4x8xf32>
    %cst_63 = arith.constant dense<0.000000e+00> : vector<2x8x4xf32>
    %144 = vector.multi_reduction <add>, %143, %cst_63 [3] : vector<2x8x4x8xf32> to vector<2x8x4xf32>
    %145 = vector.shape_cast %144 : vector<2x8x4xf32> to vector<2x8x4x1xf32>
    %146 = vector.broadcast %145 : vector<2x8x4x1xf32> to vector<2x8x4x8xf32>
    %147 = arith.divf %143, %146 : vector<2x8x4x8xf32>
    %148 = vector.shape_cast %147 : vector<2x8x4x8xf32> to vector<2x8x32xf32>
    %149 = vector.extract_strided_slice %148 {offsets = [0, 0, 0], sizes = [2, 8, 8], strides = [1, 1, 1]} : vector<2x8x32xf32> to vector<2x8x8xf32>
    %150 = vector.extract_strided_slice %115 {offsets = [0, 0, 0], sizes = [2, 8, 8], strides = [1, 1, 1]} : vector<2x8x32xf32> to vector<2x8x8xf32>
    "tpu.trace_start"() <{level = 10 : i32, message = "bqk,bkd->bqd"}> : () -> ()
    %cst_64 = arith.constant dense<0.000000e+00> : vector<2x8x8xf32>
    %151 = tpu.matmul %149, %150, %cst_64 {dimension_numbers = #tpu.dot_dimension_numbers<[2], [1], [1], [2], [0, 0, 0, 1, 1, 2], [0], [0]>} : vector<2x8x8xf32>, vector<2x8x8xf32>, vector<2x8x8xf32> -> vector<2x8x8xf32>
    "tpu.trace_stop"() : () -> ()
    %152 = vector.extract_strided_slice %148 {offsets = [0, 0, 8], sizes = [2, 8, 8], strides = [1, 1, 1]} : vector<2x8x32xf32> to vector<2x8x8xf32>
    %153 = vector.extract_strided_slice %115 {offsets = [0, 0, 8], sizes = [2, 8, 8], strides = [1, 1, 1]} : vector<2x8x32xf32> to vector<2x8x8xf32>
    "tpu.trace_start"() <{level = 10 : i32, message = "bqk,bkd->bqd"}> : () -> ()
    %cst_65 = arith.constant dense<0.000000e+00> : vector<2x8x8xf32>
    %154 = tpu.matmul %152, %153, %cst_65 {dimension_numbers = #tpu.dot_dimension_numbers<[2], [1], [1], [2], [0, 0, 0, 1, 1, 2], [0], [0]>} : vector<2x8x8xf32>, vector<2x8x8xf32>, vector<2x8x8xf32> -> vector<2x8x8xf32>
    "tpu.trace_stop"() : () -> ()
    %155 = vector.extract_strided_slice %148 {offsets = [0, 0, 16], sizes = [2, 8, 8], strides = [1, 1, 1]} : vector<2x8x32xf32> to vector<2x8x8xf32>
    %156 = vector.extract_strided_slice %115 {offsets = [0, 0, 16], sizes = [2, 8, 8], strides = [1, 1, 1]} : vector<2x8x32xf32> to vector<2x8x8xf32>
    "tpu.trace_start"() <{level = 10 : i32, message = "bqk,bkd->bqd"}> : () -> ()
    %cst_66 = arith.constant dense<0.000000e+00> : vector<2x8x8xf32>
    %157 = tpu.matmul %155, %156, %cst_66 {dimension_numbers = #tpu.dot_dimension_numbers<[2], [1], [1], [2], [0, 0, 0, 1, 1, 2], [0], [0]>} : vector<2x8x8xf32>, vector<2x8x8xf32>, vector<2x8x8xf32> -> vector<2x8x8xf32>
    "tpu.trace_stop"() : () -> ()
    %158 = vector.extract_strided_slice %148 {offsets = [0, 0, 24], sizes = [2, 8, 8], strides = [1, 1, 1]} : vector<2x8x32xf32> to vector<2x8x8xf32>
    %159 = vector.extract_strided_slice %115 {offsets = [0, 0, 24], sizes = [2, 8, 8], strides = [1, 1, 1]} : vector<2x8x32xf32> to vector<2x8x8xf32>
    "tpu.trace_start"() <{level = 10 : i32, message = "bqk,bkd->bqd"}> : () -> ()
    %cst_67 = arith.constant dense<0.000000e+00> : vector<2x8x8xf32>
    %160 = tpu.matmul %158, %159, %cst_67 {dimension_numbers = #tpu.dot_dimension_numbers<[2], [1], [1], [2], [0, 0, 0, 1, 1, 2], [0], [0]>} : vector<2x8x8xf32>, vector<2x8x8xf32>, vector<2x8x8xf32> -> vector<2x8x8xf32>
    "tpu.trace_stop"() : () -> ()
    %161 = tpu.concatenate %151, %154, %157, %160 in 2 : vector<2x8x8xf32>, vector<2x8x8xf32>, vector<2x8x8xf32>, vector<2x8x8xf32> -> vector<2x8x32xf32>
    %162 = vector.shape_cast %161 : vector<2x8x32xf32> to vector<16x32xf32>
    %cst_68 = arith.constant dense<0.000000e+00> : vector<16x32xf32>
    %163 = tpu.matmul %162, %4, %cst_68 {dimension_numbers = #tpu.dot_dimension_numbers<[1], [0], [0], [1], [0, 0, 1, 1], [], []>} : vector<16x32xf32>, vector<32x32xf32>, vector<16x32xf32> -> vector<16x32xf32>
    %164 = vector.broadcast %11 : vector<1x32xf32> to vector<16x32xf32>
    %165 = arith.addf %163, %164 : vector<16x32xf32>
    %166 = arith.addf %165, %105 : vector<16x32xf32>
    %cst_69 = arith.constant dense<0.000000e+00> : vector<16xf32>
    %167 = vector.multi_reduction <add>, %166, %cst_69 [1] : vector<16x32xf32> to vector<16xf32>
    %168 = vector.shape_cast %167 : vector<16xf32> to vector<16x1xf32>
    %cst_70 = arith.constant 3.200000e+01 : f32
    %169 = vector.broadcast %cst_70 : f32 to vector<16x1xf32>
    %170 = arith.divf %168, %169 : vector<16x1xf32>
    %171 = vector.broadcast %170 : vector<16x1xf32> to vector<16x32xf32>
    %172 = arith.subf %166, %171 : vector<16x32xf32>
    %173 = arith.mulf %172, %172 : vector<16x32xf32>
    %cst_71 = arith.constant dense<0.000000e+00> : vector<16xf32>
    %174 = vector.multi_reduction <add>, %173, %cst_71 [1] : vector<16x32xf32> to vector<16xf32>
    %175 = vector.shape_cast %174 : vector<16xf32> to vector<16x1xf32>
    %cst_72 = arith.constant 3.200000e+01 : f32
    %176 = vector.broadcast %cst_72 : f32 to vector<16x1xf32>
    %177 = arith.divf %175, %176 : vector<16x1xf32>
    %178 = vector.broadcast %170 : vector<16x1xf32> to vector<16x32xf32>
    %179 = arith.subf %166, %178 : vector<16x32xf32>
    %cst_73 = arith.constant 9.99999974E-6 : f32
    %180 = vector.broadcast %cst_73 : f32 to vector<16x1xf32>
    %181 = arith.addf %177, %180 : vector<16x1xf32>
    %182 = math.rsqrt %181 : vector<16x1xf32>
    %183 = vector.broadcast %182 : vector<16x1xf32> to vector<16x32xf32>
    %184 = arith.mulf %179, %183 : vector<16x32xf32>
    %185 = vector.broadcast %16 : vector<1x32xf32> to vector<16x32xf32>
    %186 = arith.mulf %184, %185 : vector<16x32xf32>
    %187 = vector.broadcast %17 : vector<1x32xf32> to vector<16x32xf32>
    %188 = arith.addf %186, %187 : vector<16x32xf32>
    %cst_74 = arith.constant dense<0.000000e+00> : vector<16x64xf32>
    %189 = tpu.matmul %188, %5, %cst_74 {dimension_numbers = #tpu.dot_dimension_numbers<[1], [0], [0], [1], [0, 0, 1, 1], [], []>} : vector<16x32xf32>, vector<32x64xf32>, vector<16x64xf32> -> vector<16x64xf32>
    %190 = vector.broadcast %12 : vector<1x64xf32> to vector<16x64xf32>
    %191 = arith.addf %189, %190 : vector<16x64xf32>
    %cst_75 = arith.constant 5.000000e-01 : f32
    %192 = vector.broadcast %cst_75 : f32 to vector<16x64xf32>
    %193 = arith.mulf %192, %191 : vector<16x64xf32>
    %cst_76 = arith.constant 4.471500e-02 : f32
    %194 = vector.broadcast %cst_76 : f32 to vector<16x64xf32>
    %195 = arith.mulf %194, %191 : vector<16x64xf32>
    %196 = arith.mulf %195, %191 : vector<16x64xf32>
    %197 = arith.mulf %196, %191 : vector<16x64xf32>
    %198 = arith.addf %191, %197 : vector<16x64xf32>
    %cst_77 = arith.constant 0.797884583 : f32
    %199 = vector.broadcast %cst_77 : f32 to vector<16x64xf32>
    %200 = arith.mulf %199, %198 : vector<16x64xf32>
    %201 = math.tanh %200 : vector<16x64xf32>
    %cst_78 = arith.constant 1.000000e+00 : f32
    %202 = vector.broadcast %cst_78 : f32 to vector<16x64xf32>
    %203 = arith.addf %202, %201 : vector<16x64xf32>
    %204 = arith.mulf %193, %203 : vector<16x64xf32>
    %cst_79 = arith.constant dense<0.000000e+00> : vector<16x32xf32>
    %205 = tpu.matmul %204, %6, %cst_79 {dimension_numbers = #tpu.dot_dimension_numbers<[1], [0], [0], [1], [0, 0, 1, 1], [], []>} : vector<16x64xf32>, vector<64x32xf32>, vector<16x32xf32> -> vector<16x32xf32>
    %206 = vector.broadcast %13 : vector<1x32xf32> to vector<16x32xf32>
    %207 = arith.addf %205, %206 : vector<16x32xf32>
    %208 = arith.addf %207, %165 : vector<16x32xf32>
    %cst_80 = arith.constant dense<0.000000e+00> : vector<16xf32>
    %209 = vector.multi_reduction <add>, %208, %cst_80 [1] : vector<16x32xf32> to vector<16xf32>
    %210 = vector.shape_cast %209 : vector<16xf32> to vector<16x1xf32>
    %cst_81 = arith.constant 3.200000e+01 : f32
    %211 = vector.broadcast %cst_81 : f32 to vector<16x1xf32>
    %212 = arith.divf %210, %211 : vector<16x1xf32>
    %213 = vector.broadcast %212 : vector<16x1xf32> to vector<16x32xf32>
    %214 = arith.subf %208, %213 : vector<16x32xf32>
    %215 = arith.mulf %214, %214 : vector<16x32xf32>
    %cst_82 = arith.constant dense<0.000000e+00> : vector<16xf32>
    %216 = vector.multi_reduction <add>, %215, %cst_82 [1] : vector<16x32xf32> to vector<16xf32>
    %217 = vector.shape_cast %216 : vector<16xf32> to vector<16x1xf32>
    %cst_83 = arith.constant 3.200000e+01 : f32
    %218 = vector.broadcast %cst_83 : f32 to vector<16x1xf32>
    %219 = arith.divf %217, %218 : vector<16x1xf32>
    %220 = vector.broadcast %212 : vector<16x1xf32> to vector<16x32xf32>
    %221 = arith.subf %208, %220 : vector<16x32xf32>
    %cst_84 = arith.constant 9.99999974E-6 : f32
    %222 = vector.broadcast %cst_84 : f32 to vector<16x1xf32>
    %223 = arith.addf %219, %222 : vector<16x1xf32>
    %224 = math.rsqrt %223 : vector<16x1xf32>
    %225 = vector.broadcast %224 : vector<16x1xf32> to vector<16x32xf32>
    %226 = arith.mulf %221, %225 : vector<16x32xf32>
    %227 = vector.broadcast %18 : vector<1x32xf32> to vector<16x32xf32>
    %228 = arith.mulf %226, %227 : vector<16x32xf32>
    %229 = vector.broadcast %19 : vector<1x32xf32> to vector<16x32xf32>
    %230 = arith.addf %228, %229 : vector<16x32xf32>
    %cst_85 = arith.constant 0.000000e+00 : f32
    %231 = vector.broadcast %cst_85 : f32 to vector<2x8x32xf32>
    %232 = vector.shape_cast %230 : vector<16x32xf32> to vector<2x8x32xf32>
    %233 = tpu.concatenate %232, %65, %148, %231 in 2 : vector<2x8x32xf32>, vector<2x8x32xf32>, vector<2x8x32xf32>, vector<2x8x32xf32> -> vector<2x8x128xf32>
    %c0_86 = arith.constant 0 : index
    %c0_87 = arith.constant 0 : index
    %c0_88 = arith.constant 0 : index
    %234 = vector.load %arg7[%c0_86, %c0_87, %c0_88] : memref<2x8x128xf32, #tpu.memory_space<vmem>>, vector<2x8x128xf32>
    tpu.vector_store %arg7[%c0_86, %c0_87, %c0_88], %233 {strides = array<i32>} : memref<2x8x128xf32, #tpu.memory_space<vmem>>, vector<2x8x128xf32>,
    return
  }
  func.func @transform_0(%arg0: i32) -> (i32, i32, i32) {
    %c0_i32 = arith.constant 0 : i32
    %c0_i32_0 = arith.constant 0 : i32
    %c0_i32_1 = arith.constant 0 : i32
    return %arg0, %c0_i32, %c0_i32_0 : i32, i32, i32
  }
  func.func @transform_1(%arg0: i32) -> (i32, i32, i32) {
    %c0_i32 = arith.constant 0 : i32
    %c0_i32_0 = arith.constant 0 : i32
    %c0_i32_1 = arith.constant 0 : i32
    return %arg0, %c0_i32, %c0_i32_0 : i32, i32, i32
  }
  func.func @transform_2(%arg0: i32) -> (i32, i32, i32) {
    %c0_i32 = arith.constant 0 : i32
    %c0_i32_0 = arith.constant 0 : i32
    %c0_i32_1 = arith.constant 0 : i32
    return %arg0, %c0_i32, %c0_i32_0 : i32, i32, i32
  }
  func.func @transform_3(%arg0: i32) -> (i32, i32) {
    %c0_i32 = arith.constant 0 : i32
    %c0_i32_0 = arith.constant 0 : i32
    %c0_i32_1 = arith.constant 0 : i32
    return %c0_i32, %c0_i32_0 : i32, i32
  }
  func.func @transform_4(%arg0: i32) -> (i32, i32) {
    %c0_i32 = arith.constant 0 : i32
    %c0_i32_0 = arith.constant 0 : i32
    %c0_i32_1 = arith.constant 0 : i32
    return %c0_i32, %c0_i32_0 : i32, i32
  }
  func.func @transform_5(%arg0: i32) -> (i32, i32) {
    %c0_i32 = arith.constant 0 : i32
    %c0_i32_0 = arith.constant 0 : i32
    %c0_i32_1 = arith.constant 0 : i32
    return %c0_i32, %c0_i32_0 : i32, i32
  }
  func.func @transform_6(%arg0: i32) -> (i32, i32, i32) {
    %c0_i32 = arith.constant 0 : i32
    %c0_i32_0 = arith.constant 0 : i32
    %c0_i32_1 = arith.constant 0 : i32
    return %arg0, %c0_i32, %c0_i32_0 : i32, i32, i32
  }
}

</mosaic_0001>

<bundles_post_ra>
// kernel: tpu_custom_call.1
= control target key start
LH: loop header
LB: loop body
LE: loop exit
PB: predicated region body
PF: predicated region fallthrough
CT: control target
= control target key end

     0   :  { %11 = vsyncpa [#allocation3], 0  ;;  %s7127_s0 = inlined_call_operand.hbm [shape: f32[2,8,32], index: 0, kind: input, shape index: {}]   ;;  %s7128_s1 = inlined_call_operand.hbm [shape: f32[2,8,32], index: 1, kind: input, shape index: {}]   ;;  %s7129_s2 = inlined_call_operand.hbm [shape: f32[2,8,16], index: 2, kind: input, shape index: {}]   ;;  %s7130_s3 = inlined_call_operand.vmem [shape: f32[32,320], index: 3, kind: input, shape index: {}]   ;;  %s7131_s4 = inlined_call_operand.vmem [shape: f32[64,32], index: 4, kind: input, shape index: {}]   ;;  %s7132_s5 = inlined_call_operand.vmem [shape: f32[16,128], index: 5, kind: input, shape index: {}]   ;;  %s7133_s6 = inlined_call_operand.hbm [shape: f32[2,8,128], index: 6, kind: output, shape index: {}]  }
   0x1   :  { %12 = vsyncpa [#allocation6], 0 }
   0x2   :  { %13 = vsyncpa [#allocation4], 0  ;;  %s5768_s21 = smov [#allocation5]   ;;  %s5769_s23 = smov [#allocation2]  }
   0x3   :  { %s31_s22 = sshll.u32 %s5768_s21, 4  ;;  %s19_s24 = sshll.u32 %s5769_s23, 4  ;;  %s32_s22 = int_to_ptr.vmem [resolvable:$true] %s31_s22  ;;  %s5829_s24 = int_to_ptr.vmem [resolvable:$true] %s19_s24 }
   0x4   :  { %s5674_s27 = scalar_lea.hbm %s7128_s1, 256 }
   0x5   :  { %p5675_p0 = scmp.ne.s32.totalorder %s7128_s1, %s5674_s27  ;;  %p5678_p1 = scmp.lt.u32.totalorder %s5674_s27, %s7128_s1 }
   0x7   :  { %p5680_p2 = pnand %p5678_p1, %p5675_p0 }
   0x9   :  { %5683 = shalt.err (!%p5680_p2)
}
   0xa   :  { %s5684_s8 = scalar_lea.vmem %s32_s22, 256  ;;  %p5689_p4 = scmp.lt.s32.totalorder %s32_s22, %s32_s22 }
   0xb   :  { %p5685_p3 = scmp.ne.s32.totalorder %s32_s22, %s5684_s8  ;;  %p5690_p5 = scmp.lt.s32.totalorder %s5684_s8, %s5684_s8 }
   0xd   :  { %p5691_p6 = por %p5690_p5, %p5689_p4 }
   0xf   :  { %p5692_p7 = pnand %p5691_p6, %p5685_p3 }
  0x11   :  { %5695 = shalt.err (!%p5692_p7)
}
  0x12   :  { %s5770_s9 = smov 128   ;;  %s5771_s10 = smov 8  }
  0x13   :  { %37 = dma.hbm_to_vmem [thread:$0]  %s7128_s1, 256, %s32_s22, [#allocation6], %s5770_s9, %s5770_s9, %s5771_s10  }
  0x14   :  { %s5696_s15 = scalar_lea.hbm %s7127_s0, 256 }
  0x15   :  { %p5697_p8 = scmp.ne.s32.totalorder %s7127_s0, %s5696_s15  ;;  %p5700_p9 = scmp.lt.u32.totalorder %s5696_s15, %s7127_s0 }
  0x17   :  { %p5702_p10 = pnand %p5700_p9, %p5697_p8 }
  0x19   :  { %5705 = shalt.err (!%p5702_p10)
}
  0x1a   :  { %s5706_s20 = scalar_lea.vmem %s5829_s24, 256  ;;  %p5711_p12 = scmp.lt.s32.totalorder %s5829_s24, %s5829_s24 }
  0x1b   :  { %p5707_p11 = scmp.ne.s32.totalorder %s5829_s24, %s5706_s20  ;;  %p5712_p13 = scmp.lt.s32.totalorder %s5706_s20, %s5706_s20 }
  0x1d   :  { %p5713_p0 = por %p5712_p13, %p5711_p12 }
  0x1f   :  { %p5714_p1 = pnand %p5713_p0, %p5707_p11 }
  0x21   :  { %5717 = shalt.err (!%p5714_p1)
}
  0x22   :  { %25 = dma.hbm_to_vmem [thread:$0]  %s7127_s0, 256, %s5829_s24, [#allocation3], %s5770_s9, %s5770_s9, %s5771_s10  }
  0x23   :  { %s5772_s22 = smov [#allocation7]   ;;  %s5718_s27 = scalar_lea.hbm %s7129_s2, 256 }
  0x24   :  { %s43_s23 = sshll.u32 %s5772_s22, 4  ;;  %p5719_p2 = scmp.ne.s32.totalorder %s7129_s2, %s5718_s27  ;;  %s44_s23 = int_to_ptr.vmem [resolvable:$true] %s43_s23 }
  0x25   :  { %p5722_p3 = scmp.lt.u32.totalorder %s5718_s27, %s7129_s2 }
  0x27   :  { %p5724_p4 = pnand %p5722_p3, %p5719_p2 }
  0x29   :  { %5727 = shalt.err (!%p5724_p4)
}
  0x2a   :  { %s5728_s8 = scalar_lea.vmem %s44_s23, 256  ;;  %p5733_p6 = scmp.lt.s32.totalorder %s44_s23, %s44_s23 }
  0x2b   :  { %p5729_p5 = scmp.ne.s32.totalorder %s44_s23, %s5728_s8  ;;  %p5734_p7 = scmp.lt.s32.totalorder %s5728_s8, %s5728_s8 }
  0x2d   :  { %p5735_p8 = por %p5734_p7, %p5733_p6 }
  0x2f   :  { %p5736_p9 = pnand %p5735_p8, %p5729_p5 }
  0x31   :  { %5739 = shalt.err (!%p5736_p9)
}
  0x32   :  { %49 = dma.hbm_to_vmem [thread:$0]  %s7129_s2, 256, %s44_s23, [#allocation6], %s5770_s9, %s5770_s9, %s5771_s10  }
  0x33   :  { %5762 = dma.done.wait [#allocation3], 256  }
  0x34   :  { %5763 = vsyncadd [#allocation3], 4294967040 }
  0x35   :  { %5764 = dma.done.wait [#allocation6], 512  }
  0x36   :  { %5765 = vsyncadd [#allocation6], 4294966784  ;;  %vm7134_vm0 = vcmask 261120   ;;  %v5884_v0 = vld [vmem:[%s7130_s3] sm:$0xff]  ;;  %v5889_v1 = vld [vmem:[%s7130_s3 + $0x18] sm:$0xff]  ;;  %v5773_v9 = vmov 0.0   ;;  %v872_v59 = vlaneseq }
  0x37   :  { %v67_v2 = vld [vmem:[%s7130_s3 + $0x30] sm:$0xff]  ;;  %v5500_v3 = vpack.i.bf16 %v5889_v1, %v5884_v0  ;;  %v5400_v4 = vpack.c.bf16 %v5889_v1, %v5884_v0  ;;  %v68_v5 = vld [vmem:[%s7130_s3 + $0x48] sm:$0xff]  ;;  %v100_v6 = vld [vmem:[#allocation2] sm:$0xff]  ;;  %5176 = vmatprep.subr.mxu0 %v5773_v9  ;;  %vm7135_vm1 = vmmov 0   ;;  %s5775_s20 = smov 88   ;;  %s5776_s1 = smov 96  }
  0x38   :  { %v5404_v7 = vpack.c.bf16 %v68_v5, %v67_v2  ;;  %5163 = vmatprep.mubr.msk.f32.mxu1 %vm7134_vm0, %v100_v6  ;;  %v101_v8 = vld [vmem:[#allocation2 + $0x8] sm:$0xff]  ;;  %5178 = vmatprep.mubr.msk.f32.mxu0 %vm7135_vm1, %v5773_v9  ;;  %v4970_v10 = vld [vmem:[%s7132_s5] ss:$0 sm:$0xff]  ;;  %s5777_s21 = smov 120   ;;  %s5778_s22 = smov 80   ;;  %vm7139_vm2 = vcmask 64512  }
  0x39   :  { %5401 = vmatprep.subr.bf16.mxu1 %v5400_v4  ;;  %s5779_s23 = smov 112   ;;  %s5780_s25 = smov 72   ;;  %vm7138_vm3 = vcmask 130048   ;;  %vm7137_vm4 = vcmask 195584   ;;  %v5784_v60 = vmov 1966171168  }
  0x3a   :  { %5403 = vmatpush3.bf16.msra.mxu1 %v5400_v4  ;;  %s5781_s26 = smov 104   ;;  %s5782_s27 = smov 16   ;;  %v1007_v61 = vunpack.c.l.s4 %v5784_v60  ;;  %v873_v62 = vshrl.u32 %v872_v59, 7  ;;  %v98_v2 = vld [vmem:[#allocation7] sm:$0xff]  ;;  %vm7141_vm12 = vcmask 60416  }
  0x3b   :  { %5405 = vmatprep.subr.bf16.mxu1 %v5404_v7  ;;  %s5783_s28 = smov 24   ;;  %v1005_v4 = vcombine.high %v98_v2, %v98_v2  ;;  %s5788_s29 = smov 64  }
  0x3c   :  { %v1008_v63 = vunpack.c.0.s8 %v1007_v61  ;;  %s5789_s30 = smov 56   ;;  %s5790_s7 = smov 48  }
  0x3d   :  { %s5791_s8 = smov 40   ;;  %s5792_s18 = smov 32  }
  0x3e   :  { %5407 = vmatpush3.bf16.msra.mxu1 %v5404_v7  ;;  %v6014_v5 = vsub.s32 %v1008_v63, %v873_v62 }
  0x3f   :  { %5166 = vmatprep.subr.mxu1 %v5773_v9 }
  0x40   :  { %v1019_v6 = vrot.slane %v1005_v4, %v6014_v5  ;;  %v1012_v7 = vrot.slane %v98_v2, %v6014_v5 }
  0x41   :  { %5164 = vmatmul.mubr.msk.f32.vlgmr.msra.gmra.mrb[0].mxu1 %vm7134_vm0, %v101_v8 }
  0x42   :  { %5168 = vmatprep.mubr.msk.f32.mxu1 %vm7135_vm1, %v5773_v9  ;;  %v1035_v8 = vrot.slane %v1019_v6, %v6014_v5 }
  0x44   :  { %vm1123_vm5 = vcmp.ne.f32.partialorder %v1035_v8, 0.0 }
 0x114   :  { %v5165_v11 = vpop.f32.mrb[0].mxu1 }
 0x115   :  { %v5912_v12 = vadd.f32 %v5165_v11, %v4970_v10  ;;  %v181_v13 = vpop.f32.mrb[1].mxu1  ;;  %v1020_v11 = vcombine.high %v1012_v7, %v1012_v7 }
 0x116   :  { %v5918_v14 = vadd.f32 %v4970_v10, %v181_v13  ;;  %v1028_v10 = vrot.slane %v1012_v7, %v6014_v5  ;;  %v1051_v13 = vcombine.high %v1035_v8, %v1035_v8 }
 0x117   :  { %425 = vrot.lane.b32.xlu1 %v5912_v12, %s5775_s20  ;;  %269 = vrot.lane.b32.xlu0 %v5912_v12, %s5776_s1 }
 0x118   :  { %vm1119_vm6 = vcmp.ne.f32.partialorder %v1028_v10, 0.0  ;;  %vm1125_vm7 = vcmp.ne.f32.partialorder %v1051_v13, 0.0 }
 0x11b   :  { %423 = vrot.lane.b32.xlu1 %v5912_v12, %s5777_s21  ;;  %191 = vrot.lane.b32.xlu0 %v5918_v14, %s5776_s1 }
 0x11f   :  { %581 = vrot.lane.b32.xlu1 %v5912_v12, %s5778_s22  ;;  %345 = vrot.lane.b32.xlu0 %v5918_v14, %s5777_s21 }
 0x123   :  { %347 = vrot.lane.b32.xlu1 %v5918_v14, %s5775_s20  ;;  %503 = vrot.lane.b32.xlu0 %v5918_v14, %s5778_s22 }
 0x127   :  { %579 = vrot.lane.b32.xlu1 %v5912_v12, %s5779_s23  ;;  %501 = vrot.lane.b32.xlu0 %v5918_v14, %s5779_s23 }
 0x12b   :  { %737 = vrot.lane.b32.xlu1 %v5912_v12, %s5780_s25  ;;  %659 = vrot.lane.b32.xlu0 %v5918_v14, %s5780_s25 }
 0x12f   :  { %735 = vrot.lane.b32.xlu1 %v5912_v12, %s5781_s26  ;;  %657 = vrot.lane.b32.xlu0 %v5918_v14, %s5781_s26 }
 0x189   :  { %v426_v15 = vpop.permute.xlu1 %425  ;;  %v270_v16 = vpop.permute.xlu0 %269 }
 0x18d   :  { %v424_v17 = vpop.permute.xlu1 %423  ;;  %v192_v18 = vpop.permute.xlu0 %191 }
 0x18e   :  { %5167 = vmatpush3.xpose.msk.msra.mxu1 %vm7139_vm2, %v192_v18 }
 0x18f   :  { %5171 = vmatprep.subr.mxu1 %v5773_v9 }
 0x191   :  { %v582_v19 = vpop.permute.xlu1 %581  ;;  %5169 = vmatmul.mubr.msk.f32.vlgmr.msra.gmra.mrb[2].mxu1 %vm7139_vm2, %v5918_v14  ;;  %v346_v20 = vpop.permute.xlu0 %345 }
 0x192   :  { %5172 = vmatpush3.xpose.msk.msra.mxu1 %vm7139_vm2, %v270_v16  ;;  %5173 = vmatprep.mubr.msk.f32.mxu1 %vm7135_vm1, %v5773_v9  ;;  %v1042_v16 = vrot.slane %v1020_v11, %v6014_v5 }
 0x193   :  { %5181 = vmatprep.subr.mxu1 %v5773_v9 }
 0x194   :  { %vm1120_vm9 = vcmp.ne.f32.partialorder %v1042_v16, 0.0 }
 0x195   :  { %v348_v21 = vpop.permute.xlu1 %347  ;;  %5174 = vmatmul.mubr.msk.f32.vlgmr.msra.gmra.mrb[4].mxu1 %vm7139_vm2, %v5912_v12  ;;  %v504_v22 = vpop.permute.xlu0 %503 }
 0x196   :  { %5177 = vmatpush3.xpose.msk.msra.mxu0 %vm7139_vm2, %v348_v21  ;;  %5182 = vmatpush3.xpose.msk.msra.mxu1 %vm7139_vm2, %v426_v15  ;;  %v1050_v15 = vcombine.high %v1028_v10, %v1028_v10  ;;  %v6021_v21 = vsub.s32 0, %v873_v62 }
 0x197   :  { %5183 = vmatprep.mubr.msk.f32.mxu1 %vm7135_vm1, %v5773_v9  ;;  %5186 = vmatprep.subr.mxu0 %v5773_v9 }
 0x198   :  { %5191 = vmatprep.subr.mxu1 %v5773_v9  ;;  %vm1121_vm8 = vcmp.ne.f32.partialorder %v1050_v15, 0.0  ;;  %v7160_v15 = vmov 0 }
 0x199   :  { %v580_v23 = vpop.permute.xlu1 %579  ;;  %5179 = vmatmul.mubr.msk.f32.vlgmr.msra.gmra.mrb[0].mxu0 %vm7139_vm2, %v346_v20  ;;  %5184 = vmatmul.mubr.msk.f32.vlgmr.msra.gmra.mrb[6].mxu1 %vm7139_vm2, %v424_v17  ;;  %v502_v24 = vpop.permute.xlu0 %501  ;;  %v5785_v17 = vmov 1983009808  }
 0x19a   :  { %5187 = vmatpush3.xpose.msk.msra.mxu0 %vm7139_vm2, %v504_v22  ;;  %5192 = vmatpush3.xpose.msk.msra.mxu1 %vm7139_vm2, %v582_v19  ;;  %v870_v18 = vunpack.c.l.s4 %v5785_v17  ;;  %v5786_v19 = vmov 1934713408   ;;  %v5787_v22 = vmov 0  }
 0x19b   :  { %5188 = vmatprep.mubr.msk.f32.mxu0 %vm7135_vm1, %v5773_v9  ;;  %5193 = vmatprep.mubr.msk.f32.mxu1 %vm7135_vm1, %v5773_v9  ;;  %v902_v20 = vunpack.c.l.s4 %v5786_v19 }
 0x19c   :  { %5196 = vmatprep.subr.mxu0 %v5773_v9  ;;  %5201 = vmatprep.subr.mxu1 %v5773_v9 }
 0x19d   :  { %v738_v25 = vpop.permute.xlu1 %737  ;;  %5189 = vmatmul.mubr.msk.f32.vlgmr.msra.gmra.mrb[2].mxu0 %vm7139_vm2, %v502_v24  ;;  %5194 = vmatmul.mubr.msk.f32.vlgmr.msra.gmra.mrb[8].mxu1 %vm7139_vm2, %v580_v23  ;;  %v660_v26 = vpop.permute.xlu0 %659  ;;  %v1139_v23 = vsel %vm1123_vm5, 1, %v5787_v22  ;;  %v1021_v24 = vcombine.high %v1019_v6, %v1019_v6 }
 0x19e   :  { %5197 = vmatpush3.xpose.msk.msra.mxu0 %vm7139_vm2, %v660_v26  ;;  %5202 = vmatpush3.xpose.msk.msra.mxu1 %vm7139_vm2, %v738_v25  ;;  %v1052_v25 = vcombine.high %v1042_v16, %v1042_v16  ;;  %v871_v26 = vunpack.c.0.s8 %v870_v18 }
 0x19f   :  { %5198 = vmatprep.mubr.msk.f32.mxu0 %vm7135_vm1, %v5773_v9  ;;  %5203 = vmatprep.mubr.msk.f32.mxu1 %vm7135_vm1, %v5773_v9 }
 0x1a0   :  { %5206 = vmatprep.subr.mxu0 %v5773_v9  ;;  %5211 = vmatprep.subr.mxu1 %v5773_v9  ;;  %vm1122_vm10 = vcmp.ne.f32.partialorder %v1052_v25, 0.0  ;;  %v7162_v25 = vmov 0 }
 0x1a1   :  { %v736_v27 = vpop.permute.xlu1 %735  ;;  %v658_v28 = vpop.permute.xlu0 %657 }
 0x1a2   :  { %5199 = vmatmul.mubr.msk.f32.vlgmr.msra.gmra.mrb[4].mxu0 %vm7139_vm2, %v658_v28  ;;  %5204 = vmatmul.mubr.msk.f32.vlgmr.msra.gmra.mrb[10].mxu1 %vm7139_vm2, %v736_v27  ;;  %v903_v27 = vunpack.c.0.s8 %v902_v20  ;;  %v1170_v28 = vrot.slane %v1139_v23, %v6021_v21 }
 0x1a3   :  { %5208 = vmatprep.mubr.msk.f32.mxu0 %vm7135_vm1, %v5773_v9  ;;  %5213 = vmatprep.mubr.msk.f32.mxu1 %vm7135_vm1, %v5773_v9 }
 0x1a4   :  { %vm6038_vm11 = vcmp.eq.s32.totalorder %v1170_v28, 1 }
 0x264   :  { %v264_v29 = vpop.f32.mrb[2].mxu1 }
 0x265   :  { %v5170_v30 = vpop.f32.mrb[3].mxu1 }
 0x266   :  { %v1141_v30 = vsel %vm1125_vm7, 1, %v5787_v22 }
 0x268   :  { %v341_v31 = vpop.f32.mrb[4].mxu1 }
 0x269   :  { %v5175_v32 = vpop.f32.mrb[5].mxu1 }
 0x26c   :  { %v419_v33 = vpop.f32.mrb[0].mxu0  ;;  %v497_v34 = vpop.f32.mrb[6].mxu1 }
 0x26d   :  { %817 = vrot.lane.b32.xlu1 %v497_v34, %s5771_s10  ;;  %v5185_v35 = vpop.f32.mrb[7].mxu1  ;;  %815 = vrot.lane.b32.xlu0 %v419_v33, %s5771_s10  ;;  %v5180_v36 = vpop.f32.mrb[1].mxu0  ;;  %v1049_v34 = vrot.slane %v1021_v24, %v6014_v5 }
 0x26e   :  { %v99_v35 = vld [vmem:[#allocation7 + $0x8] sm:$0xff]  ;;  %v6029_v36 = vsub.s32 %v871_v26, %v873_v62 }
 0x26f   :  { %vm1124_vm13 = vcmp.ne.f32.partialorder %v1049_v34, 0.0 }
 0x270   :  { %v575_v37 = vpop.f32.mrb[2].mxu0  ;;  %v653_v38 = vpop.f32.mrb[8].mxu1 }
 0x271   :  { %825 = vrot.lane.b32.xlu1 %v653_v38, %s5782_s27  ;;  %v5195_v39 = vpop.f32.mrb[9].mxu1  ;;  %823 = vrot.lane.b32.xlu0 %v575_v37, %s5782_s27  ;;  %v5190_v40 = vpop.f32.mrb[3].mxu0  ;;  %v1061_v37 = vrot.slane %v99_v35, %v6014_v5 }
 0x272   :  { %v1178_v39 = vrot.slane %v1141_v30, %v6021_v21 }
 0x273   :  { %v1069_v10 = vcombine.high %v1061_v37, %v1061_v37 }
 0x274   :  { %vm6053_vm15 = vcmp.eq.s32.totalorder %v1178_v39, 1 }
 0x275   :  { %v731_v41 = vpop.f32.mrb[4].mxu0  ;;  %v809_v42 = vpop.f32.mrb[10].mxu1 }
 0x276   :  { %833 = vrot.lane.b32.xlu1 %v809_v42, %s5783_s28  ;;  %v5205_v43 = vpop.f32.mrb[11].mxu1  ;;  %831 = vrot.lane.b32.xlu0 %v731_v41, %s5783_s28  ;;  %v5200_v44 = vpop.f32.mrb[5].mxu0  ;;  %v1136_v41 = vsel %vm1120_vm9, 1, %v5787_v22  ;;  %v6036_v42 = vsub.s32 %v903_v27, %v873_v62  ;;  %v1140_v62 = vsel %vm1124_vm13, 1, %v5787_v22 }
 0x277   :  { %v1138_v44 = vsel %vm1122_vm10, 1, %v5787_v22  ;;  %v1174_v26 = vrot.slane %v1140_v62, %v6021_v21 }
 0x278   :  { %v1166_v59 = vrot.slane %v1138_v44, %v6021_v21 }
 0x27a   :  { %vm6082_vm9 = vcmp.eq.s32.totalorder %v1166_v59, 1 }
 0x27b   :  { %v7163_v25 = vsel %vm6082_vm9, 4294967295, %v7162_v25 }
 0x2df   :  { %v818_v45 = vpop.permute.xlu1 %817  ;;  %v816_v46 = vpop.permute.xlu0 %815 }
 0x2e0   :  { %v837_v49 = vsel %vm7139_vm2, %v264_v29, %v816_v46  ;;  %v838_v53 = vsel %vm7139_vm2, %v341_v31, %v818_v45  ;;  %v1135_v29 = vsel %vm1119_vm6, 1, %v5787_v22  ;;  %v1137_v31 = vsel %vm1121_vm8, 1, %v5787_v22 }
 0x2e1   :  { %v1154_v38 = vrot.slane %v1135_v29, %v6021_v21  ;;  %v1162_v40 = vrot.slane %v1137_v31, %v6021_v21  ;;  %v1054_v45 = vcombine.high %v99_v35, %v99_v35 }
 0x2e3   :  { %v826_v47 = vpop.permute.xlu1 %825  ;;  %v824_v48 = vpop.permute.xlu0 %823  ;;  %vm6049_vm14 = vcmp.eq.s32.totalorder %v1154_v38, 1  ;;  %vm6057_vm5 = vcmp.eq.s32.totalorder %v1162_v40, 1  ;;  %v6066_v63 = vrot.slane %v1054_v45, %v6014_v5 }
 0x2e4   :  { %v840_v50 = vsel %vm7138_vm3, %v837_v49, %v824_v48  ;;  %v841_v55 = vsel %vm7138_vm3, %v838_v53, %v826_v47  ;;  %v1158_v53 = vrot.slane %v1136_v41, %v6021_v21 }
 0x2e6   :  { %vm6076_vm7 = vcmp.eq.s32.totalorder %v1158_v53, 1  ;;  %v1070_v53 = vcombine.high %v6066_v63, %v6066_v63 }
 0x2e7   :  { %v7161_v15 = vsel %vm6076_vm7, 4294967295, %v7160_v15 }
 0x2e8   :  { %v834_v51 = vpop.permute.xlu1 %833  ;;  %v832_v52 = vpop.permute.xlu0 %831 }
 0x2e9   :  { %v843_v54 = vsel %vm7137_vm4, %v840_v50, %v832_v52  ;;  %v844_v57 = vsel %vm7137_vm4, %v841_v55, %v834_v51  ;;  %v1053_v50 = vcombine.high %v1049_v34, %v1049_v34  ;;  %v1091_v34 = vrot.slane %v1069_v10, %v6014_v5 }
 0x2ea   :  { %v5997_v56 = vmul.f32 0.35355338, %v843_v54  ;;  %v6004_v58 = vmul.f32 0.35355338, %v844_v57  ;;  %v1077_v54 = vrot.slane %v1061_v37, %v6014_v5  ;;  %v7154_v57 = vmov 0 }
 0x2eb   :  { %v7155_v57 = vsel %vm6053_vm15, 4294967295, %v7154_v57  ;;  %vm6070_vm6 = vcmp.ne.f32.partialorder %v1053_v50, 0.0 }
 0x2ec   :  { %855 = vrot.lane.b32.xlu1 %v5997_v56, %s5779_s23  ;;  %849 = vrot.lane.b32.xlu0 %v5997_v56, %s5777_s21  ;;  %vm1127_vm8 = vcmp.ne.f32.partialorder %v1077_v54, 0.0  ;;  %v1099_v16 = vcombine.high %v1077_v54, %v1077_v54 }
 0x2ed   :  { %v1143_v31 = vsel %vm1127_vm8, 1, %v5787_v22  ;;  %vm6142_vm8 = vcmp.eq.s32.totalorder %v1174_v26, 1 }
 0x2ee   :  { %vm1129_vm10 = vcmp.ne.f32.partialorder %v1099_v16, 0.0 }
 0x2f0   :  { %851 = vrot.lane.b32.xlu1 %v6004_v58, %s5777_s21  ;;  %861 = vrot.lane.b32.xlu0 %v5997_v56, %s5781_s26 }
 0x2f4   :  { %863 = vrot.lane.b32.xlu1 %v6004_v58, %s5781_s26  ;;  %857 = vrot.lane.b32.xlu0 %v6004_v58, %s5779_s23 }
 0x35e   :  { %v856_v32 = vpop.permute.xlu1 %855  ;;  %v850_v33 = vpop.permute.xlu0 %849 }
 0x35f   :  { %v867_v46 = vcombine.low %v5997_v56, %v856_v32  ;;  %v868_v47 = vcombine.high %v5997_v56, %v856_v32  ;;  %v1142_v32 = vsel %vm6070_vm6, 1, %v5787_v22  ;;  %vm1128_vm6 = vcmp.ne.f32.partialorder %v1091_v34, 0.0 }
 0x360   :  { %v1182_v8 = vrot.slane %v1142_v32, %v6021_v21 }
 0x361   :  { %v875_v2 = vrot.slane %v867_v46, %v6029_v36  ;;  %v882_v4 = vrot.slane %v868_v47, %v6029_v36 }
 0x362   :  { %v6045_v48 = vpop.permute.xlu1 %851  ;;  %v862_v49 = vpop.permute.xlu0 %861 }
 0x363   :  { %v883_v51 = vcombine.low %v850_v33, %v862_v49  ;;  %v884_v52 = vcombine.high %v850_v33, %v862_v49  ;;  %v1084_v33 = vrot.slane %v6066_v63, %v6014_v5  ;;  %v1145_v49 = vsel %vm1129_vm10, 1, %v5787_v22 }
 0x364   :  { %v1194_v10 = vrot.slane %v1145_v49, %v6021_v21 }
 0x365   :  { %v891_v60 = vrot.slane %v883_v51, %v6029_v36  ;;  %v898_v61 = vrot.slane %v884_v52, %v6029_v36  ;;  %vm1131_vm13 = vcmp.ne.f32.partialorder %v1084_v33, 0.0  ;;  %v1100_v51 = vcombine.high %v1084_v33, %v1084_v33 }
 0x366   :  { %v864_v6 = vpop.permute.xlu1 %863  ;;  %v858_v7 = vpop.permute.xlu0 %857  ;;  %v1101_v52 = vcombine.high %v1091_v34, %v1091_v34 }
 0x367   :  { %v951_v11 = vcombine.low %v6045_v48, %v864_v6  ;;  %v935_v13 = vcombine.low %v6004_v58, %v858_v7  ;;  %v915_v17 = vcombine.low %v882_v4, %v898_v61  ;;  %v899_v18 = vcombine.low %v875_v2, %v891_v60 }
 0x368   :  { %v916_v19 = vcombine.high %v882_v4, %v898_v61  ;;  %v900_v20 = vcombine.high %v875_v2, %v891_v60  ;;  %v952_v35 = vcombine.high %v6045_v48, %v864_v6  ;;  %v936_v39 = vcombine.high %v6004_v58, %v858_v7 }
 0x369   :  { %v959_v23 = vrot.slane %v951_v11, %v6029_v36  ;;  %v943_v24 = vrot.slane %v935_v13, %v6029_v36  ;;  %v923_v27 = vrot.slane %v915_v17, %v6036_v42  ;;  %v907_v28 = vrot.slane %v899_v18, %v6036_v42 }
 0x36a   :  { %v930_v29 = vrot.slane %v916_v19, %v6036_v42  ;;  %v914_v30 = vrot.slane %v900_v20, %v6036_v42  ;;  %v1186_v48 = vrot.slane %v1143_v31, %v6021_v21  ;;  %v966_v50 = vrot.slane %v952_v35, %v6029_v36 }
 0x36b   :  { %v6101_v37 = vsel %vm6038_vm11, -1e+09, %v923_v27  ;;  %v6105_v38 = vsel %vm6049_vm14, -1e+09, %v907_v28  ;;  %v967_v44 = vcombine.low %v943_v24, %v959_v23  ;;  %v931_v58 = vcombine.high %v907_v28, %v5773_v9 }
 0x36c   :  { %v1260_v40 = vsel %vm7141_vm12, %v6101_v37, -inf  ;;  %v1248_v41 = vsel %vm7141_vm12, %v6105_v38, -inf  ;;  %v6114_v45 = vsel %vm6053_vm15, -1e+09, %v930_v29  ;;  %v6118_v46 = vsel %vm6057_vm5, -1e+09, %v914_v30 }
 0x36d   :  { %1261 = vmax.xlane.f32.xlu1 %v1260_v40  ;;  %1249 = vmax.xlane.f32.xlu0 %v1248_v41  ;;  %v932_v47 = vcombine.high %v914_v30, %v5773_v9  ;;  %v950_v54 = vrot.slane %v936_v39, %v6029_v36  ;;  %v1266_v59 = vsel %vm7141_vm12, %v6114_v45, -inf  ;;  %v1254_v60 = vsel %vm7141_vm12, %v6118_v46, -inf }
 0x36e   :  { %v968_v61 = vcombine.high %v943_v24, %v959_v23  ;;  %v6138_v2 = vsel %vm6076_vm7, -1e+09, %v931_v58  ;;  %v933_v63 = vcombine.high %v923_v27, %v5773_v9  ;;  %v975_v4 = vrot.slane %v967_v44, %v6036_v42 }
 0x36f   :  { %v6134_v62 = vsel %vm6082_vm9, -1e+09, %v932_v47  ;;  %v7164_v6 = vmov 0  ;;  %vm6146_vm10 = vcmp.eq.s32.totalorder %v1186_v48, 1  ;;  %v1147_v11 = vsel %vm1131_vm13, 1, %v5787_v22 }
 0x370   :  { %v7165_v6 = vsel %vm6142_vm8, 4294967295, %v7164_v6  ;;  %v1144_v13 = vsel %vm1128_vm6, 1, %v5787_v22  ;;  %vm6156_vm0 = vcmp.ne.f32.partialorder %v1100_v51, 0.0  ;;  %vm6160_vm1 = vcmp.ne.f32.partialorder %v1101_v52, 0.0 }
 0x371   :  { %1267 = vmax.xlane.f32.xlu1 %v1266_v59  ;;  %1255 = vmax.xlane.f32.xlu0 %v1254_v60  ;;  %v1257_v18 = vsel %vm7141_vm12, %v6134_v62, -inf  ;;  %v1251_v19 = vsel %vm7141_vm12, %v6138_v2, -inf  ;;  %v983_v20 = vcombine.low %v950_v54, %v966_v50  ;;  %v1098_v23 = vrot.slane %v1070_v53, %v6014_v5 }
 0x372   :  { %v6171_v24 = vsel %vm6142_vm8, -1e+09, %v933_v63  ;;  %v6175_v26 = vsel %vm6146_vm10, -1e+09, %v975_v4  ;;  %v934_v27 = vcombine.high %v930_v29, %v5773_v9  ;;  %v982_v28 = vrot.slane %v968_v61, %v6036_v42 }
 0x373   :  { %vm6179_vm13 = vcmp.eq.s32.totalorder %v1182_v8, 1  ;;  %v7172_v30 = vmov 0  ;;  %vm6183_vm6 = vcmp.eq.s32.totalorder %v1194_v10, 1  ;;  %v1202_v31 = vrot.slane %v1147_v11, %v6021_v21 }
 0x374   :  { %v7173_v30 = vsel %vm6179_vm13, 4294967295, %v7172_v30  ;;  %v1190_v32 = vrot.slane %v1144_v13, %v6021_v21  ;;  %v1149_v33 = vsel %vm6156_vm0, 1, %v5787_v22  ;;  %v1146_v29 = vsel %vm6160_vm1, 1, %v5787_v22 }
 0x375   :  { %1258 = vmax.xlane.f32.xlu0 %v1257_v18  ;;  %1252 = vmax.xlane.f32.xlu1 %v1251_v19  ;;  %vm1132_vm4 = vcmp.ne.f32.partialorder %v1098_v23, 0.0  ;;  %v1263_v34 = vsel %vm7141_vm12, %v6171_v24, -inf  ;;  %v1272_v35 = vsel %vm7141_vm12, %v6175_v26, -inf  ;;  %v984_v39 = vcombine.high %v950_v54, %v966_v50 }
 0x376   :  { %v1102_v40 = vcombine.high %v1098_v23, %v1098_v23  ;;  %v6201_v41 = vsel %vm6179_vm13, -1e+09, %v934_v27  ;;  %v6205_v44 = vsel %vm6183_vm6, -1e+09, %v982_v28  ;;  %v991_v47 = vrot.slane %v983_v20, %v6036_v42 }
 0x377   :  { %v999_v58 = vcombine.high %v975_v4, %v5773_v9  ;;  %vm6209_vm0 = vcmp.eq.s32.totalorder %v1202_v31, 1  ;;  %vm6213_vm1 = vcmp.eq.s32.totalorder %v1190_v32, 1  ;;  %v1210_v50 = vrot.slane %v1149_v33, %v6021_v21 }
 0x378   :  { %v1198_v51 = vrot.slane %v1146_v29, %v6021_v21  ;;  %v1148_v52 = vsel %vm1132_vm4, 1, %v5787_v22  ;;  %v1269_v53 = vsel %vm7141_vm12, %v6201_v41, -inf  ;;  %v1278_v54 = vsel %vm7141_vm12, %v6205_v44, -inf }
 0x379   :  { %1264 = vmax.xlane.f32.xlu0 %v1263_v34  ;;  %1273 = vmax.xlane.f32.xlu1 %v1272_v35  ;;  %vm1134_vm3 = vcmp.ne.f32.partialorder %v1102_v40, 0.0  ;;  %v6226_v59 = vsel %vm6209_vm0, -1e+09, %v991_v47  ;;  %v6230_v60 = vsel %vm6213_vm1, -1e+09, %v999_v58  ;;  %v998_v61 = vrot.slane %v984_v39, %v6036_v42 }
 0x37a   :  { %v1000_v63 = vcombine.high %v982_v28, %v5773_v9  ;;  %vm6234_vm4 = vcmp.eq.s32.totalorder %v1210_v50, 1  ;;  %v7180_v4 = vmov 0  ;;  %vm6238_vm2 = vcmp.eq.s32.totalorder %v1198_v51, 1 }
 0x37b   :  { %v7181_v4 = vsel %vm6234_vm4, 4294967295, %v7180_v4  ;;  %v7182_v8 = vmov 0  ;;  %v1206_v10 = vrot.slane %v1148_v52, %v6021_v21  ;;  %v1150_v11 = vsel %vm1134_vm3, 1, %v5787_v22 }
 0x37c   :  { %v7183_v8 = vsel %vm6238_vm2, 4294967295, %v7182_v8  ;;  %v1284_v13 = vsel %vm7141_vm12, %v6226_v59, -inf  ;;  %v1275_v16 = vsel %vm7141_vm12, %v6230_v60, -inf  ;;  %v6250_v17 = vsel %vm6234_vm4, -1e+09, %v998_v61 }
 0x37d   :  { %1270 = vmax.xlane.f32.xlu0 %v1269_v53  ;;  %1279 = vmax.xlane.f32.xlu1 %v1278_v54  ;;  %v6254_v18 = vsel %vm6238_vm2, -1e+09, %v1000_v63  ;;  %v1001_v19 = vcombine.high %v991_v47, %v5773_v9  ;;  %vm6257_vm13 = vcmp.eq.s32.totalorder %v1206_v10, 1  ;;  %v7184_v22 = vmov 0 }
 0x37e   :  { %v7185_v22 = vsel %vm6257_vm13, 4294967295, %v7184_v22  ;;  %v1214_v20 = vrot.slane %v1150_v11, %v6021_v21  ;;  %v1290_v23 = vsel %vm7141_vm12, %v6250_v17, -inf  ;;  %v1281_v27 = vsel %vm7141_vm12, %v6254_v18, -inf }
 0x37f   :  { %v6268_v28 = vsel %vm6257_vm13, -1e+09, %v1001_v19  ;;  %v1002_v31 = vcombine.high %v998_v61, %v5773_v9  ;;  %v7186_v32 = vmov 0  ;;  %vm7190_vm8 = vcmask 195584  }
 0x380   :  { %vm6271_vm3 = vcmp.eq.s32.totalorder %v1214_v20, 1  ;;  %v1287_v21 = vsel %vm7141_vm12, %v6268_v28, -inf  ;;  %vm7193_vm7 = vmmov %vm7190_vm8 }
 0x381   :  { %1285 = vmax.xlane.f32.xlu1 %v1284_v13  ;;  %1276 = vmax.xlane.f32.xlu0 %v1275_v16  ;;  %v7187_v32 = vsel %vm6271_vm3, 4294967295, %v7186_v32  ;;  %v6279_v33 = vsel %vm6271_vm3, -1e+09, %v1002_v31  ;;  %vm7189_vm3 = vcmask 130048  }
 0x382   :  { %v1293_v29 = vsel %vm7141_vm12, %v6279_v33, -inf  ;;  %vm7192_vm9 = vmmov %vm7189_vm3 }
 0x385   :  { %1291 = vmax.xlane.f32.xlu1 %v1290_v23  ;;  %1282 = vmax.xlane.f32.xlu0 %v1281_v27 }
 0x389   :  { %1288 = vmax.xlane.f32.xlu0 %v1287_v21 }
 0x38d   :  { %1294 = vmax.xlane.f32.xlu0 %v1293_v29 }
 0x3fa   :  { %v1262_v34 = vpop.xlane.xlu1 %1261  ;;  %v1250_v35 = vpop.xlane.xlu0 %1249 }
 0x3fb   :  { %v1296_v39 = vsub.f32 %v6105_v38, %v1250_v35  ;;  %v1300_v47 = vsub.f32 %v6101_v37, %v1262_v34 }
 0x3fd   :  { %v1312_v40 = vmul.f32 1.442695, %v1296_v39  ;;  %v1320_v53 = vmul.f32 1.442695, %v1300_v47 }
 0x3fe   :  { %v1268_v58 = vpop.xlane.xlu1 %1267  ;;  %v1256_v50 = vpop.xlane.xlu0 %1255 }
 0x3ff   :  { %v1298_v51 = vsub.f32 %v6118_v46, %v1256_v50  ;;  %5522 = vpow2.f32 %v1312_v40  ;;  %v1302_v54 = vsub.f32 %v6114_v45, %v1268_v58 }
 0x401   :  { %v1316_v52 = vmul.f32 1.442695, %v1298_v51  ;;  %v1324_v37 = vmul.f32 1.442695, %v1302_v54 }
 0x402   :  { %v1253_v61 = vpop.xlane.xlu1 %1252  ;;  %v1259_v63 = vpop.xlane.xlu0 %1258 }
 0x403   :  { %v1297_v10 = vsub.f32 %v6138_v2, %v1253_v61  ;;  %v1299_v11 = vsub.f32 %v6134_v62, %v1259_v63  ;;  %5524 = vpow2.f32 %v1316_v52 }
 0x404   :  { %5526 = vpow2.f32 %v1320_v53 }
 0x405   :  { %v1314_v38 = vmul.f32 1.442695, %v1297_v10  ;;  %v1318_v13 = vmul.f32 1.442695, %v1299_v11 }
 0x406   :  { %v1274_v16 = vpop.xlane.xlu1 %1273  ;;  %v1265_v19 = vpop.xlane.xlu0 %1264 }
 0x407   :  { %5528 = vpow2.f32 %v1314_v38  ;;  %v1304_v46 = vsub.f32 %v6175_v26, %v1274_v16  ;;  %v1301_v20 = vsub.f32 %v6171_v24, %v1265_v19 }
 0x408   :  { %5530 = vpow2.f32 %v1318_v13 }
 0x409   :  { %v1322_v45 = vmul.f32 1.442695, %v1301_v20  ;;  %v6291_v23 = vpop.eup %5522  ;;  %5532 = vpow2.f32 %v1324_v37  ;;  %v1328_v2 = vmul.f32 1.442695, %v1304_v46 }
 0x40a   :  { %v1280_v27 = vpop.xlane.xlu1 %1279  ;;  %v1271_v62 = vpop.xlane.xlu0 %1270  ;;  %v1344_v29 = vsel %vm7141_vm12, %v6291_v23, 0.0 }
 0x40b   :  { %v1306_v31 = vsub.f32 %v6205_v44, %v1280_v27  ;;  %v1303_v21 = vsub.f32 %v6201_v41, %v1271_v62  ;;  %1345 = vadd.xlane.f32.xlu1 %v1344_v29  ;;  %5534 = vpow2.f32 %v1322_v45 }
 0x40c   :  { %5536 = vpow2.f32 %v1328_v2 }
 0x40d   :  { %v1326_v26 = vmul.f32 1.442695, %v1303_v21  ;;  %v6297_v34 = vpop.eup %5524  ;;  %v1332_v24 = vmul.f32 1.442695, %v1306_v31 }
 0x40e   :  { %v1286_v35 = vpop.xlane.xlu1 %1285  ;;  %v1277_v39 = vpop.xlane.xlu0 %1276  ;;  %v1350_v44 = vsel %vm7141_vm12, %v6297_v34, 0.0 }
 0x40f   :  { %v1308_v40 = vsub.f32 %v6226_v59, %v1286_v35  ;;  %v1305_v47 = vsub.f32 %v6230_v60, %v1277_v39  ;;  %v6303_v41 = vpop.eup %5526  ;;  %1351 = vadd.xlane.f32.xlu1 %v1350_v44  ;;  %5538 = vpow2.f32 %v1326_v26 }
 0x410   :  { %5540 = vpow2.f32 %v1332_v24  ;;  %v1356_v63 = vsel %vm7141_vm12, %v6303_v41, 0.0 }
 0x411   :  { %v6305_v58 = vpop.eup %5528  ;;  %v1330_v50 = vmul.f32 1.442695, %v1305_v47  ;;  %v1336_v51 = vmul.f32 1.442695, %v1308_v40 }
 0x412   :  { %v1292_v52 = vpop.xlane.xlu1 %1291  ;;  %v1283_v53 = vpop.xlane.xlu0 %1282  ;;  %v1347_v54 = vsel %vm7141_vm12, %v6305_v58, 0.0 }
 0x413   :  { %v6309_v59 = vpop.eup %5530  ;;  %v1310_v60 = vsub.f32 %v6250_v17, %v1292_v52  ;;  %v1307_v61 = vsub.f32 %v6254_v18, %v1283_v53  ;;  %1348 = vadd.xlane.f32.xlu0 %v1347_v54  ;;  %1357 = vadd.xlane.f32.xlu1 %v1356_v63  ;;  %5542 = vpow2.f32 %v1330_v50 }
 0x414   :  { %v6315_v10 = vpop.eup %5532  ;;  %5544 = vpow2.f32 %v1336_v51  ;;  %v1353_v37 = vsel %vm7141_vm12, %v6309_v59, 0.0 }
 0x415   :  { %v1334_v11 = vmul.f32 1.442695, %v1307_v61  ;;  %v1340_v38 = vmul.f32 1.442695, %v1310_v60  ;;  %v6319_v16 = vpop.eup %5534  ;;  %v1362_v18 = vsel %vm7141_vm12, %v6315_v10, 0.0 }
 0x416   :  { %v1289_v13 = vpop.xlane.xlu0 %1288  ;;  %v6324_v19 = vpop.eup %5536  ;;  %v1359_v45 = vsel %vm7141_vm12, %v6319_v16, 0.0 }
 0x417   :  { %v1309_v17 = vsub.f32 %v6268_v28, %v1289_v13  ;;  %1354 = vadd.xlane.f32.xlu0 %v1353_v37  ;;  %1363 = vadd.xlane.f32.xlu1 %v1362_v18  ;;  %5546 = vpow2.f32 %v1334_v11  ;;  %v1368_v28 = vsel %vm7141_vm12, %v6324_v19, 0.0 }
 0x418   :  { %5548 = vpow2.f32 %v1340_v38 }
 0x419   :  { %v1338_v46 = vmul.f32 1.442695, %v1309_v17  ;;  %v6328_v2 = vpop.eup %5538 }
 0x41a   :  { %v1295_v20 = vpop.xlane.xlu0 %1294  ;;  %v6333_v62 = vpop.eup %5540  ;;  %v1365_v21 = vsel %vm7141_vm12, %v6328_v2, 0.0 }
 0x41b   :  { %v1311_v27 = vsub.f32 %v6279_v33, %v1295_v20  ;;  %1360 = vadd.xlane.f32.xlu0 %v1359_v45  ;;  %1369 = vadd.xlane.f32.xlu1 %v1368_v28  ;;  %5550 = vpow2.f32 %v1338_v46  ;;  %v1374_v26 = vsel %vm7141_vm12, %v6333_v62, 0.0 }
 0x41d   :  { %v1342_v31 = vmul.f32 1.442695, %v1311_v27  ;;  %v6337_v29 = vpop.eup %5542 }
 0x41e   :  { %v6341_v24 = vpop.eup %5544  ;;  %v1371_v33 = vsel %vm7141_vm12, %v6337_v29, 0.0 }
 0x41f   :  { %1366 = vadd.xlane.f32.xlu0 %v1365_v21  ;;  %1375 = vadd.xlane.f32.xlu1 %v1374_v26  ;;  %5552 = vpow2.f32 %v1342_v31  ;;  %v1380_v39 = vsel %vm7141_vm12, %v6341_v24, 0.0 }
 0x421   :  { %v6345_v35 = vpop.eup %5546 }
 0x422   :  { %v6349_v40 = vpop.eup %5548  ;;  %v1377_v47 = vsel %vm7141_vm12, %v6345_v35, 0.0 }
 0x423   :  { %1372 = vadd.xlane.f32.xlu0 %v1371_v33  ;;  %1381 = vadd.xlane.f32.xlu1 %v1380_v39  ;;  %v1386_v50 = vsel %vm7141_vm12, %v6349_v40, 0.0 }
 0x425   :  { %v6353_v44 = vpop.eup %5550 }
 0x426   :  { %v1383_v51 = vsel %vm7141_vm12, %v6353_v44, 0.0 }
 0x427   :  { %1378 = vadd.xlane.f32.xlu0 %v1377_v47  ;;  %1387 = vadd.xlane.f32.xlu1 %v1386_v50 }
 0x429   :  { %v6359_v52 = vpop.eup %5552 }
 0x42a   :  { %v1389_v53 = vsel %vm7141_vm12, %v6359_v52, 0.0  ;;  %vm7188_vm12 = vcmask 64512  }
 0x42b   :  { %1384 = vadd.xlane.f32.xlu0 %v1383_v51  ;;  %vm7191_vm4 = vmmov %vm7188_vm12 }
 0x42f   :  { %1390 = vadd.xlane.f32.xlu0 %v1389_v53 }
 0x498   :  { %v1346_v54 = vpop.xlane.xlu1 %1345 }
 0x49c   :  { %v1352_v60 = vpop.xlane.xlu1 %1351 }
 0x49d   :  { %5554 = vrcp.f32 %v1352_v60 }
 0x4a0   :  { %v1349_v61 = vpop.xlane.xlu0 %1348  ;;  %v1358_v63 = vpop.xlane.xlu1 %1357 }
 0x4a1   :  { %5556 = vrcp.f32 %v1349_v61 }
 0x4a4   :  { %v1355_v11 = vpop.xlane.xlu0 %1354  ;;  %v1364_v38 = vpop.xlane.xlu1 %1363 }
 0x4a5   :  { %5558 = vrcp.f32 %v1355_v11 }
 0x4a6   :  { %5560 = vrcp.f32 %v1346_v54 }
 0x4a7   :  { %5562 = vrcp.f32 %v1364_v38  ;;  %v5555_v18 = vpop.eup %5554 }
 0x4a8   :  { %v1361_v13 = vpop.xlane.xlu0 %1360  ;;  %5564 = vrcp.f32 %v1358_v63  ;;  %v1370_v37 = vpop.xlane.xlu1 %1369  ;;  %v1397_v39 = vmul.f32 %v5555_v18, %v6297_v34 }
 0x4a9   :  { %5566 = vrcp.f32 %v1361_v13 }
 0x4ab   :  { %v5557_v20 = vpop.eup %5556 }
 0x4ac   :  { %v1367_v17 = vpop.xlane.xlu0 %1366  ;;  %v1376_v46 = vpop.xlane.xlu1 %1375  ;;  %v1395_v33 = vmul.f32 %v5557_v20, %v6305_v58 }
 0x4ad   :  { %5568 = vrcp.f32 %v1367_v17 }
 0x4ae   :  { %5570 = vrcp.f32 %v1376_v46 }
 0x4af   :  { %v5559_v45 = vpop.eup %5558 }
 0x4b0   :  { %v5561_v27 = vpop.eup %5560  ;;  %v1373_v28 = vpop.xlane.xlu0 %1372  ;;  %v1399_v31 = vmul.f32 %v5559_v45, %v6309_v59 }
 0x4b1   :  { %v5563_v21 = vpop.eup %5562  ;;  %v1382_v26 = vpop.xlane.xlu1 %1381  ;;  %5572 = vrcp.f32 %v1373_v28  ;;  %v1393_v51 = vmul.f32 %v5561_v27, %v6291_v23 }
 0x4b2   :  { %v5565_v47 = vpop.eup %5564  ;;  %v1405_v53 = vmul.f32 %v5563_v21, %v6315_v10  ;;  %v1432_v54 = vcombine.low %v1395_v33, %v1399_v31 }
 0x4b3   :  { %v5567_v60 = vpop.eup %5566  ;;  %v1401_v59 = vmul.f32 %v5565_v47, %v6303_v41  ;;  %v1424_v63 = vcombine.low %v1393_v51, %v1397_v39 }
 0x4b4   :  { %v1379_v50 = vpop.xlane.xlu0 %1378  ;;  %v1403_v34 = vmul.f32 %v5567_v60, %v6319_v16  ;;  %v1439_v13 = vrot.slane %v1432_v54, %v6029_v36 }
 0x4b5   :  { %v1388_v61 = vpop.xlane.xlu1 %1387  ;;  %5574 = vrcp.f32 %v1379_v50  ;;  %v1440_v23 = vcombine.low %v1401_v59, %v1405_v53  ;;  %v1431_v10 = vrot.slane %v1424_v63, %v6029_v36 }
 0x4b6   :  { %5576 = vrcp.f32 %v1370_v37 }
 0x4b7   :  { %v5569_v11 = vpop.eup %5568  ;;  %5578 = vrcp.f32 %v1388_v61  ;;  %v1447_v37 = vrot.slane %v1440_v23, %v6029_v36  ;;  %v1456_v46 = vcombine.low %v1431_v10, %v1439_v13  ;;  %v1457_v33 = vcombine.high %v1431_v10, %v1439_v13 }
 0x4b8   :  { %v1385_v58 = vpop.xlane.xlu0 %1384  ;;  %v1407_v38 = vmul.f32 %v5569_v11, %v6328_v2  ;;  %5580 = vrcp.f32 %v1382_v26  ;;  %v5571_v20 = vpop.eup %5570 }
 0x4b9   :  { %5582 = vrcp.f32 %v1385_v58  ;;  %v6377_v21 = vrot.slane %v1456_v46, %v6036_v42  ;;  %v1413_v47 = vmul.f32 %v5571_v20, %v6333_v62  ;;  %v1471_v59 = vrot.slane %v1457_v33, %v6036_v42 }
 0x4ba   :  { %v1448_v17 = vcombine.low %v1403_v34, %v1407_v38 }
 0x4bb   :  { %v5573_v45 = vpop.eup %5572 }
 0x4bc   :  { %v1391_v18 = vpop.xlane.xlu0 %1390  ;;  %v1455_v41 = vrot.slane %v1448_v17, %v6029_v36  ;;  %v1411_v50 = vmul.f32 %v5573_v45, %v6337_v29 }
 0x4bd   :  { %5584 = vrcp.f32 %v1391_v18 }
 0x4be   :  { %v1472_v16 = vcombine.low %v1447_v37, %v1455_v41  ;;  %v1473_v27 = vcombine.high %v1447_v37, %v1455_v41 }
 0x4bf   :  { %v5575_v2 = vpop.eup %5574 }
 0x4c0   :  { %v5577_v28 = vpop.eup %5576  ;;  %v1415_v31 = vmul.f32 %v5575_v2, %v6345_v35  ;;  %v6380_v26 = vrot.slane %v1472_v16, %v6036_v42  ;;  %v1487_v35 = vrot.slane %v1473_v27, %v6036_v42 }
 0x4c1   :  { %v5579_v39 = vpop.eup %5578  ;;  %v1409_v60 = vmul.f32 %v5577_v28, %v6324_v19 }
 0x4c2   :  { %v1489_v51 = vcombine.high %v6377_v21, %v6380_v26  ;;  %v1488_v53 = vcombine.low %v6377_v21, %v6380_v26  ;;  %v5581_v54 = vpop.eup %5580  ;;  %v1421_v61 = vmul.f32 %v5579_v39, %v6349_v40  ;;  %v1500_v62 = vcombine.low %v1411_v50, %v1415_v31 }
 0x4c3   :  { %v5583_v63 = vpop.eup %5582  ;;  %v1417_v29 = vmul.f32 %v5581_v54, %v6341_v24  ;;  %v1490_v11 = vcombine.low %v1471_v59, %v1487_v35  ;;  %v1492_v58 = vcombine.low %v1409_v60, %v1413_v47  ;;  %v1491_v31 = vcombine.high %v1471_v59, %v1487_v35 }
 0x4c4   :  { %1562 = vrot.lane.b32.xlu1 %v1489_v51, %s5771_s10  ;;  %v1419_v38 = vmul.f32 %v5583_v63, %v6353_v44  ;;  %v1507_v19 = vrot.slane %v1500_v62, %v6029_v36  ;;  %v6456_v63 = vld [vmem:[%s7130_s3 + $0x8] sm:$0xff] }
 0x4c5   :  { %v1508_v40 = vcombine.low %v1417_v29, %v1421_v61  ;;  %v1499_v23 = vrot.slane %v1492_v58, %v6029_v36  ;;  %v6461_v29 = vld [vmem:[%s7130_s3 + $0x20] sm:$0xff] }
 0x4c7   :  { %v5585_v34 = vpop.eup %5584  ;;  %v1515_v17 = vrot.slane %v1508_v40, %v6029_v36  ;;  %v1525_v24 = vcombine.high %v1499_v23, %v1507_v19  ;;  %v1524_v37 = vcombine.low %v1499_v23, %v1507_v19 }
 0x4c8   :  { %v1423_v13 = vmul.f32 %v5585_v34, %v6359_v52  ;;  %1570 = vrot.lane.b32.xlu1 %v1490_v11, %s5782_s27  ;;  %v5490_v11 = vpack.i.bf16 %v6461_v29, %v6456_v63 }
 0x4c9   :  { %v1539_v44 = vrot.slane %v1525_v24, %v6036_v42  ;;  %v1532_v20 = vrot.slane %v1524_v37, %v6036_v42  ;;  %v6485_v24 = vld [vmem:[%s7130_s3 + $0x38] sm:$0xff]  ;;  %v6490_v37 = vld [vmem:[%s7130_s3 + $0x50] sm:$0xff] }
 0x4ca   :  { %v1516_v10 = vcombine.low %v1419_v38, %v1423_v13 }
 0x4cc   :  { %v1523_v18 = vrot.slane %v1516_v10, %v6029_v36 }
 0x4ce   :  { %v1541_v41 = vcombine.high %v1515_v17, %v1523_v18  ;;  %v1540_v46 = vcombine.low %v1515_v17, %v1523_v18 }
 0x4d0   :  { %v1555_v52 = vrot.slane %v1541_v41, %v6036_v42  ;;  %v1548_v45 = vrot.slane %v1540_v46, %v6036_v42  ;;  %v5495_v41 = vpack.i.bf16 %v6490_v37, %v6485_v24 }
 0x4d2   :  { %v1558_v16 = vcombine.low %v1539_v44, %v1555_v52  ;;  %v1557_v27 = vcombine.high %v1532_v20, %v1548_v45  ;;  %v1556_v2 = vcombine.low %v1532_v20, %v1548_v45  ;;  %v1559_v28 = vcombine.high %v1539_v44, %v1555_v52 }
 0x4d4   :  { %1572 = vrot.lane.b32.xlu1 %v1558_v16, %s5782_s27  ;;  %1564 = vrot.lane.b32.xlu0 %v1557_v27, %s5771_s10 }
 0x4d8   :  { %1580 = vrot.lane.b32.xlu1 %v1559_v28, %s5783_s28  ;;  %1578 = vrot.lane.b32.xlu0 %v1491_v31, %s5783_s28 }
 0x4dc   :  { %1666 = vrot.lane.b32.xlu1 %v5912_v12, %s5788_s29  ;;  %1590 = vrot.lane.b32.xlu0 %v5918_v14, %s5788_s29 }
 0x4e0   :  { %1744 = vrot.lane.b32.xlu0 %v5918_v14, %s5789_s30 }
 0x4e4   :  { %1821 = vrot.lane.b32.xlu0 %v5912_v12, %s5789_s30 }
 0x4e8   :  { %1898 = vrot.lane.b32.xlu0 %v5918_v14, %s5790_s7 }
 0x4ec   :  { %1975 = vrot.lane.b32.xlu0 %v5912_v12, %s5790_s7 }
 0x4f0   :  { %2052 = vrot.lane.b32.xlu0 %v5918_v14, %s5791_s8 }
 0x4f4   :  { %2129 = vrot.lane.b32.xlu0 %v5912_v12, %s5791_s8 }
 0x4f8   :  { %5491 = vrot.lane.b32.xlu0 %v5490_v11, %s5788_s29 }
 0x536   :  { %v1563_v21 = vpop.permute.xlu1 %1562 }
 0x537   :  { %v1584_v47 = vsel %vm7188_vm12, %v1488_v53, %v1563_v21  ;;  %vm7194_vm12 = vmmov %vm7191_vm4 }
 0x53a   :  { %v1571_v26 = vpop.permute.xlu1 %1570 }
 0x53b   :  { %v1586_v50 = vsel %vm7189_vm3, %v1584_v47, %v1571_v26  ;;  %vm7198_vm3 = vmmov %vm7191_vm4 }
 0x546   :  { %v1573_v33 = vpop.permute.xlu1 %1572  ;;  %v1565_v39 = vpop.permute.xlu0 %1564 }
 0x547   :  { %v1585_v60 = vsel %vm7191_vm4, %v1556_v2, %v1565_v39 }
 0x548   :  { %v1587_v61 = vsel %vm7192_vm9, %v1585_v60, %v1573_v33  ;;  %vm7196_vm9 = vmmov 0  }
 0x54a   :  { %v1581_v51 = vpop.permute.xlu1 %1580  ;;  %v1579_v35 = vpop.permute.xlu0 %1578 }
 0x54b   :  { %v6422_v54 = vsel %vm7190_vm8, %v1586_v50, %v1579_v35  ;;  %v6429_v53 = vsel %vm7193_vm7, %v1587_v61, %v1581_v51  ;;  %vm7195_vm8 = vmmov %vm7191_vm4 }
 0x54c   :  { %1742 = vrot.lane.b32.xlu1 %v6422_v54, %s5777_s21  ;;  %vm7197_vm7 = vmmov %vm7191_vm4 }
 0x54e   :  { %v1667_v14 = vpop.permute.xlu1 %1666  ;;  %v1591_v12 = vpop.permute.xlu0 %1590 }
 0x54f   :  { %5207 = vmatpush3.msra.mxu0 %v1591_v12  ;;  %5212 = vmatpush3.msra.mxu1 %v1667_v14 }
 0x550   :  { %1896 = vrot.lane.b32.xlu1 %v6422_v54, %s5779_s23  ;;  %5209 = vmatmul.mubr.msk.f32.vlgmr.msra.gmra.mrb[6].mxu0 %vm7194_vm12, %v6422_v54  ;;  %vm7199_vm12 = vmmov %vm7198_vm3 }
 0x551   :  { %5214 = vmatmul.mubr.msk.f32.vlgmr.msra.gmra.mrb[12].mxu1 %vm7195_vm8, %v6429_v53  ;;  %5216 = vmatprep.subr.mxu0 %v5773_v9  ;;  %vm7200_vm8 = vmmov %vm7198_vm3 }
 0x552   :  { %v1745_v59 = vpop.permute.xlu0 %1744  ;;  %5221 = vmatprep.subr.mxu1 %v5773_v9  ;;  %5218 = vmatprep.mubr.msk.f32.mxu0 %vm7196_vm9, %v5773_v9 }
 0x553   :  { %5217 = vmatpush3.msra.mxu0 %v1745_v59  ;;  %5223 = vmatprep.mubr.msk.f32.mxu1 %vm7196_vm9, %v5773_v9 }
 0x554   :  { %2050 = vrot.lane.b32.xlu1 %v6422_v54, %s5781_s26  ;;  %5226 = vmatprep.subr.mxu0 %v5773_v9 }
 0x556   :  { %v1822_v62 = vpop.permute.xlu0 %1821 }
 0x557   :  { %5222 = vmatpush3.msra.mxu1 %v1822_v62 }
 0x558   :  { %1819 = vrot.lane.b32.xlu1 %v6429_v53, %s5777_s21  ;;  %5231 = vmatprep.subr.mxu1 %v5773_v9 }
 0x55a   :  { %v1899_v58 = vpop.permute.xlu0 %1898 }
 0x55c   :  { %1973 = vrot.lane.b32.xlu1 %v6429_v53, %s5779_s23 }
 0x55e   :  { %v1976_v34 = vpop.permute.xlu0 %1975 }
 0x560   :  { %2127 = vrot.lane.b32.xlu1 %v6429_v53, %s5781_s26 }
 0x562   :  { %v2053_v19 = vpop.permute.xlu0 %2052 }
 0x564   :  { %5496 = vrot.lane.b32.xlu1 %v5495_v41, %s5788_s29 }
 0x566   :  { %v2130_v17 = vpop.permute.xlu0 %2129 }
 0x56a   :  { %v5492_v45 = vpop.permute.xlu0 %5491 }
 0x56b   :  { %v5494_v16 = vunpack.i.h.bf16 %v5492_v45  ;;  %v5493_v27 = vunpack.i.l.bf16 %v5492_v45 }
 0x56d   :  { %v5408_v2 = vpack.c.bf16 %v5494_v16, %v5493_v27  ;;  %v5666_v27 = vld [vmem:[#allocation2 + $0x8] sm:$0xff] }
 0x5be   :  { %v1743_v38 = vpop.permute.xlu1 %1742 }
 0x5bf   :  { %5219 = vmatmul.mubr.msk.f32.vlgmr.msra.gmra.mrb[8].mxu0 %vm7197_vm7, %v1743_v38  ;;  %vm7201_vm7 = vmmov %vm7198_vm3 }
 0x5c0   :  { %5227 = vmatpush3.msra.mxu0 %v1899_v58  ;;  %5228 = vmatprep.mubr.msk.f32.mxu0 %vm7196_vm9, %v5773_v9 }
 0x5c1   :  { %5236 = vmatprep.subr.mxu0 %v5773_v9 }
 0x5c2   :  { %v1897_v13 = vpop.permute.xlu1 %1896 }
 0x5c3   :  { %5229 = vmatmul.mubr.msk.f32.vlgmr.msra.gmra.mrb[10].mxu0 %vm7191_vm4, %v1897_v13  ;;  %vm7202_vm4 = vmmov %vm7198_vm3 }
 0x5c4   :  { %5237 = vmatpush3.msra.mxu0 %v2053_v19  ;;  %5238 = vmatprep.mubr.msk.f32.mxu0 %vm7196_vm9, %v5773_v9 }
 0x5c5   :  { %5409 = vmatprep.subr.bf16.mxu0 %v5408_v2 }
 0x5c6   :  { %v2051_v40 = vpop.permute.xlu1 %2050 }
 0x5c7   :  { %5239 = vmatmul.mubr.msk.f32.vlgmr.msra.gmra.mrb[12].mxu0 %vm7198_vm3, %v2051_v40  ;;  %vm7203_vm3 = vcmask 130048  }
 0x5c8   :  { %5411 = vmatpush3.bf16.msra.mxu0 %v5408_v2  ;;  %vm7207_vm13 = vmmov %vm7203_vm3 }
 0x5ca   :  { %v1820_v23 = vpop.permute.xlu1 %1819 }
 0x5cb   :  { %5224 = vmatmul.mubr.msk.f32.vlgmr.msra.gmra.mrb[14].mxu1 %vm7199_vm12, %v1820_v23  ;;  %vm7204_vm12 = vcmask 195584  }
 0x5cc   :  { %5232 = vmatpush3.msra.mxu1 %v1976_v34  ;;  %5233 = vmatprep.mubr.msk.f32.mxu1 %vm7196_vm9, %v5773_v9  ;;  %vm7208_vm15 = vmmov %vm7204_vm12 }
 0x5cd   :  { %5241 = vmatprep.subr.mxu1 %v5773_v9 }
 0x5ce   :  { %v1974_v10 = vpop.permute.xlu1 %1973 }
 0x5cf   :  { %5234 = vmatmul.mubr.msk.f32.vlgmr.msra.gmra.mrb[16].mxu1 %vm7200_vm8, %v1974_v10  ;;  %vm7205_vm8 = vcmask 261120  }
 0x5d0   :  { %5242 = vmatpush3.msra.mxu1 %v2130_v17  ;;  %5243 = vmatprep.mubr.msk.f32.mxu1 %vm7196_vm9, %v5773_v9  ;;  %vm7209_vm2 = vmmov %vm7205_vm8 }
 0x5d2   :  { %v2128_v18 = vpop.permute.xlu1 %2127 }
 0x5d3   :  { %5244 = vmatmul.mubr.msk.f32.vlgmr.msra.gmra.mrb[18].mxu1 %vm7201_vm7, %v2128_v18  ;;  %vm7206_vm7 = vmmov %vm7202_vm4 }
 0x5d6   :  { %v5497_v28 = vpop.permute.xlu1 %5496 }
 0x5d7   :  { %v5499_v31 = vunpack.i.h.bf16 %v5497_v28  ;;  %v5498_v21 = vunpack.i.l.bf16 %v5497_v28  ;;  %v5667_v28 = vld [vmem:[#allocation2] sm:$0xff] }
 0x5d9   :  { %v5412_v33 = vpack.c.bf16 %v5499_v31, %v5498_v21 }
 0x5db   :  { %5413 = vmatprep.subr.bf16.mxu0 %v5412_v33 }
 0x5dc   :  { %5415 = vmatpush3.bf16.msra.mxu0 %v5412_v33  ;;  %v5428_v33 = vpack.c.bf16 %v6490_v37, %v6485_v24 }
 0x623   :  { %v1662_v46 = vpop.f32.mrb[6].mxu0 }
 0x624   :  { %v1738_v44 = vpop.f32.mrb[12].mxu1  ;;  %v5210_v52 = vpop.f32.mrb[7].mxu0 }
 0x625   :  { %v5215_v20 = vpop.f32.mrb[13].mxu1 }
 0x692   :  { %v1815_v26 = vpop.f32.mrb[8].mxu0 }
 0x693   :  { %2206 = vrot.lane.b32.xlu0 %v1815_v26, %s5771_s10  ;;  %v5220_v39 = vpop.f32.mrb[9].mxu0  ;;  %v5424_v26 = vpack.c.bf16 %v6461_v29, %v6456_v63 }
 0x694   :  { %v102_v39 = vld [vmem:[#allocation5] sm:$0xff] }
 0x695   :  { %5425 = vmatprep.subr.bf16.mxu0 %v5424_v26 }
 0x696   :  { %v1969_v47 = vpop.f32.mrb[10].mxu0 }
 0x697   :  { %2214 = vrot.lane.b32.xlu0 %v1969_v47, %s5782_s27  ;;  %v5230_v50 = vpop.f32.mrb[11].mxu0  ;;  %v103_v47 = vld [vmem:[#allocation5 + $0x8] sm:$0xff] }
 0x69a   :  { %v2123_v51 = vpop.f32.mrb[12].mxu0 }
 0x69b   :  { %2222 = vrot.lane.b32.xlu0 %v2123_v51, %s5783_s28  ;;  %v5240_v35 = vpop.f32.mrb[13].mxu0 }
 0x69e   :  { %v1892_v60 = vpop.f32.mrb[14].mxu1 }
 0x69f   :  { %2208 = vrot.lane.b32.xlu1 %v1892_v60, %s5771_s10  ;;  %v5225_v14 = vpop.f32.mrb[15].mxu1  ;;  %v5668_v60 = vld [vmem:[%s7130_s3 + $0x30] sm:$0xff] }
 0x6a0   :  { %v5669_v14 = vld [vmem:[%s7130_s3 + $0x48] sm:$0xff] }
 0x6a2   :  { %v2046_v12 = vpop.f32.mrb[16].mxu1 }
 0x6a3   :  { %2216 = vrot.lane.b32.xlu1 %v2046_v12, %s5782_s27  ;;  %v5235_v61 = vpop.f32.mrb[17].mxu1  ;;  %v5505_v12 = vpack.i.bf16 %v5669_v14, %v5668_v60 }
 0x6a6   :  { %v2200_v59 = vpop.f32.mrb[18].mxu1 }
 0x6a7   :  { %2224 = vrot.lane.b32.xlu1 %v2200_v59, %s5783_s28  ;;  %v5245_v62 = vpop.f32.mrb[19].mxu1 }
 0x705   :  { %v2207_v11 = vpop.permute.xlu0 %2206 }
 0x706   :  { %v2228_v34 = vsel %vm7202_vm4, %v1662_v46, %v2207_v11  ;;  %v4997_v46 = vld [vmem:[%s7132_s5 + $0x3] ss:$0 sm:$0xff]  ;;  %vm7210_vm4 = vmmov %vm7209_vm2 }
 0x709   :  { %v2215_v58 = vpop.permute.xlu0 %2214 }
 0x70a   :  { %v2230_v38 = vsel %vm7203_vm3, %v2228_v34, %v2215_v58  ;;  %vm7213_vm3 = vmmov %vm7209_vm2  ;;  %v5005_v58 = vld [vmem:[%s7132_s5 + $0x2] ss:$0 sm:$0xff] }
 0x70d   :  { %v2223_v13 = vpop.permute.xlu0 %2222 }
 0x70e   :  { %v2232_v19 = vsel %vm7204_vm12, %v2230_v38, %v2223_v13  ;;  %vm7214_vm12 = vmmov %vm7209_vm2 }
 0x70f   :  { %5254 = vmatprep.mubr.msk.f32.mxu0 %vm7205_vm8, %v2232_v19  ;;  %vm7215_vm8 = vmmov %vm7209_vm2 }
 0x711   :  { %v2209_v40 = vpop.permute.xlu1 %2208 }
 0x712   :  { %v2229_v10 = vsel %vm7206_vm7, %v1738_v44, %v2209_v40  ;;  %vm7216_vm7 = vmmov %vm7209_vm2 }
 0x715   :  { %v2217_v23 = vpop.permute.xlu1 %2216 }
 0x716   :  { %v2231_v17 = vsel %vm7207_vm13, %v2229_v10, %v2217_v23  ;;  %vm7211_vm13 = vmmov %vm7209_vm2 }
 0x719   :  { %v2225_v18 = vpop.permute.xlu1 %2224 }
 0x71a   :  { %v2233_v41 = vsel %vm7208_vm15, %v2231_v17, %v2225_v18  ;;  %vm7212_vm15 = vmmov %vm7209_vm2 }
 0x71b   :  { %5255 = vmatmul.mubr.msk.f32.vlgmr.msra.gmra.mrb[14].mxu0 %vm7209_vm2, %v2233_v41 }
 0x71c   :  { %5276 = vmatprep.mubr.msk.f32.mxu0 %vm7209_vm2, %v102_v39  ;;  %5427 = vmatpush3.bf16.msra.mxu0 %v5424_v26 }
 0x71d   :  { %5429 = vmatprep.subr.bf16.mxu0 %v5428_v33 }
 0x720   :  { %5431 = vmatpush3.bf16.msra.mxu0 %v5428_v33 }
 0x721   :  { %5289 = vmatprep.subr.mxu0 %v5773_v9 }
 0x723   :  { %5277 = vmatmul.mubr.msk.f32.vlgmr.msra.gmra.mrb[16].mxu0 %vm7212_vm15, %v103_v47 }
 0x724   :  { %5291 = vmatprep.mubr.msk.f32.mxu0 %vm7196_vm9, %v5773_v9 }
 0x7ee   :  { %v5256_v52 = vpop.f32.mrb[14].mxu0 }
 0x7ef   :  { %v2332_v20 = vadd.f32 %v5256_v52, %v4997_v46  ;;  %v2326_v45 = vpop.f32.mrb[15].mxu0 }
 0x7f0   :  { %v2327_v16 = vadd.f32 %v4997_v46, %v2326_v45 }
 0x7f1   :  { %v2336_v2 = vadd.f32 %v5666_v27, %v2332_v20 }
 0x7f2   :  { %v2335_v31 = vadd.f32 %v5667_v28, %v2327_v16 }
 0x7f3   :  { %v2340_v44 = vsel %vm7210_vm4, %v2336_v2, 0.0  ;;  %vm7217_vm4 = vcmask 64512  }
 0x7f4   :  { %2341 = vadd.xlane.f32.xlu1 %v2340_v44  ;;  %v2337_v21 = vsel %vm7211_vm13, %v2335_v31, 0.0  ;;  %vm7218_vm13 = vmmov %vm7217_vm4 }
 0x7f5   :  { %2338 = vadd.xlane.f32.xlu0 %v2337_v21  ;;  %v5001_v21 = vld [vmem:[%s7132_s5 + $0x8] ss:$0 sm:$0xff]  ;;  %vm7219_vm2 = vmmov %vm7217_vm4 }
 0x7f6   :  { %v5278_v34 = vpop.f32.mrb[16].mxu0  ;;  %vm7220_vm15 = vmmov %vm7219_vm2 }
 0x7f7   :  { %v2553_v38 = vpop.f32.mrb[17].mxu0  ;;  %v6541_v19 = vadd.f32 %v5278_v34, %v5005_v58 }
 0x7f8   :  { %v6539_v13 = vadd.f32 %v5005_v58, %v2553_v38 }
 0x805   :  { %5501 = vrot.lane.b32.xlu1 %v5500_v3, %s5792_s18 }
 0x809   :  { %2716 = vrot.lane.b32.xlu1 %v6539_v13, %s5777_s21 }
 0x80d   :  { %2794 = vrot.lane.b32.xlu1 %v6541_v19, %s5777_s21 }
 0x811   :  { %2950 = vrot.lane.b32.xlu1 %v6541_v19, %s5779_s23 }
 0x815   :  { %3106 = vrot.lane.b32.xlu1 %v6541_v19, %s5781_s26 }
 0x881   :  { %v2342_v0 = vpop.xlane.xlu1 %2341 }
 0x882   :  { %v2345_v1 = vmul.f32 0.03125, %v2342_v0  ;;  %v2339_v3 = vpop.xlane.xlu0 %2338  ;;  %v5002_v0 = vld [vmem:[%s7132_s5 + $0x1] ss:$0 sm:$0xff] }
 0x883   :  { %v2344_v63 = vmul.f32 0.03125, %v2339_v3 }
 0x884   :  { %v2347_v29 = vsub.f32 %v2336_v2, %v2345_v1  ;;  %v5000_v2 = vld [vmem:[%s7132_s5 + $0x7] ss:$0 sm:$0xff] }
 0x885   :  { %v2346_v24 = vsub.f32 %v2335_v31, %v2344_v63  ;;  %v5502_v61 = vpop.permute.xlu1 %5501 }
 0x886   :  { %v2349_v37 = vmul.f32 %v2347_v29, %v2347_v29  ;;  %v5504_v59 = vunpack.i.h.bf16 %v5502_v61  ;;  %v5503_v62 = vunpack.i.l.bf16 %v5502_v61 }
 0x887   :  { %v2348_v51 = vmul.f32 %v2346_v24, %v2346_v24 }
 0x888   :  { %v2353_v50 = vsel %vm7213_vm3, %v2349_v37, 0.0  ;;  %v5416_v11 = vpack.c.bf16 %v5504_v59, %v5503_v62  ;;  %vm7221_vm3 = vmmov %vm7219_vm2 }
 0x889   :  { %2354 = vadd.xlane.f32.xlu0 %v2353_v50  ;;  %v2350_v35 = vsel %vm7214_vm12, %v2348_v51, 0.0  ;;  %v2717_v47 = vpop.permute.xlu1 %2716  ;;  %vm7222_vm12 = vmmov %vm7219_vm2 }
 0x88a   :  { %5417 = vmatprep.subr.bf16.mxu1 %v5416_v11  ;;  %5290 = vmatpush3.xpose.msk.msra.mxu0 %vm7218_vm13, %v2717_v47  ;;  %vm7226_vm13 = vmmov %vm7219_vm2 }
 0x88b   :  { %5419 = vmatpush3.bf16.msra.mxu1 %v5416_v11  ;;  %5299 = vmatprep.subr.mxu0 %v5773_v9 }
 0x88d   :  { %2351 = vadd.xlane.f32.xlu0 %v2350_v35 }
 0x8a3   :  { %5506 = vrot.lane.b32.xlu0 %v5505_v12, %s5792_s18 }
 0x8a7   :  { %2872 = vrot.lane.b32.xlu0 %v6539_v13, %s5779_s23 }
 0x8ab   :  { %3028 = vrot.lane.b32.xlu0 %v6539_v13, %s5781_s26 }
 0x916   :  { %v2355_v40 = vpop.xlane.xlu0 %2354 }
 0x917   :  { %v2357_v23 = vmul.f32 0.03125, %v2355_v40 }
 0x919   :  { %v2359_v10 = vadd.f32 1e-05, %v2357_v23 }
 0x91a   :  { %v2352_v17 = vpop.xlane.xlu0 %2351 }
 0x91b   :  { %5586 = vrsqrt.f32 %v2359_v10  ;;  %v2356_v18 = vmul.f32 0.03125, %v2352_v17 }
 0x91d   :  { %v2358_v41 = vadd.f32 1e-05, %v2356_v18 }
 0x91e   :  { %v5507_v46 = vpop.permute.xlu0 %5506 }
 0x91f   :  { %5588 = vrsqrt.f32 %v2358_v41  ;;  %v5509_v52 = vunpack.i.h.bf16 %v5507_v46  ;;  %v5508_v20 = vunpack.i.l.bf16 %v5507_v46 }
 0x921   :  { %v5420_v45 = vpack.c.bf16 %v5509_v52, %v5508_v20 }
 0x922   :  { %v2873_v50 = vpop.permute.xlu0 %2872 }
 0x923   :  { %5421 = vmatprep.subr.bf16.mxu1 %v5420_v45 }
 0x924   :  { %5423 = vmatpush3.bf16.msra.mxu1 %v5420_v45 }
 0x925   :  { %v5587_v16 = vpop.eup %5586  ;;  %5279 = vmatprep.subr.mxu1 %v5773_v9 }
 0x926   :  { %v2363_v27 = vmul.f32 %v5587_v16, %v2347_v29  ;;  %v3029_v35 = vpop.permute.xlu0 %3028 }
 0x928   :  { %v2369_v44 = vmul.f32 %v5000_v2, %v2363_v27 }
 0x929   :  { %v5589_v28 = vpop.eup %5588 }
 0x92a   :  { %v2362_v31 = vmul.f32 %v5589_v28, %v2346_v24  ;;  %v6564_v39 = vadd.f32 %v5001_v21, %v2369_v44  ;;  %v2795_v24 = vpop.permute.xlu1 %2794 }
 0x92c   :  { %v2368_v26 = vmul.f32 %v5000_v2, %v2362_v31 }
 0x92e   :  { %v6562_v33 = vadd.f32 %v5001_v21, %v2368_v26  ;;  %v2951_v37 = vpop.permute.xlu1 %2950 }
 0x930   :  { %5265 = vmatprep.mubr.msk.f32.mxu1 %vm7215_vm8, %v6562_v33  ;;  %vm7223_vm8 = vmmov %vm7219_vm2 }
 0x931   :  { %5266 = vmatmul.mubr.msk.f32.vlgmr.msra.gmra.mrb[20].mxu1 %vm7216_vm7, %v6564_v39  ;;  %vm7224_vm7 = vmmov %vm7219_vm2 }
 0x932   :  { %5280 = vmatpush3.xpose.msk.msra.mxu1 %vm7217_vm4, %v6539_v13  ;;  %5281 = vmatprep.mubr.msk.f32.mxu1 %vm7196_vm9, %v5773_v9  ;;  %v3107_v51 = vpop.permute.xlu1 %3106  ;;  %vm7225_vm4 = vmmov %vm7219_vm2 }
 0x933   :  { %5284 = vmatprep.subr.mxu1 %v5773_v9 }
 0xa04   :  { %v5267_v1 = vpop.f32.mrb[20].mxu1 }
 0xa05   :  { %v2474_v3 = vadd.f32 %v5267_v1, %v5002_v0  ;;  %v2468_v63 = vpop.f32.mrb[21].mxu1 }
 0xa06   :  { %v2469_v29 = vadd.f32 %v5002_v0, %v2468_v63 }
 0xa07   :  { %2792 = vrot.lane.b32.xlu1 %v2474_v3, %s5777_s21 }
 0xa08   :  { %2714 = vrot.lane.b32.xlu0 %v2469_v29, %s5777_s21  ;;  %5282 = vmatmul.mubr.msk.f32.vlgmr.msra.gmra.mrb[22].mxu1 %vm7219_vm2, %v2469_v29 }
 0xa09   :  { %5285 = vmatpush3.xpose.msk.msra.mxu1 %vm7220_vm15, %v6541_v19  ;;  %5286 = vmatprep.mubr.msk.f32.mxu1 %vm7196_vm9, %v5773_v9  ;;  %vm7227_vm15 = vmmov %vm7219_vm2 }
 0xa0a   :  { %5294 = vmatprep.subr.mxu1 %v5773_v9 }
 0xa0b   :  { %2948 = vrot.lane.b32.xlu1 %v2474_v3, %s5779_s23 }
 0xa0c   :  { %2870 = vrot.lane.b32.xlu0 %v2469_v29, %s5779_s23  ;;  %5287 = vmatmul.mubr.msk.f32.vlgmr.msra.gmra.mrb[24].mxu1 %vm7221_vm3, %v2474_v3  ;;  %vm7228_vm3 = vmmov %vm7219_vm2 }
 0xa0d   :  { %5295 = vmatpush3.xpose.msk.msra.mxu1 %vm7222_vm12, %v2795_v24  ;;  %5296 = vmatprep.mubr.msk.f32.mxu1 %vm7196_vm9, %v5773_v9  ;;  %vm7229_vm12 = vmmov %vm7219_vm2 }
 0xa0e   :  { %5304 = vmatprep.subr.mxu1 %v5773_v9 }
 0xa0f   :  { %3104 = vrot.lane.b32.xlu1 %v2474_v3, %s5781_s26 }
 0xa10   :  { %3026 = vrot.lane.b32.xlu0 %v2469_v29, %s5781_s26 }
 0xa79   :  { %v2793_v60 = vpop.permute.xlu1 %2792 }
 0xa7a   :  { %v2715_v14 = vpop.permute.xlu0 %2714  ;;  %5297 = vmatmul.mubr.msk.f32.vlgmr.msra.gmra.mrb[26].mxu1 %vm7223_vm8, %v2793_v60  ;;  %vm7230_vm8 = vmmov %vm7219_vm2 }
 0xa7b   :  { %5305 = vmatpush3.xpose.msk.msra.mxu1 %vm7224_vm7, %v2951_v37  ;;  %5292 = vmatmul.mubr.msk.f32.vlgmr.msra.gmra.mrb[18].mxu0 %vm7225_vm4, %v2715_v14  ;;  %vm7231_vm7 = vmmov %vm7219_vm2 }
 0xa7c   :  { %5300 = vmatpush3.xpose.msk.msra.mxu0 %vm7226_vm13, %v2873_v50  ;;  %5306 = vmatprep.mubr.msk.f32.mxu1 %vm7196_vm9, %v5773_v9  ;;  %vm7232_vm4 = vmmov %vm7219_vm2 }
 0xa7d   :  { %v2949_v12 = vpop.permute.xlu1 %2948  ;;  %5314 = vmatprep.subr.mxu1 %v5773_v9  ;;  %5301 = vmatprep.mubr.msk.f32.mxu0 %vm7196_vm9, %v5773_v9  ;;  %vm7233_vm13 = vmmov %vm7219_vm2 }
 0xa7e   :  { %5309 = vmatprep.subr.mxu0 %v5773_v9  ;;  %v2871_v61 = vpop.permute.xlu0 %2870  ;;  %5307 = vmatmul.mubr.msk.f32.vlgmr.msra.gmra.mrb[28].mxu1 %vm7219_vm2, %v2949_v12  ;;  %vm7234_vm2 = vcmask 130048  }
 0xa7f   :  { %5315 = vmatpush3.xpose.msk.msra.mxu1 %vm7227_vm15, %v3107_v51  ;;  %5302 = vmatmul.mubr.msk.f32.vlgmr.msra.gmra.mrb[20].mxu0 %vm7228_vm3, %v2871_v61  ;;  %vm7235_vm15 = vmmov %vm7234_vm2  ;;  %vm7236_vm3 = vcmask 195584  }
 0xa80   :  { %5310 = vmatpush3.xpose.msk.msra.mxu0 %vm7229_vm12, %v3029_v35  ;;  %5316 = vmatprep.mubr.msk.f32.mxu1 %vm7196_vm9, %v5773_v9  ;;  %vm7237_vm12 = vmmov %vm7236_vm3 }
 0xa81   :  { %v3105_v59 = vpop.permute.xlu1 %3104  ;;  %5311 = vmatprep.mubr.msk.f32.mxu0 %vm7196_vm9, %v5773_v9  ;;  %5319 = vmatprep.subr.mxu0 %v5773_v9 }
 0xa82   :  { %v3027_v62 = vpop.permute.xlu0 %3026  ;;  %5317 = vmatmul.mubr.msk.f32.vlgmr.msra.gmra.mrb[30].mxu1 %vm7230_vm8, %v3105_v59  ;;  %5324 = vmatprep.subr.mxu1 %v5773_v9  ;;  %vm3450_vm8 = vcmask 126016  }
 0xa83   :  { %5312 = vmatmul.mubr.msk.f32.vlgmr.msra.gmra.mrb[22].mxu0 %vm7231_vm7, %v3027_v62  ;;  %5326 = vmatprep.mubr.msk.f32.mxu1 %vm7196_vm9, %v5773_v9  ;;  %vm7245_vm7 = vnez %v7173_v30 }
 0xa84   :  { %5321 = vmatprep.mubr.msk.f32.mxu0 %vm7196_vm9, %v5773_v9 }
 0xadb   :  { %v2634_v11 = vpop.f32.mrb[22].mxu1 }
 0xadc   :  { %v5283_v58 = vpop.f32.mrb[23].mxu1 }
 0xadf   :  { %v2710_v34 = vpop.f32.mrb[24].mxu1 }
 0xae0   :  { %v5288_v38 = vpop.f32.mrb[25].mxu1 }
 0xb4d   :  { %v2866_v40 = vpop.f32.mrb[26].mxu1 }
 0xb4e   :  { %v2788_v23 = vpop.f32.mrb[18].mxu0  ;;  %3186 = vrot.lane.b32.xlu1 %v2866_v40, %s5771_s10  ;;  %v5298_v10 = vpop.f32.mrb[27].mxu1 }
 0xb4f   :  { %3184 = vrot.lane.b32.xlu0 %v2788_v23, %s5771_s10  ;;  %v5293_v17 = vpop.f32.mrb[19].mxu0 }
 0xb51   :  { %v3022_v18 = vpop.f32.mrb[28].mxu1 }
 0xb52   :  { %v2944_v41 = vpop.f32.mrb[20].mxu0  ;;  %3194 = vrot.lane.b32.xlu1 %v3022_v18, %s5782_s27  ;;  %v5308_v46 = vpop.f32.mrb[29].mxu1 }
 0xb53   :  { %3192 = vrot.lane.b32.xlu0 %v2944_v41, %s5782_s27  ;;  %v5303_v52 = vpop.f32.mrb[21].mxu0 }
 0xb55   :  { %v3178_v20 = vpop.f32.mrb[30].mxu1 }
 0xb56   :  { %v3100_v45 = vpop.f32.mrb[22].mxu0  ;;  %3202 = vrot.lane.b32.xlu1 %v3178_v20, %s5783_s28  ;;  %v5318_v16 = vpop.f32.mrb[31].mxu1 }
 0xb57   :  { %3200 = vrot.lane.b32.xlu0 %v3100_v45, %s5783_s28  ;;  %v5313_v27 = vpop.f32.mrb[23].mxu0 }
 0xbc0   :  { %v3187_v2 = vpop.permute.xlu1 %3186 }
 0xbc1   :  { %v3185_v28 = vpop.permute.xlu0 %3184  ;;  %v3207_v21 = vsel %vm7232_vm4, %v2710_v34, %v3187_v2  ;;  %vm7246_vm4 = vnez %v7187_v32 }
 0xbc2   :  { %v3206_v26 = vsel %vm7233_vm13, %v2634_v11, %v3185_v28  ;;  %vm7247_vm13 = vcmask 60416  }
 0xbc4   :  { %v3195_v31 = vpop.permute.xlu1 %3194 }
 0xbc5   :  { %v3193_v44 = vpop.permute.xlu0 %3192  ;;  %v3209_v47 = vsel %vm7234_vm2, %v3207_v21, %v3195_v31  ;;  %vm7248_vm2 = vmmov %vm7247_vm13 }
 0xbc6   :  { %v3208_v1 = vsel %vm7235_vm15, %v3206_v26, %v3193_v44  ;;  %vm7249_vm15 = vmmov %vm7248_vm2 }
 0xbc8   :  { %v3203_v0 = vpop.permute.xlu1 %3202 }
 0xbc9   :  { %v3211_v3 = vsel %vm7236_vm3, %v3209_v47, %v3203_v0  ;;  %v3201_v63 = vpop.permute.xlu0 %3200  ;;  %vm7250_vm3 = vmmov %vm7248_vm2 }
 0xbca   :  { %v3213_v29 = vmul.f32 0.35355338, %v3211_v3  ;;  %v3210_v24 = vsel %vm7237_vm12, %v3208_v1, %v3201_v63  ;;  %vm7251_vm12 = vmmov %vm7248_vm2 }
 0xbcb   :  { %v3212_v37 = vmul.f32 0.35355338, %v3210_v24 }
 0xbcc   :  { %3218 = vrot.lane.b32.xlu1 %v3213_v29, %s5777_s21 }
 0xbcd   :  { %3216 = vrot.lane.b32.xlu0 %v3212_v37, %s5777_s21 }
 0xbd0   :  { %3222 = vrot.lane.b32.xlu1 %v3212_v37, %s5779_s23 }
 0xbd1   :  { %3228 = vrot.lane.b32.xlu0 %v3212_v37, %s5781_s26 }
 0xbd4   :  { %3230 = vrot.lane.b32.xlu1 %v3213_v29, %s5781_s26 }
 0xbd5   :  { %3224 = vrot.lane.b32.xlu0 %v3213_v29, %s5779_s23 }
 0xc3e   :  { %v3219_v50 = vpop.permute.xlu1 %3218 }
 0xc3f   :  { %v3217_v51 = vpop.permute.xlu0 %3216 }
 0xc42   :  { %v3223_v35 = vpop.permute.xlu1 %3222 }
 0xc43   :  { %v3229_v60 = vpop.permute.xlu0 %3228  ;;  %v3234_v38 = vcombine.low %v3212_v37, %v3223_v35  ;;  %v3235_v27 = vcombine.high %v3212_v37, %v3223_v35 }
 0xc44   :  { %v3250_v40 = vcombine.low %v3217_v51, %v3229_v60  ;;  %v3251_v2 = vcombine.high %v3217_v51, %v3229_v60 }
 0xc45   :  { %v3242_v46 = vrot.slane %v3234_v38, %v6029_v36  ;;  %v3249_v21 = vrot.slane %v3235_v27, %v6029_v36 }
 0xc46   :  { %v3231_v14 = vpop.permute.xlu1 %3230  ;;  %v3258_v52 = vrot.slane %v3250_v40, %v6029_v36  ;;  %v3265_v26 = vrot.slane %v3251_v2, %v6029_v36 }
 0xc47   :  { %v3318_v12 = vcombine.low %v3219_v50, %v3231_v14  ;;  %v3225_v61 = vpop.permute.xlu0 %3224  ;;  %v3319_v59 = vcombine.high %v3219_v50, %v3231_v14 }
 0xc48   :  { %v3302_v62 = vcombine.low %v3213_v29, %v3225_v61  ;;  %v3303_v11 = vcombine.high %v3213_v29, %v3225_v61  ;;  %v3266_v44 = vcombine.low %v3242_v46, %v3258_v52  ;;  %v3267_v1 = vcombine.high %v3242_v46, %v3258_v52 }
 0xc49   :  { %v3326_v58 = vrot.slane %v3318_v12, %v6029_v36  ;;  %v3333_v23 = vrot.slane %v3319_v59, %v6029_v36  ;;  %v3282_v29 = vcombine.low %v3249_v21, %v3265_v26  ;;  %v3283_v50 = vcombine.high %v3249_v21, %v3265_v26 }
 0xc4a   :  { %v3310_v34 = vrot.slane %v3302_v62, %v6029_v36  ;;  %v3317_v10 = vrot.slane %v3303_v11, %v6029_v36  ;;  %v3274_v0 = vrot.slane %v3266_v44, %v6036_v42  ;;  %v3281_v63 = vrot.slane %v3267_v1, %v6036_v42 }
 0xc4b   :  { %v3290_v37 = vrot.slane %v3282_v29, %v6036_v42  ;;  %v3297_v35 = vrot.slane %v3283_v50, %v6036_v42 }
 0xc4c   :  { %v3334_v17 = vcombine.low %v3310_v34, %v3326_v58  ;;  %v3335_v18 = vcombine.high %v3310_v34, %v3326_v58  ;;  %v3350_v16 = vcombine.low %v3317_v10, %v3333_v23  ;;  %v3298_v3 = vcombine.high %v3274_v0, %v5773_v9 }
 0xc4d   :  { %v3299_v24 = vcombine.high %v3281_v63, %v5773_v9  ;;  %v3300_v51 = vcombine.high %v3290_v37, %v5773_v9  ;;  %v3351_v60 = vcombine.high %v3317_v10, %v3333_v23  ;;  %v3301_v14 = vcombine.high %v3297_v35, %v5773_v9 }
 0xc4e   :  { %v3342_v41 = vrot.slane %v3334_v17, %v6036_v42  ;;  %v3349_v45 = vrot.slane %v3335_v18, %v6036_v42  ;;  %v3358_v31 = vrot.slane %v3350_v16, %v6036_v42 }
 0xc4f   :  { %v3365_v12 = vrot.slane %v3351_v60, %v6036_v42 }
 0xc50   :  { %3402 = vrot.lane.b32.xlu0 %v3342_v41, %s5771_s10  ;;  %v3366_v20 = vcombine.high %v3342_v41, %v5773_v9  ;;  %v3367_v28 = vcombine.high %v3349_v45, %v5773_v9  ;;  %v3368_v47 = vcombine.high %v3358_v31, %v5773_v9 }
 0xc51   :  { %v3369_v61 = vcombine.high %v3365_v12, %v5773_v9 }
 0xc52   :  { %3404 = vrot.lane.b32.xlu1 %v3366_v20, %s5771_s10 }
 0xc54   :  { %3406 = vrot.lane.b32.xlu0 %v3349_v45, %s5771_s10 }
 0xc56   :  { %3408 = vrot.lane.b32.xlu1 %v3367_v28, %s5771_s10 }
 0xc58   :  { %3410 = vrot.lane.b32.xlu0 %v3358_v31, %s5771_s10 }
 0xc5a   :  { %3412 = vrot.lane.b32.xlu1 %v3368_v47, %s5771_s10 }
 0xc5c   :  { %3386 = vrot.lane.b32.xlu0 %v3274_v0, %s5771_s10 }
 0xc5e   :  { %3388 = vrot.lane.b32.xlu1 %v3298_v3, %s5771_s10 }
 0xc60   :  { %3390 = vrot.lane.b32.xlu0 %v3281_v63, %s5771_s10 }
 0xc62   :  { %3392 = vrot.lane.b32.xlu1 %v3299_v24, %s5771_s10 }
 0xc64   :  { %3394 = vrot.lane.b32.xlu0 %v3290_v37, %s5771_s10 }
 0xc66   :  { %3396 = vrot.lane.b32.xlu1 %v3300_v51, %s5771_s10 }
 0xc68   :  { %3398 = vrot.lane.b32.xlu0 %v3297_v35, %s5771_s10 }
 0xc6a   :  { %3400 = vrot.lane.b32.xlu1 %v3301_v14, %s5771_s10 }
 0xc6c   :  { %3414 = vrot.lane.b32.xlu0 %v3365_v12, %s5771_s10 }
 0xc6e   :  { %3416 = vrot.lane.b32.xlu1 %v3369_v61, %s5771_s10 }
 0xcc2   :  { %v3403_v59 = vpop.permute.xlu0 %3402 }
 0xcc3   :  { %v6683_v62 = vsel %vm6146_vm10, -1e+09, %v3403_v59  ;;  %vm7241_vm10 = vnez %v7161_v15 }
 0xcc4   :  { %v3405_v11 = vpop.permute.xlu1 %3404  ;;  %v3475_v58 = vsel %vm3450_vm8, %v6683_v62, -inf }
 0xcc5   :  { %3476 = vmax.xlane.f32.xlu1 %v3475_v58  ;;  %v6713_v16 = vsel %vm6213_vm1, -1e+09, %v3405_v11  ;;  %vm7244_vm1 = vnez %v7165_v6 }
 0xcc6   :  { %v3407_v34 = vpop.permute.xlu0 %3406  ;;  %v3478_v56 = vsel %vm3450_vm8, %v6713_v16, -inf }
 0xcc7   :  { %v6689_v38 = vsel %vm6183_vm6, -1e+09, %v3407_v34  ;;  %vm7242_vm6 = vnez %v7163_v25 }
 0xcc8   :  { %v3409_v40 = vpop.permute.xlu1 %3408  ;;  %v3481_v23 = vsel %vm3450_vm8, %v6689_v38, -inf }
 0xcc9   :  { %3482 = vmax.xlane.f32.xlu1 %v3481_v23 }
 0xcca   :  { %v3411_v10 = vpop.permute.xlu0 %3410 }
 0xccb   :  { %v6695_v7 = vsel %vm6209_vm0, -1e+09, %v3411_v10  ;;  %vm7243_vm0 = vnez %v7181_v4 }
 0xccc   :  { %v3413_v17 = vpop.permute.xlu1 %3412  ;;  %v3487_v18 = vsel %vm3450_vm8, %v6695_v7, -inf }
 0xccd   :  { %3488 = vmax.xlane.f32.xlu1 %v3487_v18 }
 0xcce   :  { %v3387_v41 = vpop.permute.xlu0 %3386 }
 0xccf   :  { %v6701_v5 = vsel %vm6049_vm14, -1e+09, %v3387_v41  ;;  %vm7238_vm14 = vnez %v7183_v8 }
 0xcd0   :  { %v3451_v46 = vsel %vm3450_vm8, %v6701_v5, -inf  ;;  %v3389_v52 = vpop.permute.xlu1 %3388  ;;  %v6725_v31 = vsel %vm7238_vm14, -1e+09, %v3409_v40  ;;  %vm7253_vm14 = vmmov %vm7248_vm2 }
 0xcd1   :  { %3452 = vmax.xlane.f32.xlu0 %v3451_v46  ;;  %v3484_v21 = vsel %vm3450_vm8, %v6725_v31, -inf  ;;  %v6741_v8 = vsel %vm7241_vm10, -1e+09, %v3389_v52  ;;  %vm7256_vm10 = vmmov %vm7248_vm2 }
 0xcd2   :  { %v3391_v20 = vpop.permute.xlu0 %3390  ;;  %v3454_v1 = vsel %vm3450_vm8, %v6741_v8, -inf }
 0xcd3   :  { %v6707_v48 = vsel %vm6057_vm5, -1e+09, %v3391_v20  ;;  %vm7239_vm5 = vnez %v7155_v57 }
 0xcd4   :  { %v3457_v45 = vsel %vm3450_vm8, %v6707_v48, -inf  ;;  %v3393_v2 = vpop.permute.xlu1 %3392 }
 0xcd5   :  { %3458 = vmax.xlane.f32.xlu0 %v3457_v45  ;;  %v6749_v3 = vsel %vm7242_vm6, -1e+09, %v3393_v2  ;;  %vm7257_vm6 = vmmov %vm7248_vm2 }
 0xcd6   :  { %v3395_v55 = vpop.permute.xlu0 %3394  ;;  %v3460_v29 = vsel %vm3450_vm8, %v6749_v3, -inf }
 0xcd7   :  { %v6717_v27 = vsel %vm6038_vm11, -1e+09, %v3395_v55  ;;  %vm7240_vm11 = vnez %v7185_v22 }
 0xcd8   :  { %v3463_v28 = vsel %vm3450_vm8, %v6717_v27, -inf  ;;  %v6737_v26 = vsel %vm7240_vm11, -1e+09, %v3413_v17  ;;  %v3397_v47 = vpop.permute.xlu1 %3396  ;;  %vm7255_vm11 = vmmov %vm7248_vm2 }
 0xcd9   :  { %3464 = vmax.xlane.f32.xlu1 %v3463_v28  ;;  %3479 = vmax.xlane.f32.xlu0 %v3478_v56  ;;  %v3490_v0 = vsel %vm3450_vm8, %v6737_v26, -inf  ;;  %v6761_v24 = vsel %vm7244_vm1, -1e+09, %v3397_v47 }
 0xcda   :  { %v3399_v49 = vpop.permute.xlu0 %3398  ;;  %v3466_v25 = vsel %vm3450_vm8, %v6761_v24, -inf }
 0xcdb   :  { %v6729_v44 = vsel %vm7239_vm5, -1e+09, %v3399_v49  ;;  %vm7254_vm5 = vmmov %vm7248_vm2 }
 0xcdc   :  { %v3469_v43 = vsel %vm3450_vm8, %v6729_v44, -inf  ;;  %v3401_v15 = vpop.permute.xlu1 %3400 }
 0xcdd   :  { %3470 = vmax.xlane.f32.xlu1 %v3469_v43  ;;  %3485 = vmax.xlane.f32.xlu0 %v3484_v21  ;;  %v6767_v4 = vsel %vm7245_vm7, -1e+09, %v3401_v15 }
 0xcde   :  { %v3415_v57 = vpop.permute.xlu0 %3414  ;;  %v3472_v50 = vsel %vm3450_vm8, %v6767_v4, -inf }
 0xcdf   :  { %v6753_v22 = vsel %vm7243_vm0, -1e+09, %v3415_v57  ;;  %vm7258_vm0 = vmmov %vm7248_vm2 }
 0xce0   :  { %v3493_v63 = vsel %vm3450_vm8, %v6753_v22, -inf  ;;  %v3417_v37 = vpop.permute.xlu1 %3416  ;;  %vm7259_vm1 = vmmov %vm7258_vm0 }
 0xce1   :  { %3491 = vmax.xlane.f32.xlu0 %v3490_v0  ;;  %3455 = vmax.xlane.f32.xlu1 %v3454_v1  ;;  %v6773_v51 = vsel %vm7246_vm4, -1e+09, %v3417_v37  ;;  %vm7260_vm7 = vmmov %vm7258_vm0 }
 0xce2   :  { %v3496_v6 = vsel %vm3450_vm8, %v6773_v51, -inf  ;;  %vm7252_vm8 = vmmov %vm7248_vm2 }
 0xce3   :  { %vm7261_vm4 = vmmov %vm7258_vm0 }
 0xce5   :  { %3494 = vmax.xlane.f32.xlu1 %v3493_v63  ;;  %3461 = vmax.xlane.f32.xlu0 %v3460_v29 }
 0xce9   :  { %3467 = vmax.xlane.f32.xlu0 %v3466_v25 }
 0xced   :  { %3473 = vmax.xlane.f32.xlu0 %v3472_v50 }
 0xcf1   :  { %3497 = vmax.xlane.f32.xlu0 %v3496_v6 }
 0xd52   :  { %v3477_v35 = vpop.xlane.xlu1 %3476 }
 0xd53   :  { %v3507_v60 = vsub.f32 %v6683_v62, %v3477_v35 }
 0xd55   :  { %v3531_v30 = vmul.f32 1.442695, %v3507_v60 }
 0xd56   :  { %v3483_v14 = vpop.xlane.xlu1 %3482 }
 0xd57   :  { %5590 = vpow2.f32 %v3531_v30  ;;  %v3509_v12 = vsub.f32 %v6689_v38, %v3483_v14 }
 0xd59   :  { %v3535_v61 = vmul.f32 1.442695, %v3509_v12 }
 0xd5a   :  { %v3489_v59 = vpop.xlane.xlu1 %3488 }
 0xd5b   :  { %5592 = vpow2.f32 %v3535_v61  ;;  %v3511_v32 = vsub.f32 %v6695_v7, %v3489_v59 }
 0xd5d   :  { %v3539_v11 = vmul.f32 1.442695, %v3511_v32 }
 0xd5e   :  { %v3453_v58 = vpop.xlane.xlu0 %3452 }
 0xd5f   :  { %5594 = vpow2.f32 %v3539_v11  ;;  %v3499_v34 = vsub.f32 %v6701_v5, %v3453_v58 }
 0xd61   :  { %v6781_v40 = vpop.eup %5590  ;;  %v3515_v23 = vmul.f32 1.442695, %v3499_v34 }
 0xd62   :  { %v3459_v10 = vpop.xlane.xlu0 %3458  ;;  %3579 = vrot.lane.b32.xlu0 %v6781_v40, %s5777_s21 }
 0xd63   :  { %5596 = vpow2.f32 %v3515_v23  ;;  %v3501_v62 = vsub.f32 %v6707_v48, %v3459_v10 }
 0xd65   :  { %v6786_v38 = vpop.eup %5592  ;;  %v3519_v17 = vmul.f32 1.442695, %v3501_v62 }
 0xd66   :  { %v3480_v18 = vpop.xlane.xlu0 %3479  ;;  %3583 = vrot.lane.b32.xlu0 %v6786_v38, %s5777_s21  ;;  %v3465_v7 = vpop.xlane.xlu1 %3464 }
 0xd67   :  { %5598 = vpow2.f32 %v3519_v17  ;;  %v3508_v41 = vsub.f32 %v6713_v16, %v3480_v18  ;;  %v3503_v5 = vsub.f32 %v6717_v27, %v3465_v7 }
 0xd69   :  { %v6792_v46 = vpop.eup %5594  ;;  %v3533_v52 = vmul.f32 1.442695, %v3508_v41  ;;  %v3523_v20 = vmul.f32 1.442695, %v3503_v5 }
 0xd6a   :  { %v3486_v45 = vpop.xlane.xlu0 %3485  ;;  %3587 = vrot.lane.b32.xlu0 %v6792_v46, %s5777_s21  ;;  %v3471_v48 = vpop.xlane.xlu1 %3470 }
 0xd6b   :  { %5600 = vpow2.f32 %v3533_v52  ;;  %v3510_v55 = vsub.f32 %v6725_v31, %v3486_v45  ;;  %v3505_v2 = vsub.f32 %v6729_v44, %v3471_v48 }
 0xd6c   :  { %5602 = vpow2.f32 %v3523_v20 }
 0xd6d   :  { %v6798_v28 = vpop.eup %5596  ;;  %v3537_v16 = vmul.f32 1.442695, %v3510_v55  ;;  %v3527_v56 = vmul.f32 1.442695, %v3505_v2 }
 0xd6e   :  { %v3492_v27 = vpop.xlane.xlu0 %3491  ;;  %3563 = vrot.lane.b32.xlu1 %v6798_v28, %s5777_s21  ;;  %v3456_v49 = vpop.xlane.xlu1 %3455 }
 0xd6f   :  { %5604 = vpow2.f32 %v3537_v16  ;;  %v3512_v43 = vsub.f32 %v6737_v26, %v3492_v27  ;;  %v3500_v21 = vsub.f32 %v6741_v8, %v3456_v49 }
 0xd70   :  { %5606 = vpow2.f32 %v3527_v56 }
 0xd71   :  { %v6804_v47 = vpop.eup %5598  ;;  %v3541_v31 = vmul.f32 1.442695, %v3512_v43  ;;  %v3517_v44 = vmul.f32 1.442695, %v3500_v21 }
 0xd72   :  { %3567 = vrot.lane.b32.xlu1 %v6804_v47, %s5777_s21  ;;  %v3462_v57 = vpop.xlane.xlu0 %3461  ;;  %v3495_v0 = vpop.xlane.xlu1 %3494 }
 0xd73   :  { %5608 = vpow2.f32 %v3541_v31  ;;  %v3502_v1 = vsub.f32 %v6749_v3, %v3462_v57  ;;  %v3513_v15 = vsub.f32 %v6753_v22, %v3495_v0 }
 0xd74   :  { %5610 = vpow2.f32 %v3517_v44 }
 0xd75   :  { %v6810_v63 = vpop.eup %5600  ;;  %v3521_v26 = vmul.f32 1.442695, %v3502_v1  ;;  %v3543_v8 = vmul.f32 1.442695, %v3513_v15 }
 0xd76   :  { %v6812_v29 = vpop.eup %5602  ;;  %3581 = vrot.lane.b32.xlu1 %v6810_v63, %s5777_s21  ;;  %v3468_v25 = vpop.xlane.xlu0 %3467 }
 0xd77   :  { %5612 = vpow2.f32 %v3521_v26  ;;  %v3504_v37 = vsub.f32 %v6761_v24, %v3468_v25  ;;  %3571 = vrot.lane.b32.xlu0 %v6812_v29, %s5777_s21 }
 0xd78   :  { %5614 = vpow2.f32 %v3543_v8 }
 0xd79   :  { %v6819_v3 = vpop.eup %5604  ;;  %v3525_v22 = vmul.f32 1.442695, %v3504_v37 }
 0xd7a   :  { %v6821_v50 = vpop.eup %5606  ;;  %3585 = vrot.lane.b32.xlu1 %v6819_v3, %s5777_s21  ;;  %v3474_v6 = vpop.xlane.xlu0 %3473 }
 0xd7b   :  { %5616 = vpow2.f32 %v3525_v22  ;;  %v3506_v35 = vsub.f32 %v6767_v4, %v3474_v6  ;;  %3575 = vrot.lane.b32.xlu0 %v6821_v50, %s5777_s21 }
 0xd7d   :  { %v6828_v24 = vpop.eup %5608  ;;  %v3529_v60 = vmul.f32 1.442695, %v3506_v35 }
 0xd7e   :  { %v6830_v30 = vpop.eup %5610  ;;  %3589 = vrot.lane.b32.xlu1 %v6828_v24, %s5777_s21  ;;  %v3498_v14 = vpop.xlane.xlu0 %3497 }
 0xd7f   :  { %5618 = vpow2.f32 %v3529_v60  ;;  %v3514_v12 = vsub.f32 %v6773_v51, %v3498_v14  ;;  %3565 = vrot.lane.b32.xlu0 %v6830_v30, %s5777_s21 }
 0xd81   :  { %v6837_v61 = vpop.eup %5612  ;;  %v3545_v4 = vmul.f32 1.442695, %v3514_v12 }
 0xd82   :  { %v6839_v59 = vpop.eup %5614  ;;  %3569 = vrot.lane.b32.xlu1 %v6837_v61, %s5777_s21 }
 0xd83   :  { %5620 = vpow2.f32 %v3545_v4  ;;  %3591 = vrot.lane.b32.xlu0 %v6839_v59, %s5777_s21 }
 0xd85   :  { %v6845_v32 = vpop.eup %5616 }
 0xd86   :  { %3573 = vrot.lane.b32.xlu1 %v6845_v32, %s5777_s21 }
 0xd89   :  { %v6849_v51 = vpop.eup %5618 }
 0xd8a   :  { %3577 = vrot.lane.b32.xlu1 %v6849_v51, %s5777_s21 }
 0xd8d   :  { %v6853_v11 = vpop.eup %5620 }
 0xd8e   :  { %3593 = vrot.lane.b32.xlu1 %v6853_v11, %s5777_s21 }
 0xdd4   :  { %v3580_v58 = vpop.permute.xlu0 %3579 }
 0xdd5   :  { %v3635_v34 = vsel %vm7247_vm13, %v3580_v58, 0.0  ;;  %vm7262_vm13 = vmmov %vm7258_vm0 }
 0xdd6   :  { %3636 = vadd.xlane.f32.xlu1 %v3635_v34 }
 0xdd8   :  { %v3584_v23 = vpop.permute.xlu0 %3583 }
 0xdd9   :  { %v3641_v10 = vsel %vm7248_vm2, %v3584_v23, 0.0  ;;  %vm7263_vm2 = vcmask 64512  }
 0xdda   :  { %3642 = vadd.xlane.f32.xlu1 %v3641_v10 }
 0xddc   :  { %v3588_v62 = vpop.permute.xlu0 %3587 }
 0xddd   :  { %v3647_v17 = vsel %vm7249_vm15, %v3588_v62, 0.0  ;;  %vm7264_vm15 = vmmov %vm7263_vm2 }
 0xdde   :  { %3648 = vadd.xlane.f32.xlu1 %v3647_v17 }
 0xde0   :  { %v3564_v18 = vpop.permute.xlu1 %3563 }
 0xde1   :  { %v3611_v7 = vsel %vm7250_vm3, %v3564_v18, 0.0  ;;  %vm7265_vm3 = vcmask 130048  }
 0xde2   :  { %3612 = vadd.xlane.f32.xlu0 %v3611_v7 }
 0xde4   :  { %v3568_v41 = vpop.permute.xlu1 %3567 }
 0xde5   :  { %v3617_v5 = vsel %vm7251_vm12, %v3568_v41, 0.0  ;;  %vm7266_vm12 = vmmov %vm7265_vm3 }
 0xde6   :  { %3618 = vadd.xlane.f32.xlu0 %v3617_v5 }
 0xde8   :  { %v3582_v52 = vpop.permute.xlu1 %3581 }
 0xde9   :  { %v3572_v20 = vpop.permute.xlu0 %3571  ;;  %v3638_v45 = vsel %vm7252_vm8, %v3582_v52, 0.0  ;;  %vm7267_vm8 = vcmask 195584  }
 0xdea   :  { %v3623_v48 = vsel %vm7253_vm14, %v3572_v20, 0.0  ;;  %3639 = vadd.xlane.f32.xlu0 %v3638_v45  ;;  %vm7268_vm14 = vmmov %vm7267_vm8 }
 0xdeb   :  { %3624 = vadd.xlane.f32.xlu1 %v3623_v48 }
 0xdec   :  { %v3586_v55 = vpop.permute.xlu1 %3585 }
 0xded   :  { %v3576_v2 = vpop.permute.xlu0 %3575  ;;  %v3644_v16 = vsel %vm7254_vm5, %v3586_v55, 0.0  ;;  %vm7269_vm5 = vmmov %vm7263_vm2 }
 0xdee   :  { %v3629_v56 = vsel %vm7255_vm11, %v3576_v2, 0.0  ;;  %3645 = vadd.xlane.f32.xlu0 %v3644_v16  ;;  %vm7270_vm11 = vmmov %vm7263_vm2 }
 0xdef   :  { %3630 = vadd.xlane.f32.xlu1 %v3629_v56 }
 0xdf0   :  { %v3590_v27 = vpop.permute.xlu1 %3589 }
 0xdf1   :  { %v3566_v49 = vpop.permute.xlu0 %3565  ;;  %v3650_v43 = vsel %vm7256_vm10, %v3590_v27, 0.0  ;;  %vm7271_vm10 = vmmov %vm7263_vm2 }
 0xdf2   :  { %v3614_v21 = vsel %vm7257_vm6, %v3566_v49, 0.0  ;;  %3651 = vadd.xlane.f32.xlu0 %v3650_v43  ;;  %vm7272_vm6 = vmmov %vm7263_vm2 }
 0xdf3   :  { %3615 = vadd.xlane.f32.xlu1 %v3614_v21 }
 0xdf4   :  { %v3570_v31 = vpop.permute.xlu1 %3569 }
 0xdf5   :  { %v3592_v44 = vpop.permute.xlu0 %3591  ;;  %v3620_v57 = vsel %vm7258_vm0, %v3570_v31, 0.0  ;;  %vm7273_vm0 = vmmov %vm7263_vm2 }
 0xdf6   :  { %v3653_v0 = vsel %vm7259_vm1, %v3592_v44, 0.0  ;;  %3621 = vadd.xlane.f32.xlu0 %v3620_v57  ;;  %vm7274_vm1 = vmmov %vm7273_vm0 }
 0xdf7   :  { %3654 = vadd.xlane.f32.xlu1 %v3653_v0 }
 0xdf8   :  { %v3574_v1 = vpop.permute.xlu1 %3573 }
 0xdf9   :  { %v3626_v15 = vsel %vm7260_vm7, %v3574_v1, 0.0  ;;  %vm7275_vm7 = vmmov %vm7273_vm0 }
 0xdfa   :  { %3627 = vadd.xlane.f32.xlu0 %v3626_v15 }
 0xdfc   :  { %v3578_v26 = vpop.permute.xlu1 %3577 }
 0xdfd   :  { %v3632_v8 = vsel %vm7261_vm4, %v3578_v26, 0.0  ;;  %vm7276_vm4 = vmmov %vm7273_vm0 }
 0xdfe   :  { %3633 = vadd.xlane.f32.xlu0 %v3632_v8 }
 0xe00   :  { %v3594_v25 = vpop.permute.xlu1 %3593 }
 0xe01   :  { %v3656_v37 = vsel %vm7262_vm13, %v3594_v25, 0.0  ;;  %vm7278_vm13 = vmmov %vm7265_vm3 }
 0xe02   :  { %3657 = vadd.xlane.f32.xlu0 %v3656_v37 }
 0xe63   :  { %v3637_v22 = vpop.xlane.xlu1 %3636 }
 0xe64   :  { %5622 = vrcp.f32 %v3637_v22 }
 0xe67   :  { %v3643_v6 = vpop.xlane.xlu1 %3642 }
 0xe68   :  { %5624 = vrcp.f32 %v3643_v6 }
 0xe6b   :  { %v3649_v35 = vpop.xlane.xlu1 %3648 }
 0xe6c   :  { %5626 = vrcp.f32 %v3649_v35 }
 0xe6e   :  { %v5623_v60 = vpop.eup %5622 }
 0xe6f   :  { %v3613_v14 = vpop.xlane.xlu0 %3612  ;;  %v3676_v12 = vmul.f32 %v5623_v60, %v6781_v40 }
 0xe70   :  { %5628 = vrcp.f32 %v3613_v14 }
 0xe71   :  { %3723 = vrot.lane.b32.xlu0 %v3676_v12, %s5777_s21 }
 0xe72   :  { %v5625_v4 = vpop.eup %5624 }
 0xe73   :  { %v3619_v58 = vpop.xlane.xlu0 %3618  ;;  %v3680_v34 = vmul.f32 %v5625_v4, %v6786_v38 }
 0xe74   :  { %5630 = vrcp.f32 %v3619_v58 }
 0xe75   :  { %3727 = vrot.lane.b32.xlu0 %v3680_v34, %s5777_s21 }
 0xe76   :  { %v5627_v23 = vpop.eup %5626 }
 0xe77   :  { %v3640_v10 = vpop.xlane.xlu0 %3639  ;;  %v3684_v62 = vmul.f32 %v5627_v23, %v6792_v46 }
 0xe78   :  { %5632 = vrcp.f32 %v3640_v10  ;;  %v3625_v17 = vpop.xlane.xlu1 %3624 }
 0xe79   :  { %5634 = vrcp.f32 %v3625_v17  ;;  %3731 = vrot.lane.b32.xlu0 %v3684_v62, %s5777_s21 }
 0xe7a   :  { %v5629_v40 = vpop.eup %5628 }
 0xe7b   :  { %v3646_v18 = vpop.xlane.xlu0 %3645  ;;  %v3660_v7 = vmul.f32 %v5629_v40, %v6798_v28 }
 0xe7c   :  { %5636 = vrcp.f32 %v3646_v18  ;;  %v3631_v41 = vpop.xlane.xlu1 %3630 }
 0xe7d   :  { %5638 = vrcp.f32 %v3631_v41  ;;  %3707 = vrot.lane.b32.xlu1 %v3660_v7, %s5777_s21 }
 0xe7e   :  { %v5631_v38 = vpop.eup %5630 }
 0xe7f   :  { %v3652_v5 = vpop.xlane.xlu0 %3651  ;;  %v3664_v52 = vmul.f32 %v5631_v38, %v6804_v47 }
 0xe80   :  { %5640 = vrcp.f32 %v3652_v5  ;;  %v3616_v46 = vpop.xlane.xlu1 %3615 }
 0xe81   :  { %5642 = vrcp.f32 %v3616_v46  ;;  %3711 = vrot.lane.b32.xlu1 %v3664_v52, %s5777_s21 }
 0xe82   :  { %v5633_v20 = vpop.eup %5632 }
 0xe83   :  { %v5635_v45 = vpop.eup %5634  ;;  %v3622_v48 = vpop.xlane.xlu0 %3621  ;;  %v3678_v55 = vmul.f32 %v5633_v20, %v6810_v63 }
 0xe84   :  { %5644 = vrcp.f32 %v3622_v48  ;;  %v3655_v28 = vpop.xlane.xlu1 %3654  ;;  %v3668_v2 = vmul.f32 %v5635_v45, %v6812_v29 }
 0xe85   :  { %5646 = vrcp.f32 %v3655_v28  ;;  %3725 = vrot.lane.b32.xlu1 %v3678_v55, %s5777_s21 }
 0xe86   :  { %v5637_v16 = vpop.eup %5636  ;;  %3715 = vrot.lane.b32.xlu0 %v3668_v2, %s5777_s21 }
 0xe87   :  { %v5639_v47 = vpop.eup %5638  ;;  %v3628_v56 = vpop.xlane.xlu0 %3627  ;;  %v3682_v27 = vmul.f32 %v5637_v16, %v6819_v3 }
 0xe88   :  { %5648 = vrcp.f32 %v3628_v56  ;;  %v3672_v49 = vmul.f32 %v5639_v47, %v6821_v50 }
 0xe89   :  { %3729 = vrot.lane.b32.xlu1 %v3682_v27, %s5777_s21 }
 0xe8a   :  { %v5641_v63 = vpop.eup %5640  ;;  %3719 = vrot.lane.b32.xlu0 %v3672_v49, %s5777_s21 }
 0xe8b   :  { %v5643_v43 = vpop.eup %5642  ;;  %v3634_v29 = vpop.xlane.xlu0 %3633  ;;  %v3686_v21 = vmul.f32 %v5641_v63, %v6828_v24 }
 0xe8c   :  { %5650 = vrcp.f32 %v3634_v29  ;;  %v3662_v31 = vmul.f32 %v5643_v43, %v6830_v30 }
 0xe8d   :  { %3733 = vrot.lane.b32.xlu1 %v3686_v21, %s5777_s21 }
 0xe8e   :  { %v5645_v44 = vpop.eup %5644  ;;  %3709 = vrot.lane.b32.xlu0 %v3662_v31, %s5777_s21 }
 0xe8f   :  { %v5647_v3 = vpop.eup %5646  ;;  %v3658_v57 = vpop.xlane.xlu0 %3657  ;;  %v3666_v50 = vmul.f32 %v5645_v44, %v6837_v61 }
 0xe90   :  { %5652 = vrcp.f32 %v3658_v57  ;;  %v3688_v0 = vmul.f32 %v5647_v3, %v6839_v59 }
 0xe91   :  { %3713 = vrot.lane.b32.xlu1 %v3666_v50, %s5777_s21 }
 0xe92   :  { %v5649_v1 = vpop.eup %5648  ;;  %3735 = vrot.lane.b32.xlu0 %v3688_v0, %s5777_s21 }
 0xe93   :  { %v3670_v24 = vmul.f32 %v5649_v1, %v6845_v32 }
 0xe95   :  { %3717 = vrot.lane.b32.xlu1 %v3670_v24, %s5777_s21 }
 0xe96   :  { %v5651_v30 = vpop.eup %5650 }
 0xe97   :  { %v3674_v15 = vmul.f32 %v5651_v30, %v6849_v51 }
 0xe99   :  { %3721 = vrot.lane.b32.xlu1 %v3674_v15, %s5777_s21 }
 0xe9a   :  { %v5653_v26 = vpop.eup %5652 }
 0xe9b   :  { %v3690_v61 = vmul.f32 %v5653_v26, %v6853_v11 }
 0xe9d   :  { %3737 = vrot.lane.b32.xlu1 %v3690_v61, %s5777_s21 }
 0xee3   :  { %v3724_v59 = vpop.permute.xlu0 %3723 }
 0xee7   :  { %v3728_v8 = vpop.permute.xlu0 %3727 }
 0xee8   :  { %v3823_v17 = vcombine.low %v3724_v59, %v3728_v8 }
 0xeea   :  { %v3830_v20 = vrot.slane %v3823_v17, %v6029_v36 }
 0xeeb   :  { %v3732_v22 = vpop.permute.xlu0 %3731 }
 0xeef   :  { %v3708_v25 = vpop.permute.xlu1 %3707 }
 0xef3   :  { %v3712_v37 = vpop.permute.xlu1 %3711 }
 0xef4   :  { %v3755_v34 = vcombine.low %v3708_v25, %v3712_v37 }
 0xef6   :  { %v3762_v18 = vrot.slane %v3755_v34, %v6029_v36  ;;  %v5671_v34 = vld [vmem:[%s7130_s3 + $0x50] sm:$0xff] }
 0xef7   :  { %v3726_v6 = vpop.permute.xlu1 %3725 }
 0xef8   :  { %v3716_v35 = vpop.permute.xlu0 %3715 }
 0xefb   :  { %v3730_v32 = vpop.permute.xlu1 %3729 }
 0xefc   :  { %v3720_v60 = vpop.permute.xlu0 %3719  ;;  %v3831_v23 = vcombine.low %v3726_v6, %v3730_v32 }
 0xefd   :  { %v3771_v10 = vcombine.low %v3716_v35, %v3720_v60 }
 0xefe   :  { %v3838_v41 = vrot.slane %v3831_v23, %v6029_v36 }
 0xeff   :  { %v3734_v14 = vpop.permute.xlu1 %3733  ;;  %v3778_v5 = vrot.slane %v3771_v10, %v6029_v36 }
 0xf00   :  { %v3710_v4 = vpop.permute.xlu0 %3709  ;;  %v3855_v2 = vcombine.low %v3830_v20, %v3838_v41  ;;  %v3856_v44 = vcombine.high %v3830_v20, %v3838_v41 }
 0xf02   :  { %v3863_v57 = vrot.slane %v3855_v2, %v6036_v42  ;;  %v3870_v30 = vrot.slane %v3856_v44, %v6036_v42 }
 0xf03   :  { %v3714_v12 = vpop.permute.xlu1 %3713 }
 0xf04   :  { %v3763_v51 = vcombine.low %v3710_v4, %v3714_v12  ;;  %v3736_v11 = vpop.permute.xlu0 %3735 }
 0xf05   :  { %v3839_v38 = vcombine.low %v3732_v22, %v3736_v11 }
 0xf06   :  { %v3770_v62 = vrot.slane %v3763_v51, %v6029_v36 }
 0xf07   :  { %v3718_v58 = vpop.permute.xlu1 %3717  ;;  %v3846_v16 = vrot.slane %v3839_v38, %v6029_v36 }
 0xf08   :  { %v3787_v52 = vcombine.low %v3762_v18, %v3770_v62  ;;  %v3788_v47 = vcombine.high %v3762_v18, %v3770_v62 }
 0xf0a   :  { %v3795_v27 = vrot.slane %v3787_v52, %v6036_v42  ;;  %v3802_v3 = vrot.slane %v3788_v47, %v6036_v42  ;;  %v5672_v52 = vld [vmem:[%s7130_s3 + $0x8] sm:$0xff] }
 0xf0b   :  { %v3722_v40 = vpop.permute.xlu1 %3721 }
 0xf0c   :  { %v3779_v7 = vcombine.low %v3718_v58, %v3722_v40  ;;  %v5670_v58 = vld [vmem:[%s7130_s3 + $0x38] sm:$0xff] }
 0xf0d   :  { %v5515_v23 = vpack.i.bf16 %v5671_v34, %v5670_v58 }
 0xf0e   :  { %v3786_v46 = vrot.slane %v3779_v7, %v6029_v36 }
 0xf0f   :  { %v3738_v45 = vpop.permute.xlu1 %3737 }
 0xf10   :  { %v3803_v48 = vcombine.low %v3778_v5, %v3786_v46  ;;  %v3804_v55 = vcombine.high %v3778_v5, %v3786_v46  ;;  %v3847_v28 = vcombine.low %v3734_v14, %v3738_v45  ;;  %v5673_v46 = vld [vmem:[%s7130_s3 + $0x20] sm:$0xff] }
 0xf11   :  { %v5510_v20 = vpack.i.bf16 %v5673_v46, %v5672_v52  ;;  %v75_v52 = vld [vmem:[%s7130_s3 + $0x40] sm:$0xff] }
 0xf12   :  { %v3854_v56 = vrot.slane %v3847_v28, %v6029_v36  ;;  %v3811_v49 = vrot.slane %v3803_v48, %v6036_v42  ;;  %v3818_v63 = vrot.slane %v3804_v55, %v6036_v42 }
 0xf14   :  { %v3871_v43 = vcombine.low %v3846_v16, %v3854_v56  ;;  %v3872_v29 = vcombine.high %v3846_v16, %v3854_v56  ;;  %v3820_v21 = vcombine.high %v3795_v27, %v3811_v49  ;;  %v3819_v31 = vcombine.low %v3795_v27, %v3811_v49 }
 0xf15   :  { %v3821_v0 = vcombine.low %v3802_v3, %v3818_v63  ;;  %v3822_v15 = vcombine.high %v3802_v3, %v3818_v63 }
 0xf16   :  { %3893 = vrot.lane.b32.xlu0 %v3820_v21, %s5771_s10  ;;  %v3879_v50 = vrot.slane %v3871_v43, %v6036_v42  ;;  %v3886_v36 = vrot.slane %v3872_v29, %v6036_v42 }
 0xf18   :  { %v3888_v1 = vcombine.high %v3863_v57, %v3879_v50  ;;  %v3887_v24 = vcombine.low %v3863_v57, %v3879_v50  ;;  %v3889_v26 = vcombine.low %v3870_v30, %v3886_v36  ;;  %v3890_v61 = vcombine.high %v3870_v30, %v3886_v36 }
 0xf1a   :  { %3901 = vrot.lane.b32.xlu0 %v3821_v0, %s5782_s27  ;;  %3895 = vrot.lane.b32.xlu1 %v3888_v1, %s5771_s10 }
 0xf1e   :  { %3909 = vrot.lane.b32.xlu0 %v3822_v15, %s5783_s28  ;;  %3903 = vrot.lane.b32.xlu1 %v3889_v26, %s5782_s27 }
 0xf22   :  { %3921 = vrot.lane.b32.xlu0 %v6539_v13, %s5776_s1  ;;  %3911 = vrot.lane.b32.xlu1 %v3890_v61, %s5783_s28 }
 0xf26   :  { %4075 = vrot.lane.b32.xlu0 %v6539_v13, %s5775_s20  ;;  %3997 = vrot.lane.b32.xlu1 %v6541_v19, %s5776_s1 }
 0xf2a   :  { %4152 = vrot.lane.b32.xlu0 %v6541_v19, %s5775_s20 }
 0xf2e   :  { %4229 = vrot.lane.b32.xlu0 %v6539_v13, %s5778_s22 }
 0xf32   :  { %4306 = vrot.lane.b32.xlu0 %v6541_v19, %s5778_s22 }
 0xf36   :  { %4383 = vrot.lane.b32.xlu0 %v6539_v13, %s5780_s25 }
 0xf3a   :  { %4460 = vrot.lane.b32.xlu0 %v6541_v19, %s5780_s25 }
 0xf3e   :  { %5511 = vrot.lane.b32.xlu0 %v5510_v20, %s5792_s18  ;;  %v76_v20 = vld [vmem:[%s7130_s3 + $0x58] sm:$0xff] }
 0xf88   :  { %v3894_v42 = vpop.permute.xlu0 %3893 }
 0xf89   :  { %v3915_v22 = vsel %vm7263_vm2, %v3819_v31, %v3894_v42  ;;  %vm7279_vm2 = vmmov %vm7267_vm8 }
 0xf8c   :  { %v3902_v59 = vpop.permute.xlu0 %3901  ;;  %v3896_v8 = vpop.permute.xlu1 %3895 }
 0xf8d   :  { %v3916_v6 = vsel %vm7264_vm15, %v3887_v24, %v3896_v8  ;;  %v3917_v35 = vsel %vm7265_vm3, %v3915_v22, %v3902_v59  ;;  %vm7280_vm15 = vcmask 261120   ;;  %vm7281_vm3 = vmmov %vm7273_vm0 }
 0xf90   :  { %v3910_v25 = vpop.permute.xlu0 %3909  ;;  %v3904_v37 = vpop.permute.xlu1 %3903 }
 0xf91   :  { %v3918_v32 = vsel %vm7266_vm12, %v3916_v6, %v3904_v37  ;;  %v6948_v13 = vsel %vm7267_vm8, %v3917_v35, %v3910_v25  ;;  %vm7282_vm8 = vmmov %vm7279_vm2 }
 0xf94   :  { %v3922_v60 = vpop.permute.xlu0 %3921  ;;  %v3912_v14 = vpop.permute.xlu1 %3911 }
 0xf95   :  { %v6951_v19 = vsel %vm7268_vm14, %v3918_v32, %v3912_v14  ;;  %5320 = vmatpush3.msra.mxu0 %v3922_v60  ;;  %vm7283_vm14 = vmmov %vm7280_vm15  ;;  %v5032_v32 = vld [vmem:[%s7132_s5 + $0x4] ss:$0 sm:$0xff] }
 0xf96   :  { %5322 = vmatmul.mubr.msk.f32.vlgmr.msra.gmra.mrb[24].mxu0 %vm7269_vm5, %v6948_v13  ;;  %4150 = vrot.lane.b32.xlu1 %v6951_v19, %s5777_s21  ;;  %vm7284_vm5 = vmmov %vm7283_vm14 }
 0xf97   :  { %5329 = vmatprep.subr.mxu0 %v5773_v9  ;;  %5331 = vmatprep.mubr.msk.f32.mxu0 %vm7196_vm9, %v5773_v9 }
 0xf98   :  { %v4076_v12 = vpop.permute.xlu0 %4075  ;;  %v3998_v4 = vpop.permute.xlu1 %3997 }
 0xf99   :  { %5325 = vmatpush3.msra.mxu1 %v3998_v4  ;;  %5330 = vmatpush3.msra.mxu0 %v4076_v12 }
 0xf9a   :  { %4304 = vrot.lane.b32.xlu1 %v6951_v19, %s5779_s23  ;;  %5327 = vmatmul.mubr.msk.f32.vlgmr.msra.gmra.mrb[32].mxu1 %vm7270_vm11, %v6951_v19  ;;  %vm7285_vm11 = vmmov %vm7284_vm5 }
 0xf9b   :  { %5334 = vmatprep.subr.mxu1 %v5773_v9  ;;  %5336 = vmatprep.mubr.msk.f32.mxu1 %vm7196_vm9, %v5773_v9 }
 0xf9c   :  { %v4153_v51 = vpop.permute.xlu0 %4152  ;;  %5339 = vmatprep.subr.mxu0 %v5773_v9 }
 0xf9d   :  { %5335 = vmatpush3.msra.mxu1 %v4153_v51 }
 0xf9e   :  { %4073 = vrot.lane.b32.xlu1 %v6948_v13, %s5777_s21  ;;  %5344 = vmatprep.subr.mxu1 %v5773_v9 }
 0xfa0   :  { %v4230_v10 = vpop.permute.xlu0 %4229 }
 0xfa2   :  { %4227 = vrot.lane.b32.xlu1 %v6948_v13, %s5779_s23 }
 0xfa4   :  { %v4307_v11 = vpop.permute.xlu0 %4306 }
 0xfa6   :  { %4381 = vrot.lane.b32.xlu1 %v6948_v13, %s5781_s26 }
 0xfa8   :  { %v4384_v62 = vpop.permute.xlu0 %4383 }
 0xfaa   :  { %4458 = vrot.lane.b32.xlu1 %v6951_v19, %s5781_s26 }
 0xfac   :  { %v4461_v18 = vpop.permute.xlu0 %4460 }
 0xfae   :  { %5516 = vrot.lane.b32.xlu1 %v5515_v23, %s5792_s18 }
 0xfb0   :  { %v5512_v47 = vpop.permute.xlu0 %5511 }
 0xfb1   :  { %v5514_v56 = vunpack.i.h.bf16 %v5512_v47  ;;  %v5513_v27 = vunpack.i.l.bf16 %v5512_v47 }
 0xfb3   :  { %v5432_v63 = vpack.c.bf16 %v5514_v56, %v5513_v27  ;;  %v5035_v56 = vld [vmem:[%s7132_s5 + $0x9] ss:$0 sm:$0xff] }
0x1008   :  { %v4151_v17 = vpop.permute.xlu1 %4150 }
0x1009   :  { %5337 = vmatmul.mubr.msk.f32.vlgmr.msra.gmra.mrb[34].mxu1 %vm7271_vm10, %v4151_v17  ;;  %vm7286_vm10 = vmmov %vm7284_vm5 }
0x100a   :  { %5345 = vmatpush3.msra.mxu1 %v4307_v11  ;;  %5346 = vmatprep.mubr.msk.f32.mxu1 %vm7196_vm9, %v5773_v9 }
0x100b   :  { %5354 = vmatprep.subr.mxu1 %v5773_v9 }
0x100c   :  { %v4305_v40 = vpop.permute.xlu1 %4304 }
0x100d   :  { %5347 = vmatmul.mubr.msk.f32.vlgmr.msra.gmra.mrb[36].mxu1 %vm7272_vm6, %v4305_v40  ;;  %vm7287_vm6 = vmmov %vm7284_vm5 }
0x100e   :  { %5355 = vmatpush3.msra.mxu1 %v4461_v18  ;;  %5356 = vmatprep.mubr.msk.f32.mxu1 %vm7196_vm9, %v5773_v9 }
0x1010   :  { %v4074_v7 = vpop.permute.xlu1 %4073 }
0x1011   :  { %5332 = vmatmul.mubr.msk.f32.vlgmr.msra.gmra.mrb[26].mxu0 %vm7273_vm0, %v4074_v7 }
0x1012   :  { %5340 = vmatpush3.msra.mxu0 %v4230_v10  ;;  %5341 = vmatprep.mubr.msk.f32.mxu0 %vm7196_vm9, %v5773_v9 }
0x1013   :  { %5349 = vmatprep.subr.mxu0 %v5773_v9 }
0x1014   :  { %v4228_v41 = vpop.permute.xlu1 %4227 }
0x1015   :  { %5342 = vmatmul.mubr.msk.f32.vlgmr.msra.gmra.mrb[28].mxu0 %vm7274_vm1, %v4228_v41 }
0x1016   :  { %5350 = vmatpush3.msra.mxu0 %v4384_v62  ;;  %5351 = vmatprep.mubr.msk.f32.mxu0 %vm7196_vm9, %v5773_v9  ;;  %vm7277_vm9 = vmmov %vm7273_vm0 }
0x1017   :  { %5433 = vmatprep.subr.bf16.mxu0 %v5432_v63  ;;  %vm7288_vm0 = vmmov %vm7284_vm5 }
0x1018   :  { %v4382_v38 = vpop.permute.xlu1 %4381  ;;  %vm7289_vm1 = vmmov %vm7288_vm0 }
0x1019   :  { %5352 = vmatmul.mubr.msk.f32.vlgmr.msra.gmra.mrb[30].mxu0 %vm7275_vm7, %v4382_v38  ;;  %vm4809_vm7 = vcmask 523264  }
0x101a   :  { %5435 = vmatpush3.bf16.msra.mxu0 %v5432_v63 }
0x101c   :  { %v4459_v5 = vpop.permute.xlu1 %4458 }
0x101d   :  { %5357 = vmatmul.mubr.msk.f32.vlgmr.msra.gmra.mrb[38].mxu1 %vm7276_vm4, %v4459_v5  ;;  %v74_v5 = vld [vmem:[%s7130_s3 + $0x28] sm:$0xff]  ;;  %vm7290_vm4 = vmmov %vm7288_vm0 }
0x1020   :  { %v5517_v28 = vpop.permute.xlu1 %5516 }
0x1021   :  { %v5519_v2 = vunpack.i.h.bf16 %v5517_v28  ;;  %v5518_v16 = vunpack.i.l.bf16 %v5517_v28 }
0x1023   :  { %v5436_v49 = vpack.c.bf16 %v5519_v2, %v5518_v16 }
0x1025   :  { %5437 = vmatprep.subr.bf16.mxu0 %v5436_v49 }
0x1026   :  { %5439 = vmatpush3.bf16.msra.mxu0 %v5436_v49  ;;  %v5036_v49 = vld [vmem:[%s7132_s5 + $0xa] ss:$0 sm:$0xff] }
0x1069   :  { %v3993_v45 = vpop.f32.mrb[24].mxu0 }
0x106a   :  { %v5323_v48 = vpop.f32.mrb[25].mxu0 }
0x106d   :  { %v4069_v9 = vpop.f32.mrb[32].mxu1 }
0x106e   :  { %v5328_v55 = vpop.f32.mrb[33].mxu1 }
0x10dc   :  { %v4223_v43 = vpop.f32.mrb[34].mxu1 }
0x10dd   :  { %4539 = vrot.lane.b32.xlu1 %v4223_v43, %s5771_s10  ;;  %v5338_v29 = vpop.f32.mrb[35].mxu1 }
0x10e0   :  { %v4377_v21 = vpop.f32.mrb[36].mxu1 }
0x10e1   :  { %4547 = vrot.lane.b32.xlu1 %v4377_v21, %s5782_s27  ;;  %v5348_v31 = vpop.f32.mrb[37].mxu1 }
0x10e4   :  { %v4146_v44 = vpop.f32.mrb[26].mxu0 }
0x10e5   :  { %4537 = vrot.lane.b32.xlu0 %v4146_v44, %s5771_s10  ;;  %v5333_v3 = vpop.f32.mrb[27].mxu0 }
0x10e6   :  { %v77_v3 = vld [vmem:[%s7131_s4] sm:$0xff] }
0x10e8   :  { %v4300_v57 = vpop.f32.mrb[28].mxu0 }
0x10e9   :  { %4545 = vrot.lane.b32.xlu0 %v4300_v57, %s5782_s27  ;;  %v5343_v50 = vpop.f32.mrb[29].mxu0  ;;  %v78_v57 = vld [vmem:[%s7131_s4 + $0x8] sm:$0xff] }
0x10ea   :  { %v79_v50 = vld [vmem:[%s7131_s4 + $0x10] sm:$0xff] }
0x10ec   :  { %v4454_v36 = vpop.f32.mrb[30].mxu0 }
0x10ed   :  { %4553 = vrot.lane.b32.xlu0 %v4454_v36, %s5783_s28  ;;  %v5353_v0 = vpop.f32.mrb[31].mxu0  ;;  %v5448_v36 = vpack.c.bf16 %v78_v57, %v77_v3  ;;  %v5043_v57 = vld [vmem:[%s7132_s5 + $0xb] ss:$0 sm:$0xff] }
0x10ee   :  { %v80_v0 = vld [vmem:[%s7131_s4 + $0x18] sm:$0xff] }
0x10ef   :  { %5449 = vmatprep.subr.bf16.mxu0 %v5448_v36 }
0x10f0   :  { %v4531_v1 = vpop.f32.mrb[38].mxu1 }
0x10f1   :  { %4555 = vrot.lane.b32.xlu1 %v4531_v1, %s5783_s28  ;;  %v5358_v24 = vpop.f32.mrb[39].mxu1  ;;  %v5452_v1 = vpack.c.bf16 %v80_v0, %v79_v50 }
0x10f2   :  { %v81_v24 = vld [vmem:[%s7131_s4 + $0x20] sm:$0xff] }
0x114f   :  { %v4540_v15 = vpop.permute.xlu1 %4539 }
0x1150   :  { %v4560_v37 = vsel %vm7281_vm3, %v4069_v9, %v4540_v15  ;;  %vm7294_vm3 = vmmov %vm7288_vm0 }
0x1153   :  { %v4548_v42 = vpop.permute.xlu1 %4547 }
0x1154   :  { %v4562_v22 = vsel %vm7266_vm12, %v4560_v37, %v4548_v42  ;;  %vm7295_vm12 = vmmov %vm7288_vm0 }
0x1157   :  { %v4538_v30 = vpop.permute.xlu0 %4537 }
0x1158   :  { %v4559_v61 = vsel %vm7277_vm9, %v3993_v45, %v4538_v30  ;;  %v5444_v45 = vpack.c.bf16 %v76_v20, %v75_v52  ;;  %v82_v30 = vld [vmem:[%s7131_s4 + $0x28] sm:$0xff]  ;;  %vm7291_vm9 = vmmov %vm7288_vm0 }
0x1159   :  { %v5456_v15 = vpack.c.bf16 %v82_v30, %v81_v24 }
0x115b   :  { %v4546_v26 = vpop.permute.xlu0 %4545 }
0x115c   :  { %v4561_v59 = vsel %vm7278_vm13, %v4559_v61, %v4546_v26  ;;  %v83_v26 = vld [vmem:[%s7131_s4 + $0x30] sm:$0xff]  ;;  %v84_v61 = vld [vmem:[%s7131_s4 + $0x38] sm:$0xff]  ;;  %vm7292_vm13 = vmmov %vm7288_vm0 }
0x115d   :  { %v5460_v42 = vpack.c.bf16 %v84_v61, %v83_v26 }
0x115f   :  { %v4554_v8 = vpop.permute.xlu0 %4553 }
0x1160   :  { %v4563_v25 = vsel %vm7279_vm2, %v4561_v59, %v4554_v8  ;;  %v5037_v59 = vld [vmem:[%s7132_s5 + $0x5] ss:$0 sm:$0xff]  ;;  %vm7293_vm2 = vmmov %vm7288_vm0 }
0x1161   :  { %5367 = vmatprep.mubr.msk.f32.mxu0 %vm7280_vm15, %v4563_v25  ;;  %vm4947_vm15 = vcmask 785408  }
0x1163   :  { %v4556_v6 = vpop.permute.xlu1 %4555 }
0x1164   :  { %v4564_v35 = vsel %vm7282_vm8, %v4562_v22, %v4556_v6 }
0x1165   :  { %5368 = vmatmul.mubr.msk.f32.vlgmr.msra.gmra.mrb[32].mxu0 %vm7283_vm14, %v4564_v35 }
0x1166   :  { %5451 = vmatpush3.bf16.msra.mxu0 %v5448_v36 }
0x1167   :  { %5453 = vmatprep.subr.bf16.mxu0 %v5452_v1 }
0x116a   :  { %5455 = vmatpush3.bf16.msra.mxu0 %v5452_v1 }
0x116b   :  { %5457 = vmatprep.subr.bf16.mxu0 %v5456_v15 }
0x116e   :  { %5459 = vmatpush3.bf16.msra.mxu0 %v5456_v15 }
0x116f   :  { %5461 = vmatprep.subr.bf16.mxu0 %v5460_v42 }
0x1172   :  { %5463 = vmatpush3.bf16.msra.mxu0 %v5460_v42 }
0x1238   :  { %v5369_v60 = vpop.f32.mrb[32].mxu0 }
0x1239   :  { %v7024_v14 = vadd.f32 %v5369_v60, %v5032_v32  ;;  %v4653_v12 = vpop.f32.mrb[33].mxu0 }
0x123a   :  { %v7026_v4 = vadd.f32 %v5032_v32, %v4653_v12 }
0x123b   :  { %v4663_v51 = vadd.f32 %v7024_v14, %v6564_v39 }
0x123c   :  { %v4662_v58 = vadd.f32 %v7026_v4, %v6562_v33  ;;  %v73_v33 = vld [vmem:[%s7130_s3 + $0x10] sm:$0xff] }
0x123d   :  { %v4667_v34 = vsel %vm7284_vm5, %v4663_v51, 0.0  ;;  %v5440_v46 = vpack.c.bf16 %v74_v5, %v73_v33 }
0x123e   :  { %4668 = vadd.xlane.f32.xlu1 %v4667_v34  ;;  %v4664_v23 = vsel %vm7285_vm11, %v4662_v58, 0.0 }
0x123f   :  { %4665 = vadd.xlane.f32.xlu0 %v4664_v23  ;;  %5441 = vmatprep.subr.bf16.mxu1 %v5440_v46 }
0x1240   :  { %5443 = vmatpush3.bf16.msra.mxu1 %v5440_v46 }
0x1241   :  { %5445 = vmatprep.subr.bf16.mxu1 %v5444_v45 }
0x1244   :  { %5447 = vmatpush3.bf16.msra.mxu1 %v5444_v45 }
0x12cb   :  { %v4669_v10 = vpop.xlane.xlu1 %4668 }
0x12cc   :  { %v4671_v11 = vmul.f32 0.03125, %v4669_v10  ;;  %v4666_v62 = vpop.xlane.xlu0 %4665 }
0x12cd   :  { %v4670_v17 = vmul.f32 0.03125, %v4666_v62 }
0x12ce   :  { %v4673_v40 = vsub.f32 %v4663_v51, %v4671_v11 }
0x12cf   :  { %v4672_v18 = vsub.f32 %v4662_v58, %v4670_v17 }
0x12d0   :  { %v4675_v38 = vmul.f32 %v4673_v40, %v4673_v40 }
0x12d1   :  { %v4674_v7 = vmul.f32 %v4672_v18, %v4672_v18 }
0x12d2   :  { %v4679_v39 = vsel %vm7287_vm6, %v4675_v38, 0.0 }
0x12d3   :  { %v4676_v41 = vsel %vm7286_vm10, %v4674_v7, 0.0 }
0x12d4   :  { %4677 = vadd.xlane.f32.xlu0 %v4676_v41 }
0x12d8   :  { %4680 = vadd.xlane.f32.xlu0 %v4679_v39  ;;  %v5040_v39 = vld [vmem:[%s7132_s5 + $0x6] ss:$0 sm:$0xff] }
0x1361   :  { %v4678_v48 = vpop.xlane.xlu0 %4677 }
0x1362   :  { %v4682_v9 = vmul.f32 0.03125, %v4678_v48 }
0x1364   :  { %v4684_v55 = vadd.f32 1e-05, %v4682_v9 }
0x1365   :  { %v4681_v28 = vpop.xlane.xlu0 %4680 }
0x1366   :  { %5654 = vrsqrt.f32 %v4684_v55  ;;  %v4683_v2 = vmul.f32 0.03125, %v4681_v28 }
0x1368   :  { %v4685_v16 = vadd.f32 1e-05, %v4683_v2 }
0x136a   :  { %5656 = vrsqrt.f32 %v4685_v16 }
0x1370   :  { %v5655_v47 = vpop.eup %5654 }
0x1371   :  { %v4688_v27 = vmul.f32 %v5655_v47, %v4672_v18 }
0x1373   :  { %v4694_v63 = vmul.f32 %v5035_v56, %v4688_v27 }
0x1374   :  { %v5657_v43 = vpop.eup %5656 }
0x1375   :  { %v4689_v29 = vmul.f32 %v5657_v43, %v4673_v40  ;;  %v4700_v21 = vadd.f32 %v5036_v49, %v4694_v63 }
0x1377   :  { %v4695_v31 = vmul.f32 %v5035_v56, %v4689_v29  ;;  %5378 = vmatprep.mubr.msk.f32.mxu1 %vm7288_vm0, %v4700_v21 }
0x1379   :  { %v4701_v44 = vadd.f32 %v5036_v49, %v4695_v31 }
0x137b   :  { %5379 = vmatmul.mubr.msk.f32.vlgmr.msra.gmra.mrb[40].mxu1 %vm7289_vm1, %v4701_v44 }
0x144e   :  { %v5380_v8 = vpop.f32.mrb[40].mxu1 }
0x144f   :  { %v4784_v25 = vadd.f32 %v5380_v8, %v5037_v59  ;;  %v4778_v37 = vpop.f32.mrb[41].mxu1 }
0x1450   :  { %v4779_v22 = vadd.f32 %v5037_v59, %v4778_v37 }
0x1451   :  { %v4790_v6 = vmul.f32 0.044715, %v4784_v25  ;;  %v4788_v7 = vmul.f32 0.5, %v4784_v25 }
0x1452   :  { %v4789_v35 = vmul.f32 0.044715, %v4779_v22  ;;  %v4787_v40 = vmul.f32 0.5, %v4779_v22 }
0x1453   :  { %v4792_v32 = vmul.f32 %v4790_v6, %v4784_v25 }
0x1454   :  { %v4791_v60 = vmul.f32 %v4789_v35, %v4779_v22 }
0x1455   :  { %v4794_v12 = vmul.f32 %v4792_v32, %v4784_v25 }
0x1456   :  { %v4793_v51 = vmul.f32 %v4791_v60, %v4779_v22 }
0x1457   :  { %v4796_v58 = vadd.f32 %v4794_v12, %v4784_v25 }
0x1458   :  { %v4795_v34 = vadd.f32 %v4793_v51, %v4779_v22 }
0x1459   :  { %v4798_v23 = vmul.f32 0.7978846, %v4796_v58 }
0x145a   :  { %v4797_v10 = vmul.f32 0.7978846, %v4795_v34 }
0x145b   :  { %5658 = vtanh.f32 %v4798_v23 }
0x145c   :  { %5660 = vtanh.f32 %v4797_v10 }
0x1465   :  { %v5659_v11 = vpop.eup %5658 }
0x1466   :  { %v5661_v62 = vpop.eup %5660  ;;  %v4802_v17 = vadd.f32 1.0, %v5659_v11 }
0x1467   :  { %v4801_v18 = vadd.f32 1.0, %v5661_v62 }
0x1468   :  { %v4804_v38 = vmul.f32 %v4802_v17, %v4788_v7 }
0x1469   :  { %v4803_v41 = vmul.f32 %v4801_v18, %v4787_v40 }
0x146b   :  { %5397 = vmatprep.mubr.msk.f32.mxu0 %vm4809_vm7, %v4803_v41 }
0x146c   :  { %5398 = vmatmul.mubr.msk.f32.vlgmr.msra.gmra.mrb[34].mxu0 %vm4809_vm7, %v4804_v38 }
0x153f   :  { %v5399_v33 = vpop.f32.mrb[34].mxu0 }
0x1540   :  { %v4888_v5 = vadd.f32 %v5399_v33, %v5040_v39  ;;  %v4882_v52 = vpop.f32.mrb[35].mxu0 }
0x1541   :  { %v4883_v46 = vadd.f32 %v5040_v39, %v4882_v52 }
0x1542   :  { %v4892_v20 = vadd.f32 %v4888_v5, %v7024_v14 }
0x1543   :  { %v4891_v45 = vadd.f32 %v4883_v46, %v7026_v4 }
0x1544   :  { %v4896_v48 = vsel %vm7290_vm4, %v4892_v20, 0.0 }
0x1545   :  { %4897 = vadd.xlane.f32.xlu0 %v4896_v48  ;;  %v4893_v9 = vsel %vm7291_vm9, %v4891_v45, 0.0 }
0x1546   :  { %4894 = vadd.xlane.f32.xlu1 %v4893_v9 }
0x1557   :  { %4931 = vrot.lane.b32.xlu1 %v6422_v54, %s5792_s18 }
0x155b   :  { %4937 = vrot.lane.b32.xlu1 %v6948_v13, %s5788_s29 }
0x15d2   :  { %v4898_v55 = vpop.xlane.xlu0 %4897 }
0x15d3   :  { %v4900_v28 = vmul.f32 0.03125, %v4898_v55  ;;  %v4895_v2 = vpop.xlane.xlu1 %4894 }
0x15d4   :  { %v4899_v16 = vmul.f32 0.03125, %v4895_v2 }
0x15d5   :  { %v4902_v47 = vsub.f32 %v4892_v20, %v4900_v28 }
0x15d6   :  { %v4901_v14 = vsub.f32 %v4891_v45, %v4899_v16 }
0x15d7   :  { %v4904_v56 = vmul.f32 %v4902_v47, %v4902_v47  ;;  %v4932_v54 = vpop.permute.xlu1 %4931 }
0x15d8   :  { %v4903_v4 = vmul.f32 %v4901_v14, %v4901_v14 }
0x15d9   :  { %v4908_v27 = vsel %vm7292_vm13, %v4904_v56, 0.0 }
0x15da   :  { %4909 = vadd.xlane.f32.xlu0 %v4908_v27  ;;  %v4905_v49 = vsel %vm7293_vm2, %v4903_v4, 0.0 }
0x15db   :  { %4906 = vadd.xlane.f32.xlu1 %v4905_v49  ;;  %v4938_v13 = vpop.permute.xlu1 %4937 }
0x15ec   :  { %4939 = vrot.lane.b32.xlu1 %v6951_v19, %s5788_s29 }
0x15f0   :  { %4933 = vrot.lane.b32.xlu0 %v6429_v53, %s5792_s18  ;;  %v5044_v53 = vld [vmem:[%s7132_s5 + $0xc] ss:$0 sm:$0xff]  ;;  %s5793_s18 = smov [#allocation8]  }
0x15f1   :  { %s4957_s3 = sshll.u32 %s5793_s18, 4  ;;  %s4958_s3 = int_to_ptr.vmem [resolvable:$true] %s4957_s3 }
0x15f2   :  { %s5740_s5 = scalar_lea.vmem %s4958_s3, 256  ;;  %p5745_p11 = scmp.lt.s32.totalorder %s4958_s3, %s4958_s3 }
0x15f3   :  { %p5741_p10 = scmp.ne.s32.totalorder %s4958_s3, %s5740_s5  ;;  %p5746_p12 = scmp.lt.s32.totalorder %s5740_s5, %s5740_s5 }
0x15f5   :  { %p5747_p13 = por %p5746_p12, %p5745_p11 }
0x15f7   :  { %p5748_p0 = pnand %p5747_p13, %p5741_p10 }
0x1667   :  { %v4910_v63 = vpop.xlane.xlu0 %4909 }
0x1668   :  { %v4912_v43 = vmul.f32 0.03125, %v4910_v63  ;;  %v4907_v29 = vpop.xlane.xlu1 %4906 }
0x1669   :  { %v4911_v21 = vmul.f32 0.03125, %v4907_v29 }
0x166a   :  { %v4914_v31 = vadd.f32 1e-05, %v4912_v43 }
0x166b   :  { %v4913_v44 = vadd.f32 1e-05, %v4911_v21  ;;  %v4934_v30 = vpop.permute.xlu0 %4933 }
0x166c   :  { %5662 = vrsqrt.f32 %v4914_v31  ;;  %v4940_v61 = vpop.permute.xlu1 %4939 }
0x166d   :  { %5664 = vrsqrt.f32 %v4913_v44 }
0x1676   :  { %v5663_v3 = vpop.eup %5662 }
0x1677   :  { %v5665_v50 = vpop.eup %5664  ;;  %v4918_v19 = vmul.f32 %v5663_v3, %v4902_v47 }
0x1678   :  { %v4917_v36 = vmul.f32 %v5665_v50, %v4901_v14 }
0x1679   :  { %v4924_v0 = vmul.f32 %v5043_v57, %v4918_v19 }
0x167a   :  { %v4923_v1 = vmul.f32 %v5043_v57, %v4917_v36 }
0x167b   :  { %v4930_v24 = vadd.f32 %v5044_v53, %v4924_v0 }
0x167c   :  { %v4929_v15 = vadd.f32 %v5044_v53, %v4923_v1 }
0x167d   :  { %v4944_v26 = vsel %vm7294_vm3, %v4930_v24, %v4934_v30 }
0x167e   :  { %v4946_v42 = vsel %vm4809_vm7, %v4944_v26, %v4940_v61  ;;  %v4943_v59 = vsel %vm7295_vm12, %v4929_v15, %v4932_v54 }
0x167f   :  { %v4949_v8 = vsel %vm4947_vm15, %v4946_v42, 0.0  ;;  %v4945_v25 = vsel %vm4809_vm7, %v4943_v59, %v4938_v13 }
0x1680   :  { %4951 = vst [vmem:[#allocation8 + $0x8] sm:$0xff] %v4949_v8  ;;  %v4948_v37 = vsel %vm4947_vm15, %v4945_v25, 0.0 }
0x1681   :  { %4950 = vst [vmem:[#allocation8] sm:$0xff] %v4948_v37 }
0x1682   :  { %5751 = shalt.err (!%p5748_p0)
}
0x1683   :  { %s5752_s16 = scalar_lea.hbm %s7133_s6, 256 }
0x1684   :  { %p5753_p1 = scmp.ne.s32.totalorder %s7133_s6, %s5752_s16  ;;  %p5756_p2 = scmp.lt.u32.totalorder %s5752_s16, %s7133_s6 }
0x1686   :  { %p5758_p3 = pnand %p5756_p2, %p5753_p1 }
0x1688   :  { %5761 = shalt.err (!%p5758_p3)
}
0x1689   :  { %4963 = dma.vmem_to_hbm [thread:$0]  %s4958_s3, 256, %s7133_s6, [#allocation4], %s5770_s9, %s5770_s9, %s5771_s10  }
0x168a   :  { %5766 = dma.done.wait [#allocation4], 256  }
0x168b   :  { %5767 = vsyncadd [#allocation4], 4294967040 }
0x168c   :  { %4967 = vsyncpa [#allocation3], 1 }
0x168d   :  { %4968 = vsyncpa [#allocation6], 1 }
0x168e   :  { %4969 = vsyncpa [#allocation4], 1 }

</bundles_post_ra>
